<compile_context>
chip_gen: v6e
topology: v6e:2x2x1
jax: 0.10.0
libtpu: 0.0.40
codegen_flags: <defaults>
</compile_context>

<pallas_src>
import functools

import jax
import jax.numpy as jnp
from jax.experimental import pallas as pl
from jax.experimental.pallas import tpu as pltpu

EPS = 1e-5
_VMEM_LIMIT = 32 * 1024 * 1024


# ---------------------------------------------------------------------------
# Pass 1 / 2 kernel:  y = conv3x3( act(x) ),  stats += [sum(y), sum(y*y)]
#   act(x) = relu(x * scale + shift)   if apply_act   (fused bn+relu of prev layer)
#          = x                          otherwise
# One grid step == one batch image.
# ---------------------------------------------------------------------------
def _conv_stats_kernel(x_ref, w_ref, scale_ref, shift_ref,
                       y_ref, stats_ref, pad_ref, *, apply_act):
    _, H, W, Cin = x_ref.shape
    Cout = w_ref.shape[-1]
    step = pl.program_id(0)

    # Zero only the 1-wide halo of the padded scratch, once (scratch persists
    # across grid steps; the interior is overwritten every step).
    @pl.when(step == 0)
    def _():
        zrow = jnp.zeros((1, W + 2, Cin), pad_ref.dtype)
        zcol = jnp.zeros((H + 2, 1, Cin), pad_ref.dtype)
        pad_ref[0:1, :, :] = zrow
        pad_ref[H + 1:H + 2, :, :] = zrow
        pad_ref[:, 0:1, :] = zcol
        pad_ref[:, W + 1:W + 2, :] = zcol

    # Fill interior; fuse the previous layer's BN affine + ReLU when requested.
    xin = x_ref[0]                                   # (H, W, Cin) f32
    if apply_act:
        sc = scale_ref[...].reshape(1, 1, Cin)
        sh = shift_ref[...].reshape(1, 1, Cin)
        xin = jnp.maximum(xin * sc + sh, 0.0)
    pad_ref[1:H + 1, 1:W + 1, :] = xin

    # im2col: one MXU dot with K = 9*Cin instead of nine K = Cin dots.
    patch = jnp.concatenate(
        [pad_ref[dy:dy + H, dx:dx + W, :] for dy in range(3) for dx in range(3)],
        axis=-1,
    ).reshape(H * W, 9 * Cin).astype(jnp.bfloat16)
    acc = jnp.dot(patch, w_ref[...], preferred_element_type=jnp.float32)

    y_ref[...] = acc.reshape(1, H, W, Cout)

    # Fused per-channel sum / sum-of-squares (single pass), accumulated over
    # the grid in the resident stats output block.
    ssum = jnp.sum(acc, axis=0, keepdims=True)          # (1, Cout)
    ssq = jnp.sum(acc * acc, axis=0, keepdims=True)     # (1, Cout)
    st = jnp.concatenate([ssum, ssq], axis=0)           # (2, Cout)

    @pl.when(step == 0)
    def _():
        stats_ref[...] = st

    @pl.when(step > 0)
    def _():
        stats_ref[...] = stats_ref[...] + st


def _conv3x3_bn_stats(x, wflat, scale, shift, *, apply_act):
    N, H, W, Cin = x.shape
    Cout = wflat.shape[-1]
    flops = 2 * N * H * W * 9 * Cin * Cout
    bytes_accessed = (N * H * W * Cin * 4 + 9 * Cin * Cout * 2
                      + N * H * W * Cout * 4 + (2 + 2) * Cout * 4)

    kernel = functools.partial(_conv_stats_kernel, apply_act=apply_act)
    return pl.pallas_call(
        kernel,
        grid=(N,),
        in_specs=[
            pl.BlockSpec((1, H, W, Cin), lambda i: (i, 0, 0, 0)),
            pl.BlockSpec((9 * Cin, Cout), lambda i: (0, 0)),
            pl.BlockSpec((1, Cin), lambda i: (0, 0)),
            pl.BlockSpec((1, Cin), lambda i: (0, 0)),
        ],
        out_specs=(
            pl.BlockSpec((1, H, W, Cout), lambda i: (i, 0, 0, 0)),
            pl.BlockSpec((2, Cout), lambda i: (0, 0)),
        ),
        out_shape=(
            jax.ShapeDtypeStruct((N, H, W, Cout), jnp.float32),
            jax.ShapeDtypeStruct((2, Cout), jnp.float32),
        ),
        scratch_shapes=[pltpu.VMEM((H + 2, W + 2, Cin), jnp.float32)],
        compiler_params=pltpu.CompilerParams(
            dimension_semantics=("arbitrary",),   # stats accumulate across grid
            vmem_limit_bytes=_VMEM_LIMIT),
        cost_estimate=pl.CostEstimate(flops=flops, transcendentals=0,
                                      bytes_accessed=bytes_accessed),
    )(x, wflat, scale, shift)


# ---------------------------------------------------------------------------
# Pass 3 kernel:  out = relu( y * scale + shift + x )   (bn2 + residual + relu)
# ---------------------------------------------------------------------------
def _residual_bn_relu_kernel(y_ref, x_ref, scale_ref, shift_ref, o_ref):
    C = o_ref.shape[-1]
    sc = scale_ref[...].reshape(1, 1, 1, C)
    sh = shift_ref[...].reshape(1, 1, 1, C)
    out = y_ref[...] * sc + sh + x_ref[...]
    o_ref[...] = jnp.maximum(out, 0.0).astype(o_ref.dtype)


def _residual_bn_relu(y, x, scale, shift):
    N, H, W, C = x.shape
    return pl.pallas_call(
        _residual_bn_relu_kernel,
        grid=(N,),
        in_specs=[
            pl.BlockSpec((1, H, W, C), lambda i: (i, 0, 0, 0)),
            pl.BlockSpec((1, H, W, C), lambda i: (i, 0, 0, 0)),
            pl.BlockSpec((1, C), lambda i: (0, 0)),
            pl.BlockSpec((1, C), lambda i: (0, 0)),
        ],
        out_specs=pl.BlockSpec((1, H, W, C), lambda i: (i, 0, 0, 0)),
        out_shape=jax.ShapeDtypeStruct((N, H, W, C), x.dtype),
        compiler_params=pltpu.CompilerParams(
            dimension_semantics=("parallel",),    # pure elementwise -> megacore OK
            vmem_limit_bytes=_VMEM_LIMIT),
    )(y, x, scale, shift)


# ---------------------------------------------------------------------------
# Wrapper
# ---------------------------------------------------------------------------
def _bn_scale_shift(stats, gamma, beta, count):
    """Training-mode BN (biased variance) folded into per-channel scale/shift."""
    s = stats[0]
    sq = stats[1]
    mean = s / count
    var = jnp.maximum(sq / count - mean * mean, 0.0)
    inv = jax.lax.rsqrt(var + EPS)
    scale = gamma.reshape(-1) * inv
    shift = beta.reshape(-1) - mean * scale
    return scale.reshape(1, -1).astype(jnp.float32), shift.reshape(1, -1).astype(jnp.float32)


@jax.jit
def basic_block(x_nchw, w1, g1, b1, w2, g2, b2):
    """BasicBlock forward. x_nchw: (N, C, H, W) f32, weights HWIO. Returns NCHW."""
    N, C, H, W = x_nchw.shape
    Cout = w1.shape[-1]
    count = N * H * W

    x = jnp.transpose(x_nchw, (0, 2, 3, 1))                   # NHWC
    # Pre-flatten weights to (9*Cin, Cout) for the im2col dot, cast to bf16.
    w1f = w1.reshape(9 * C, Cout).astype(jnp.bfloat16)
    w2f = w2.reshape(9 * Cout, Cout).astype(jnp.bfloat16)
    ones = jnp.ones((1, C), jnp.float32)
    zeros = jnp.zeros((1, C), jnp.float32)

    # pass 1: conv1 + stats of its output
    y1, st1 = _conv3x3_bn_stats(x, w1f, ones, zeros, apply_act=False)
    sc1, sh1 = _bn_scale_shift(st1, g1, b1, count)

    # pass 2: conv2( relu(bn1(y1)) ) + stats of its output (bn1+relu fused in-kernel)
    y2, st2 = _conv3x3_bn_stats(y1, w2f, sc1, sh1, apply_act=True)
    sc2, sh2 = _bn_scale_shift(st2, g2, b2, count)

    # pass 3: bn2 + residual add + relu
    out_nhwc = _residual_bn_relu(y2, x, sc2, sh2)
    return jnp.transpose(out_nhwc, (0, 3, 1, 2))              # back to NCHW


# ---------------------------------------------------------------------------
# Pure-JAX reference (same semantics) for a correctness check.
# ---------------------------------------------------------------------------
def ref_forward(x_nchw, w1, g1, b1, w2, g2, b2):
    def conv(x, w):
        return jax.lax.conv_general_dilated(
            x, w, window_strides=(1, 1), padding=((1, 1), (1, 1)),
            dimension_numbers=('NHWC', 'HWIO', 'NHWC'))

    def bn(y, g, b):
        m = jnp.mean(y, axis=(0, 1, 2), keepdims=True)
        v = jnp.mean((y - m) ** 2, axis=(0, 1, 2), keepdims=True)
        return g * (y - m) * jax.lax.rsqrt(v + EPS) + b

    x = jnp.transpose(x_nchw, (0, 2, 3, 1))
    o = jnp.maximum(bn(conv(x, w1), g1, b1), 0.0)
    o = bn(conv(o, w2), g2, b2) + x
    o = jnp.maximum(o, 0.0)
    return jnp.transpose(o, (0, 3, 1, 2))


if __name__ == "__main__":
    # Small shapes: inplanes = planes = 4 (residual add requires equal channels
    # when downsample is None), stride = 1.
    N, C, H, W = 2, 4, 16, 16

    key = jax.random.PRNGKey(0)
    kx, k1, k2 = jax.random.split(key, 3)

    x = jax.random.normal(kx, (N, C, H, W), dtype=jnp.float32)

    # conv weights in HWIO layout (3, 3, Cin, Cout); kaiming-ish scale.
    scale = (2.0 / (9 * C)) ** 0.5
    w1 = scale * jax.random.normal(k1, (3, 3, C, C), dtype=jnp.float32)
    w2 = scale * jax.random.normal(k2, (3, 3, C, C), dtype=jnp.float32)

    # BatchNorm affine params: PyTorch default init (gamma=1, beta=0).
    g1 = jnp.ones((1, C), jnp.float32)
    b1 = jnp.zeros((1, C), jnp.float32)
    g2 = jnp.ones((1, C), jnp.float32)
    b2 = jnp.zeros((1, C), jnp.float32)

    out = jax.block_until_ready(basic_block(x, w1, g1, b1, w2, g2, b2))
    ref = jax.block_until_ready(ref_forward(x, w1, g1, b1, w2, g2, b2))

    assert out.shape == (N, C, H, W)
    # bf16 MXU operands (f32 accumulation / f32 BN stats) -> loosened tolerance
    # versus the pure-f32 reference.
    max_diff = float(jnp.max(jnp.abs(out - ref)))
    assert jnp.allclose(out, ref, atol=5e-2, rtol=5e-2), (
        "mismatch vs reference; max abs diff = %e" % max_diff)

    print("KERNEL_OK")
</pallas_src>

<mosaic_0001>
module attributes {stable_mosaic.version = 11 : i64} {
  func.func @_residual_bn_relu_kernel(%arg0: i32, %arg1: memref<1x16x16x4xf32, #tpu.memory_space<vmem>>, %arg2: memref<1x16x16x4xf32, #tpu.memory_space<vmem>>, %arg3: memref<1x4xf32, #tpu.memory_space<vmem>>, %arg4: memref<1x4xf32, #tpu.memory_space<vmem>>, %arg5: memref<1x16x16x4xf32, #tpu.memory_space<vmem>>) attributes {dimension_semantics = [#tpu.dimension_semantics<parallel>], iteration_bounds = array<i64: 2>, scalar_prefetch = 0 : i64, scratch_operands = 0 : i64, tpu.core_type = #tpu.core_type<tc>, window_params = [{transform_indices = @transform_0, window_bounds = array<i64: 1, 16, 16, 4>}, {transform_indices = @transform_1, window_bounds = array<i64: 1, 16, 16, 4>}, {pipeline_mode = #tpu.pipeline_mode<synchronous>, transform_indices = @transform_2, window_bounds = array<i64: 1, 4>}, {pipeline_mode = #tpu.pipeline_mode<synchronous>, transform_indices = @transform_3, window_bounds = array<i64: 1, 4>}, {transform_indices = @transform_4, window_bounds = array<i64: 1, 16, 16, 4>}]} {
    %c0 = arith.constant 0 : index
    %c0_0 = arith.constant 0 : index
    %0 = vector.load %arg3[%c0, %c0_0] : memref<1x4xf32, #tpu.memory_space<vmem>>, vector<1x4xf32>
    %1 = vector.shape_cast %0 : vector<1x4xf32> to vector<1x1x1x4xf32>
    %c0_1 = arith.constant 0 : index
    %c0_2 = arith.constant 0 : index
    %2 = vector.load %arg4[%c0_1, %c0_2] : memref<1x4xf32, #tpu.memory_space<vmem>>, vector<1x4xf32>
    %3 = vector.shape_cast %2 : vector<1x4xf32> to vector<1x1x1x4xf32>
    %c0_3 = arith.constant 0 : index
    %c0_4 = arith.constant 0 : index
    %c0_5 = arith.constant 0 : index
    %c0_6 = arith.constant 0 : index
    %4 = vector.load %arg1[%c0_3, %c0_4, %c0_5, %c0_6] : memref<1x16x16x4xf32, #tpu.memory_space<vmem>>, vector<1x16x16x4xf32>
    %5 = vector.broadcast %1 : vector<1x1x1x4xf32> to vector<1x16x16x4xf32>
    %6 = arith.mulf %4, %5 : vector<1x16x16x4xf32>
    %7 = vector.broadcast %3 : vector<1x1x1x4xf32> to vector<1x16x16x4xf32>
    %8 = arith.addf %6, %7 : vector<1x16x16x4xf32>
    %c0_7 = arith.constant 0 : index
    %c0_8 = arith.constant 0 : index
    %c0_9 = arith.constant 0 : index
    %c0_10 = arith.constant 0 : index
    %9 = vector.load %arg2[%c0_7, %c0_8, %c0_9, %c0_10] : memref<1x16x16x4xf32, #tpu.memory_space<vmem>>, vector<1x16x16x4xf32>
    %10 = arith.addf %8, %9 : vector<1x16x16x4xf32>
    %cst = arith.constant 0.000000e+00 : f32
    %11 = vector.broadcast %cst : f32 to vector<1x16x16x4xf32>
    %12 = arith.maximumf %10, %11 : vector<1x16x16x4xf32>
    %c0_11 = arith.constant 0 : index
    %c0_12 = arith.constant 0 : index
    %c0_13 = arith.constant 0 : index
    %c0_14 = arith.constant 0 : index
    %13 = vector.load %arg5[%c0_11, %c0_12, %c0_13, %c0_14] : memref<1x16x16x4xf32, #tpu.memory_space<vmem>>, vector<1x16x16x4xf32>
    tpu.vector_store %arg5[%c0_11, %c0_12, %c0_13, %c0_14], %12 {strides = array<i32>} : memref<1x16x16x4xf32, #tpu.memory_space<vmem>>, vector<1x16x16x4xf32>,
    return
  }
  func.func @transform_0(%arg0: i32) -> (i32, i32, i32, i32) {
    %c0_i32 = arith.constant 0 : i32
    %c0_i32_0 = arith.constant 0 : i32
    %c0_i32_1 = arith.constant 0 : i32
    %c0_i32_2 = arith.constant 0 : i32
    return %arg0, %c0_i32, %c0_i32_0, %c0_i32_1 : i32, i32, i32, i32
  }
  func.func @transform_1(%arg0: i32) -> (i32, i32, i32, i32) {
    %c0_i32 = arith.constant 0 : i32
    %c0_i32_0 = arith.constant 0 : i32
    %c0_i32_1 = arith.constant 0 : i32
    %c0_i32_2 = arith.constant 0 : i32
    return %arg0, %c0_i32, %c0_i32_0, %c0_i32_1 : i32, i32, i32, i32
  }
  func.func @transform_2(%arg0: i32) -> (i32, i32) {
    %c0_i32 = arith.constant 0 : i32
    %c0_i32_0 = arith.constant 0 : i32
    %c0_i32_1 = arith.constant 0 : i32
    return %c0_i32, %c0_i32_0 : i32, i32
  }
  func.func @transform_3(%arg0: i32) -> (i32, i32) {
    %c0_i32 = arith.constant 0 : i32
    %c0_i32_0 = arith.constant 0 : i32
    %c0_i32_1 = arith.constant 0 : i32
    return %c0_i32, %c0_i32_0 : i32, i32
  }
  func.func @transform_4(%arg0: i32) -> (i32, i32, i32, i32) {
    %c0_i32 = arith.constant 0 : i32
    %c0_i32_0 = arith.constant 0 : i32
    %c0_i32_1 = arith.constant 0 : i32
    %c0_i32_2 = arith.constant 0 : i32
    return %arg0, %c0_i32, %c0_i32_0, %c0_i32_1 : i32, i32, i32, i32
  }
}

module attributes {stable_mosaic.version = 11 : i64} {
  func.func @_conv_stats_kernel(%arg0: i32, %arg1: memref<1x16x16x4xf32, #tpu.memory_space<vmem>>, %arg2: memref<36x4xbf16, #tpu.memory_space<vmem>>, %arg3: memref<1x4xf32, #tpu.memory_space<vmem>>, %arg4: memref<1x4xf32, #tpu.memory_space<vmem>>, %arg5: memref<1x16x16x4xf32, #tpu.memory_space<vmem>>, %arg6: memref<2x4xf32, #tpu.memory_space<vmem>>, %arg7: memref<18x18x4xf32, #tpu.memory_space<vmem>>) attributes {dimension_semantics = [#tpu.dimension_semantics<arbitrary>], iteration_bounds = array<i64: 2>, scalar_prefetch = 0 : i64, scratch_operands = 1 : i64, tpu.core_type = #tpu.core_type<tc>, window_params = [{transform_indices = @transform_0, window_bounds = array<i64: 1, 16, 16, 4>}, {pipeline_mode = #tpu.pipeline_mode<synchronous>, transform_indices = @transform_1, window_bounds = array<i64: 36, 4>}, {pipeline_mode = #tpu.pipeline_mode<synchronous>, transform_indices = @transform_2, window_bounds = array<i64: 1, 4>}, {pipeline_mode = #tpu.pipeline_mode<synchronous>, transform_indices = @transform_3, window_bounds = array<i64: 1, 4>}, {transform_indices = @transform_4, window_bounds = array<i64: 1, 16, 16, 4>}, {pipeline_mode = #tpu.pipeline_mode<synchronous>, transform_indices = @transform_5, window_bounds = array<i64: 2, 4>}]} {
    %c0_i32 = arith.constant 0 : i32
    %0 = arith.cmpi eq, %arg0, %c0_i32 : i32
    %1 = arith.extui %0 : i1 to i32
    %c0_i32_0 = arith.constant 0 : i32
    %2 = arith.cmpi ne, %1, %c0_i32_0 : i32
    scf.if %2 {
      %cst_44 = arith.constant 0.000000e+00 : f32
      %34 = vector.broadcast %cst_44 : f32 to vector<1x18x4xf32>
      %cst_45 = arith.constant 0.000000e+00 : f32
      %35 = vector.broadcast %cst_45 : f32 to vector<18x1x4xf32>
      %c0_46 = arith.constant 0 : index
      %c0_47 = arith.constant 0 : index
      %c0_48 = arith.constant 0 : index
      %36 = vector.load %arg7[%c0_46, %c0_47, %c0_48] : memref<18x18x4xf32, #tpu.memory_space<vmem>>, vector<1x18x4xf32>
      tpu.vector_store %arg7[%c0_46, %c0_47, %c0_48], %34 {strides = array<i32>} : memref<18x18x4xf32, #tpu.memory_space<vmem>>, vector<1x18x4xf32>,
      %c17 = arith.constant 17 : index
      %c0_49 = arith.constant 0 : index
      %c0_50 = arith.constant 0 : index
      %37 = vector.load %arg7[%c17, %c0_49, %c0_50] : memref<18x18x4xf32, #tpu.memory_space<vmem>>, vector<1x18x4xf32>
      tpu.vector_store %arg7[%c17, %c0_49, %c0_50], %34 {strides = array<i32>} : memref<18x18x4xf32, #tpu.memory_space<vmem>>, vector<1x18x4xf32>,
      %c0_51 = arith.constant 0 : index
      %c0_52 = arith.constant 0 : index
      %c0_53 = arith.constant 0 : index
      %38 = vector.load %arg7[%c0_51, %c0_52, %c0_53] : memref<18x18x4xf32, #tpu.memory_space<vmem>>, vector<18x1x4xf32>
      tpu.vector_store %arg7[%c0_51, %c0_52, %c0_53], %35 {strides = array<i32>} : memref<18x18x4xf32, #tpu.memory_space<vmem>>, vector<18x1x4xf32>,
      %c0_54 = arith.constant 0 : index
      %c17_55 = arith.constant 17 : index
      %c0_56 = arith.constant 0 : index
      %39 = vector.load %arg7[%c0_54, %c17_55, %c0_56] : memref<18x18x4xf32, #tpu.memory_space<vmem>>, vector<18x1x4xf32>
      tpu.vector_store %arg7[%c0_54, %c17_55, %c0_56], %35 {strides = array<i32>} : memref<18x18x4xf32, #tpu.memory_space<vmem>>, vector<18x1x4xf32>,
    } else {
    }
    %c0 = arith.constant 0 : index
    %c0_1 = arith.constant 0 : index
    %c0_2 = arith.constant 0 : index
    %c0_3 = arith.constant 0 : index
    %3 = vector.load %arg1[%c0, %c0_1, %c0_2, %c0_3] : memref<1x16x16x4xf32, #tpu.memory_space<vmem>>, vector<1x16x16x4xf32>
    %4 = vector.shape_cast %3 : vector<1x16x16x4xf32> to vector<16x16x4xf32>
    %c1 = arith.constant 1 : index
    %c1_4 = arith.constant 1 : index
    %c0_5 = arith.constant 0 : index
    %5 = vector.load %arg7[%c1, %c1_4, %c0_5] : memref<18x18x4xf32, #tpu.memory_space<vmem>>, vector<16x16x4xf32>
    tpu.vector_store %arg7[%c1, %c1_4, %c0_5], %4 {strides = array<i32>} : memref<18x18x4xf32, #tpu.memory_space<vmem>>, vector<16x16x4xf32>,
    %c0_6 = arith.constant 0 : index
    %c0_7 = arith.constant 0 : index
    %c0_8 = arith.constant 0 : index
    %6 = vector.load %arg7[%c0_6, %c0_7, %c0_8] : memref<18x18x4xf32, #tpu.memory_space<vmem>>, vector<16x16x4xf32>
    %c0_9 = arith.constant 0 : index
    %c1_10 = arith.constant 1 : index
    %c0_11 = arith.constant 0 : index
    %7 = vector.load %arg7[%c0_9, %c1_10, %c0_11] : memref<18x18x4xf32, #tpu.memory_space<vmem>>, vector<16x16x4xf32>
    %c0_12 = arith.constant 0 : index
    %c2 = arith.constant 2 : index
    %c0_13 = arith.constant 0 : index
    %8 = vector.load %arg7[%c0_12, %c2, %c0_13] : memref<18x18x4xf32, #tpu.memory_space<vmem>>, vector<16x16x4xf32>
    %c1_14 = arith.constant 1 : index
    %c0_15 = arith.constant 0 : index
    %c0_16 = arith.constant 0 : index
    %9 = vector.load %arg7[%c1_14, %c0_15, %c0_16] : memref<18x18x4xf32, #tpu.memory_space<vmem>>, vector<16x16x4xf32>
    %c1_17 = arith.constant 1 : index
    %c1_18 = arith.constant 1 : index
    %c0_19 = arith.constant 0 : index
    %10 = vector.load %arg7[%c1_17, %c1_18, %c0_19] : memref<18x18x4xf32, #tpu.memory_space<vmem>>, vector<16x16x4xf32>
    %c1_20 = arith.constant 1 : index
    %c2_21 = arith.constant 2 : index
    %c0_22 = arith.constant 0 : index
    %11 = vector.load %arg7[%c1_20, %c2_21, %c0_22] : memref<18x18x4xf32, #tpu.memory_space<vmem>>, vector<16x16x4xf32>
    %c2_23 = arith.constant 2 : index
    %c0_24 = arith.constant 0 : index
    %c0_25 = arith.constant 0 : index
    %12 = vector.load %arg7[%c2_23, %c0_24, %c0_25] : memref<18x18x4xf32, #tpu.memory_space<vmem>>, vector<16x16x4xf32>
    %c2_26 = arith.constant 2 : index
    %c1_27 = arith.constant 1 : index
    %c0_28 = arith.constant 0 : index
    %13 = vector.load %arg7[%c2_26, %c1_27, %c0_28] : memref<18x18x4xf32, #tpu.memory_space<vmem>>, vector<16x16x4xf32>
    %c2_29 = arith.constant 2 : index
    %c2_30 = arith.constant 2 : index
    %c0_31 = arith.constant 0 : index
    %14 = vector.load %arg7[%c2_29, %c2_30, %c0_31] : memref<18x18x4xf32, #tpu.memory_space<vmem>>, vector<16x16x4xf32>
    %15 = tpu.concatenate %6, %7, %8, %9, %10, %11, %12, %13, %14 in 2 : vector<16x16x4xf32>, vector<16x16x4xf32>, vector<16x16x4xf32>, vector<16x16x4xf32>, vector<16x16x4xf32>, vector<16x16x4xf32>, vector<16x16x4xf32>, vector<16x16x4xf32>, vector<16x16x4xf32> -> vector<16x16x36xf32>
    %16 = vector.shape_cast %15 : vector<16x16x36xf32> to vector<256x36xf32>
    %17 = arith.truncf %16 : vector<256x36xf32> to vector<256x36xbf16>
    %c0_32 = arith.constant 0 : index
    %c0_33 = arith.constant 0 : index
    %18 = vector.load %arg2[%c0_32, %c0_33] : memref<36x4xbf16, #tpu.memory_space<vmem>>, vector<36x4xbf16>
    %cst = arith.constant dense<0.000000e+00> : vector<256x4xf32>
    %19 = tpu.matmul %17, %18, %cst {dimension_numbers = #tpu.dot_dimension_numbers<[1], [0], [0], [1], [0, 0, 1, 1], [], []>} : vector<256x36xbf16>, vector<36x4xbf16>, vector<256x4xf32> -> vector<256x4xf32>
    %20 = vector.shape_cast %19 : vector<256x4xf32> to vector<1x16x16x4xf32>
    %c0_34 = arith.constant 0 : index
    %c0_35 = arith.constant 0 : index
    %c0_36 = arith.constant 0 : index
    %c0_37 = arith.constant 0 : index
    %21 = vector.load %arg5[%c0_34, %c0_35, %c0_36, %c0_37] : memref<1x16x16x4xf32, #tpu.memory_space<vmem>>, vector<1x16x16x4xf32>
    tpu.vector_store %arg5[%c0_34, %c0_35, %c0_36, %c0_37], %20 {strides = array<i32>} : memref<1x16x16x4xf32, #tpu.memory_space<vmem>>, vector<1x16x16x4xf32>,
    %cst_38 = arith.constant dense<0.000000e+00> : vector<4xf32>
    %22 = vector.multi_reduction <add>, %19, %cst_38 [0] : vector<256x4xf32> to vector<4xf32>
    %23 = vector.shape_cast %22 : vector<4xf32> to vector<1x4xf32>
    %24 = arith.mulf %19, %19 : vector<256x4xf32>
    %cst_39 = arith.constant dense<0.000000e+00> : vector<4xf32>
    %25 = vector.multi_reduction <add>, %24, %cst_39 [0] : vector<256x4xf32> to vector<4xf32>
    %26 = vector.shape_cast %25 : vector<4xf32> to vector<1x4xf32>
    %27 = tpu.concatenate %23, %26 in 0 : vector<1x4xf32>, vector<1x4xf32> -> vector<2x4xf32>
    %c0_i32_40 = arith.constant 0 : i32
    %28 = arith.cmpi eq, %arg0, %c0_i32_40 : i32
    %29 = arith.extui %28 : i1 to i32
    %c0_i32_41 = arith.constant 0 : i32
    %30 = arith.cmpi ne, %29, %c0_i32_41 : i32
    scf.if %30 {
      %c0_44 = arith.constant 0 : index
      %c0_45 = arith.constant 0 : index
      %34 = vector.load %arg6[%c0_44, %c0_45] : memref<2x4xf32, #tpu.memory_space<vmem>>, vector<2x4xf32>
      tpu.vector_store %arg6[%c0_44, %c0_45], %27 {strides = array<i32>} : memref<2x4xf32, #tpu.memory_space<vmem>>, vector<2x4xf32>,
    } else {
    }
    %c0_i32_42 = arith.constant 0 : i32
    %31 = arith.cmpi sgt, %arg0, %c0_i32_42 : i32
    %32 = arith.extui %31 : i1 to i32
    %c0_i32_43 = arith.constant 0 : i32
    %33 = arith.cmpi ne, %32, %c0_i32_43 : i32
    scf.if %33 {
      %c0_44 = arith.constant 0 : index
      %c0_45 = arith.constant 0 : index
      %34 = vector.load %arg6[%c0_44, %c0_45] : memref<2x4xf32, #tpu.memory_space<vmem>>, vector<2x4xf32>
      %35 = arith.addf %34, %27 : vector<2x4xf32>
      %c0_46 = arith.constant 0 : index
      %c0_47 = arith.constant 0 : index
      %36 = vector.load %arg6[%c0_46, %c0_47] : memref<2x4xf32, #tpu.memory_space<vmem>>, vector<2x4xf32>
      tpu.vector_store %arg6[%c0_46, %c0_47], %35 {strides = array<i32>} : memref<2x4xf32, #tpu.memory_space<vmem>>, vector<2x4xf32>,
    } else {
    }
    return
  }
  func.func @transform_0(%arg0: i32) -> (i32, i32, i32, i32) {
    %c0_i32 = arith.constant 0 : i32
    %c0_i32_0 = arith.constant 0 : i32
    %c0_i32_1 = arith.constant 0 : i32
    %c0_i32_2 = arith.constant 0 : i32
    return %arg0, %c0_i32, %c0_i32_0, %c0_i32_1 : i32, i32, i32, i32
  }
  func.func @transform_1(%arg0: i32) -> (i32, i32) {
    %c0_i32 = arith.constant 0 : i32
    %c0_i32_0 = arith.constant 0 : i32
    %c0_i32_1 = arith.constant 0 : i32
    return %c0_i32, %c0_i32_0 : i32, i32
  }
  func.func @transform_2(%arg0: i32) -> (i32, i32) {
    %c0_i32 = arith.constant 0 : i32
    %c0_i32_0 = arith.constant 0 : i32
    %c0_i32_1 = arith.constant 0 : i32
    return %c0_i32, %c0_i32_0 : i32, i32
  }
  func.func @transform_3(%arg0: i32) -> (i32, i32) {
    %c0_i32 = arith.constant 0 : i32
    %c0_i32_0 = arith.constant 0 : i32
    %c0_i32_1 = arith.constant 0 : i32
    return %c0_i32, %c0_i32_0 : i32, i32
  }
  func.func @transform_4(%arg0: i32) -> (i32, i32, i32, i32) {
    %c0_i32 = arith.constant 0 : i32
    %c0_i32_0 = arith.constant 0 : i32
    %c0_i32_1 = arith.constant 0 : i32
    %c0_i32_2 = arith.constant 0 : i32
    return %arg0, %c0_i32, %c0_i32_0, %c0_i32_1 : i32, i32, i32, i32
  }
  func.func @transform_5(%arg0: i32) -> (i32, i32) {
    %c0_i32 = arith.constant 0 : i32
    %c0_i32_0 = arith.constant 0 : i32
    %c0_i32_1 = arith.constant 0 : i32
    return %c0_i32, %c0_i32_0 : i32, i32
  }
}

module attributes {stable_mosaic.version = 11 : i64} {
  func.func @_conv_stats_kernel(%arg0: i32, %arg1: memref<1x16x16x4xf32, #tpu.memory_space<vmem>>, %arg2: memref<36x4xbf16, #tpu.memory_space<vmem>>, %arg3: memref<1x4xf32, #tpu.memory_space<vmem>>, %arg4: memref<1x4xf32, #tpu.memory_space<vmem>>, %arg5: memref<1x16x16x4xf32, #tpu.memory_space<vmem>>, %arg6: memref<2x4xf32, #tpu.memory_space<vmem>>, %arg7: memref<18x18x4xf32, #tpu.memory_space<vmem>>) attributes {dimension_semantics = [#tpu.dimension_semantics<arbitrary>], iteration_bounds = array<i64: 2>, scalar_prefetch = 0 : i64, scratch_operands = 1 : i64, tpu.core_type = #tpu.core_type<tc>, window_params = [{transform_indices = @transform_0, window_bounds = array<i64: 1, 16, 16, 4>}, {pipeline_mode = #tpu.pipeline_mode<synchronous>, transform_indices = @transform_1, window_bounds = array<i64: 36, 4>}, {pipeline_mode = #tpu.pipeline_mode<synchronous>, transform_indices = @transform_2, window_bounds = array<i64: 1, 4>}, {pipeline_mode = #tpu.pipeline_mode<synchronous>, transform_indices = @transform_3, window_bounds = array<i64: 1, 4>}, {transform_indices = @transform_4, window_bounds = array<i64: 1, 16, 16, 4>}, {pipeline_mode = #tpu.pipeline_mode<synchronous>, transform_indices = @transform_5, window_bounds = array<i64: 2, 4>}]} {
    %c0_i32 = arith.constant 0 : i32
    %0 = arith.cmpi eq, %arg0, %c0_i32 : i32
    %1 = arith.extui %0 : i1 to i32
    %c0_i32_0 = arith.constant 0 : i32
    %2 = arith.cmpi ne, %1, %c0_i32_0 : i32
    scf.if %2 {
      %cst_49 = arith.constant 0.000000e+00 : f32
      %44 = vector.broadcast %cst_49 : f32 to vector<1x18x4xf32>
      %cst_50 = arith.constant 0.000000e+00 : f32
      %45 = vector.broadcast %cst_50 : f32 to vector<18x1x4xf32>
      %c0_51 = arith.constant 0 : index
      %c0_52 = arith.constant 0 : index
      %c0_53 = arith.constant 0 : index
      %46 = vector.load %arg7[%c0_51, %c0_52, %c0_53] : memref<18x18x4xf32, #tpu.memory_space<vmem>>, vector<1x18x4xf32>
      tpu.vector_store %arg7[%c0_51, %c0_52, %c0_53], %44 {strides = array<i32>} : memref<18x18x4xf32, #tpu.memory_space<vmem>>, vector<1x18x4xf32>,
      %c17 = arith.constant 17 : index
      %c0_54 = arith.constant 0 : index
      %c0_55 = arith.constant 0 : index
      %47 = vector.load %arg7[%c17, %c0_54, %c0_55] : memref<18x18x4xf32, #tpu.memory_space<vmem>>, vector<1x18x4xf32>
      tpu.vector_store %arg7[%c17, %c0_54, %c0_55], %44 {strides = array<i32>} : memref<18x18x4xf32, #tpu.memory_space<vmem>>, vector<1x18x4xf32>,
      %c0_56 = arith.constant 0 : index
      %c0_57 = arith.constant 0 : index
      %c0_58 = arith.constant 0 : index
      %48 = vector.load %arg7[%c0_56, %c0_57, %c0_58] : memref<18x18x4xf32, #tpu.memory_space<vmem>>, vector<18x1x4xf32>
      tpu.vector_store %arg7[%c0_56, %c0_57, %c0_58], %45 {strides = array<i32>} : memref<18x18x4xf32, #tpu.memory_space<vmem>>, vector<18x1x4xf32>,
      %c0_59 = arith.constant 0 : index
      %c17_60 = arith.constant 17 : index
      %c0_61 = arith.constant 0 : index
      %49 = vector.load %arg7[%c0_59, %c17_60, %c0_61] : memref<18x18x4xf32, #tpu.memory_space<vmem>>, vector<18x1x4xf32>
      tpu.vector_store %arg7[%c0_59, %c17_60, %c0_61], %45 {strides = array<i32>} : memref<18x18x4xf32, #tpu.memory_space<vmem>>, vector<18x1x4xf32>,
    } else {
    }
    %c0 = arith.constant 0 : index
    %c0_1 = arith.constant 0 : index
    %c0_2 = arith.constant 0 : index
    %c0_3 = arith.constant 0 : index
    %3 = vector.load %arg1[%c0, %c0_1, %c0_2, %c0_3] : memref<1x16x16x4xf32, #tpu.memory_space<vmem>>, vector<1x16x16x4xf32>
    %4 = vector.shape_cast %3 : vector<1x16x16x4xf32> to vector<16x16x4xf32>
    %c0_4 = arith.constant 0 : index
    %c0_5 = arith.constant 0 : index
    %5 = vector.load %arg3[%c0_4, %c0_5] : memref<1x4xf32, #tpu.memory_space<vmem>>, vector<1x4xf32>
    %6 = vector.shape_cast %5 : vector<1x4xf32> to vector<1x1x4xf32>
    %c0_6 = arith.constant 0 : index
    %c0_7 = arith.constant 0 : index
    %7 = vector.load %arg4[%c0_6, %c0_7] : memref<1x4xf32, #tpu.memory_space<vmem>>, vector<1x4xf32>
    %8 = vector.shape_cast %7 : vector<1x4xf32> to vector<1x1x4xf32>
    %9 = vector.broadcast %6 : vector<1x1x4xf32> to vector<16x16x4xf32>
    %10 = arith.mulf %4, %9 : vector<16x16x4xf32>
    %11 = vector.broadcast %8 : vector<1x1x4xf32> to vector<16x16x4xf32>
    %12 = arith.addf %10, %11 : vector<16x16x4xf32>
    %cst = arith.constant 0.000000e+00 : f32
    %13 = vector.broadcast %cst : f32 to vector<16x16x4xf32>
    %14 = arith.maximumf %12, %13 : vector<16x16x4xf32>
    %c1 = arith.constant 1 : index
    %c1_8 = arith.constant 1 : index
    %c0_9 = arith.constant 0 : index
    %15 = vector.load %arg7[%c1, %c1_8, %c0_9] : memref<18x18x4xf32, #tpu.memory_space<vmem>>, vector<16x16x4xf32>
    tpu.vector_store %arg7[%c1, %c1_8, %c0_9], %14 {strides = array<i32>} : memref<18x18x4xf32, #tpu.memory_space<vmem>>, vector<16x16x4xf32>,
    %c0_10 = arith.constant 0 : index
    %c0_11 = arith.constant 0 : index
    %c0_12 = arith.constant 0 : index
    %16 = vector.load %arg7[%c0_10, %c0_11, %c0_12] : memref<18x18x4xf32, #tpu.memory_space<vmem>>, vector<16x16x4xf32>
    %c0_13 = arith.constant 0 : index
    %c1_14 = arith.constant 1 : index
    %c0_15 = arith.constant 0 : index
    %17 = vector.load %arg7[%c0_13, %c1_14, %c0_15] : memref<18x18x4xf32, #tpu.memory_space<vmem>>, vector<16x16x4xf32>
    %c0_16 = arith.constant 0 : index
    %c2 = arith.constant 2 : index
    %c0_17 = arith.constant 0 : index
    %18 = vector.load %arg7[%c0_16, %c2, %c0_17] : memref<18x18x4xf32, #tpu.memory_space<vmem>>, vector<16x16x4xf32>
    %c1_18 = arith.constant 1 : index
    %c0_19 = arith.constant 0 : index
    %c0_20 = arith.constant 0 : index
    %19 = vector.load %arg7[%c1_18, %c0_19, %c0_20] : memref<18x18x4xf32, #tpu.memory_space<vmem>>, vector<16x16x4xf32>
    %c1_21 = arith.constant 1 : index
    %c1_22 = arith.constant 1 : index
    %c0_23 = arith.constant 0 : index
    %20 = vector.load %arg7[%c1_21, %c1_22, %c0_23] : memref<18x18x4xf32, #tpu.memory_space<vmem>>, vector<16x16x4xf32>
    %c1_24 = arith.constant 1 : index
    %c2_25 = arith.constant 2 : index
    %c0_26 = arith.constant 0 : index
    %21 = vector.load %arg7[%c1_24, %c2_25, %c0_26] : memref<18x18x4xf32, #tpu.memory_space<vmem>>, vector<16x16x4xf32>
    %c2_27 = arith.constant 2 : index
    %c0_28 = arith.constant 0 : index
    %c0_29 = arith.constant 0 : index
    %22 = vector.load %arg7[%c2_27, %c0_28, %c0_29] : memref<18x18x4xf32, #tpu.memory_space<vmem>>, vector<16x16x4xf32>
    %c2_30 = arith.constant 2 : index
    %c1_31 = arith.constant 1 : index
    %c0_32 = arith.constant 0 : index
    %23 = vector.load %arg7[%c2_30, %c1_31, %c0_32] : memref<18x18x4xf32, #tpu.memory_space<vmem>>, vector<16x16x4xf32>
    %c2_33 = arith.constant 2 : index
    %c2_34 = arith.constant 2 : index
    %c0_35 = arith.constant 0 : index
    %24 = vector.load %arg7[%c2_33, %c2_34, %c0_35] : memref<18x18x4xf32, #tpu.memory_space<vmem>>, vector<16x16x4xf32>
    %25 = tpu.concatenate %16, %17, %18, %19, %20, %21, %22, %23, %24 in 2 : vector<16x16x4xf32>, vector<16x16x4xf32>, vector<16x16x4xf32>, vector<16x16x4xf32>, vector<16x16x4xf32>, vector<16x16x4xf32>, vector<16x16x4xf32>, vector<16x16x4xf32>, vector<16x16x4xf32> -> vector<16x16x36xf32>
    %26 = vector.shape_cast %25 : vector<16x16x36xf32> to vector<256x36xf32>
    %27 = arith.truncf %26 : vector<256x36xf32> to vector<256x36xbf16>
    %c0_36 = arith.constant 0 : index
    %c0_37 = arith.constant 0 : index
    %28 = vector.load %arg2[%c0_36, %c0_37] : memref<36x4xbf16, #tpu.memory_space<vmem>>, vector<36x4xbf16>
    %cst_38 = arith.constant dense<0.000000e+00> : vector<256x4xf32>
    %29 = tpu.matmul %27, %28, %cst_38 {dimension_numbers = #tpu.dot_dimension_numbers<[1], [0], [0], [1], [0, 0, 1, 1], [], []>} : vector<256x36xbf16>, vector<36x4xbf16>, vector<256x4xf32> -> vector<256x4xf32>
    %30 = vector.shape_cast %29 : vector<256x4xf32> to vector<1x16x16x4xf32>
    %c0_39 = arith.constant 0 : index
    %c0_40 = arith.constant 0 : index
    %c0_41 = arith.constant 0 : index
    %c0_42 = arith.constant 0 : index
    %31 = vector.load %arg5[%c0_39, %c0_40, %c0_41, %c0_42] : memref<1x16x16x4xf32, #tpu.memory_space<vmem>>, vector<1x16x16x4xf32>
    tpu.vector_store %arg5[%c0_39, %c0_40, %c0_41, %c0_42], %30 {strides = array<i32>} : memref<1x16x16x4xf32, #tpu.memory_space<vmem>>, vector<1x16x16x4xf32>,
    %cst_43 = arith.constant dense<0.000000e+00> : vector<4xf32>
    %32 = vector.multi_reduction <add>, %29, %cst_43 [0] : vector<256x4xf32> to vector<4xf32>
    %33 = vector.shape_cast %32 : vector<4xf32> to vector<1x4xf32>
    %34 = arith.mulf %29, %29 : vector<256x4xf32>
    %cst_44 = arith.constant dense<0.000000e+00> : vector<4xf32>
    %35 = vector.multi_reduction <add>, %34, %cst_44 [0] : vector<256x4xf32> to vector<4xf32>
    %36 = vector.shape_cast %35 : vector<4xf32> to vector<1x4xf32>
    %37 = tpu.concatenate %33, %36 in 0 : vector<1x4xf32>, vector<1x4xf32> -> vector<2x4xf32>
    %c0_i32_45 = arith.constant 0 : i32
    %38 = arith.cmpi eq, %arg0, %c0_i32_45 : i32
    %39 = arith.extui %38 : i1 to i32
    %c0_i32_46 = arith.constant 0 : i32
    %40 = arith.cmpi ne, %39, %c0_i32_46 : i32
    scf.if %40 {
      %c0_49 = arith.constant 0 : index
      %c0_50 = arith.constant 0 : index
      %44 = vector.load %arg6[%c0_49, %c0_50] : memref<2x4xf32, #tpu.memory_space<vmem>>, vector<2x4xf32>
      tpu.vector_store %arg6[%c0_49, %c0_50], %37 {strides = array<i32>} : memref<2x4xf32, #tpu.memory_space<vmem>>, vector<2x4xf32>,
    } else {
    }
    %c0_i32_47 = arith.constant 0 : i32
    %41 = arith.cmpi sgt, %arg0, %c0_i32_47 : i32
    %42 = arith.extui %41 : i1 to i32
    %c0_i32_48 = arith.constant 0 : i32
    %43 = arith.cmpi ne, %42, %c0_i32_48 : i32
    scf.if %43 {
      %c0_49 = arith.constant 0 : index
      %c0_50 = arith.constant 0 : index
      %44 = vector.load %arg6[%c0_49, %c0_50] : memref<2x4xf32, #tpu.memory_space<vmem>>, vector<2x4xf32>
      %45 = arith.addf %44, %37 : vector<2x4xf32>
      %c0_51 = arith.constant 0 : index
      %c0_52 = arith.constant 0 : index
      %46 = vector.load %arg6[%c0_51, %c0_52] : memref<2x4xf32, #tpu.memory_space<vmem>>, vector<2x4xf32>
      tpu.vector_store %arg6[%c0_51, %c0_52], %45 {strides = array<i32>} : memref<2x4xf32, #tpu.memory_space<vmem>>, vector<2x4xf32>,
    } else {
    }
    return
  }
  func.func @transform_0(%arg0: i32) -> (i32, i32, i32, i32) {
    %c0_i32 = arith.constant 0 : i32
    %c0_i32_0 = arith.constant 0 : i32
    %c0_i32_1 = arith.constant 0 : i32
    %c0_i32_2 = arith.constant 0 : i32
    return %arg0, %c0_i32, %c0_i32_0, %c0_i32_1 : i32, i32, i32, i32
  }
  func.func @transform_1(%arg0: i32) -> (i32, i32) {
    %c0_i32 = arith.constant 0 : i32
    %c0_i32_0 = arith.constant 0 : i32
    %c0_i32_1 = arith.constant 0 : i32
    return %c0_i32, %c0_i32_0 : i32, i32
  }
  func.func @transform_2(%arg0: i32) -> (i32, i32) {
    %c0_i32 = arith.constant 0 : i32
    %c0_i32_0 = arith.constant 0 : i32
    %c0_i32_1 = arith.constant 0 : i32
    return %c0_i32, %c0_i32_0 : i32, i32
  }
  func.func @transform_3(%arg0: i32) -> (i32, i32) {
    %c0_i32 = arith.constant 0 : i32
    %c0_i32_0 = arith.constant 0 : i32
    %c0_i32_1 = arith.constant 0 : i32
    return %c0_i32, %c0_i32_0 : i32, i32
  }
  func.func @transform_4(%arg0: i32) -> (i32, i32, i32, i32) {
    %c0_i32 = arith.constant 0 : i32
    %c0_i32_0 = arith.constant 0 : i32
    %c0_i32_1 = arith.constant 0 : i32
    %c0_i32_2 = arith.constant 0 : i32
    return %arg0, %c0_i32, %c0_i32_0, %c0_i32_1 : i32, i32, i32, i32
  }
  func.func @transform_5(%arg0: i32) -> (i32, i32) {
    %c0_i32 = arith.constant 0 : i32
    %c0_i32_0 = arith.constant 0 : i32
    %c0_i32_1 = arith.constant 0 : i32
    return %c0_i32, %c0_i32_0 : i32, i32
  }
}

</mosaic_0001>

<bundles_post_ra>
// kernel: basic_block.5
= control target key start
LH: loop header
LB: loop body
LE: loop exit
PB: predicated region body
PF: predicated region fallthrough
CT: control target
= control target key end

     0   :  { %s583_s15 = smov 0   ;;  %s816_s0 = inlined_call_operand.vmem [shape: f32[2,16,16,4], index: 0, kind: input, shape index: {}]   ;;  %s817_s1 = inlined_call_operand.vmem [shape: f32[2,16,16,4], index: 1, kind: input, shape index: {}]   ;;  %s818_s2 = inlined_call_operand.vmem [shape: f32[1,4], index: 2, kind: input, shape index: {}]   ;;  %s819_s3 = inlined_call_operand.vmem [shape: f32[1,4], index: 3, kind: input, shape index: {}]   ;;  %s820_s4 = inlined_call_operand.vmem [shape: f32[2,16,16,4], index: 4, kind: output, shape index: {}]  }
   0x1 LB: > { %s524_s16 = sadd.s32 4294967295, %s556_s15   ;;  %p528_p0 = scmp.ge.s32.totalorder %s556_s15, 1  ;;  %s556_s15 = sphi %s583_s15, %s14_s15  }
   0x2   : > { %p172_p1 = scmp.lt.s32.totalorder %s556_s15, 3 }
   0x4   : > { %p173_p2 = pnand %p528_p0, %p172_p1 }
   0x5   : > { %p203_p3 = scmp.lt.s32.totalorder (!%p173_p2), %s524_s16, 1 }
   0x6   : > { %176 = sbr.rel (%p173_p2) target bundleno = 53 (0x35), region = 36 }
   0xb   : > { %s822_s16 = smov (!%p203_p3, %s524_s16), 1  ;;  %v596_v0 = vld [vmem:[%s818_s2] ss:$0 sm:$0xff]  ;;  %vm424_vm0 = vcmask 31744  }
   0xc   : > { %s591_s17 = sshll.u32 %s822_s16, 8  ;;  %v613_v1 = vld [vmem:[%s819_s3] ss:$0 sm:$0xff] }
   0xd   : > { %s602_s22 = scalar_lea.vmem %s816_s0, %s591_s17  ;;  %s608_s25 = scalar_lea.vmem %s817_s1, %s591_s17 }
   0xe   : > { %v220_v2 = vld [vmem:[%s602_s22] sm:$0xff]  ;;  %v221_v3 = vld [vmem:[%s602_s22 + $0x8] sm:$0xff]  ;;  %v222_v7 = vld [vmem:[%s602_s22 + $0x10] sm:$0xff]  ;;  %s644_s30 = scalar_lea.vmem %s820_s4, %s591_s17 }
   0xf   : > { %v258_v4 = vmul.f32 %v596_v0, %v220_v2  ;;  %v328_v5 = vld [vmem:[%s608_s25] sm:$0xff]  ;;  %v259_v6 = vmul.f32 %v596_v0, %v221_v3  ;;  %v329_v8 = vld [vmem:[%s608_s25 + $0x8] sm:$0xff]  ;;  %v260_v9 = vmul.f32 %v596_v0, %v222_v7  ;;  %v223_v10 = vld [vmem:[%s602_s22 + $0x18] sm:$0xff] }
  0x10   : > { %v224_v11 = vld [vmem:[%s602_s22 + $0x20] sm:$0xff]  ;;  %v330_v14 = vld [vmem:[%s608_s25 + $0x10] sm:$0xff]  ;;  %v261_v15 = vmul.f32 %v596_v0, %v223_v10  ;;  %v331_v16 = vld [vmem:[%s608_s25 + $0x18] sm:$0xff] }
  0x11   : > { %v296_v12 = vadd.f32 %v613_v1, %v258_v4  ;;  %v297_v13 = vadd.f32 %v613_v1, %v259_v6  ;;  %v262_v17 = vmul.f32 %v596_v0, %v224_v11  ;;  %v225_v18 = vld [vmem:[%s602_s22 + $0x28] sm:$0xff]  ;;  %v298_v19 = vadd.f32 %v613_v1, %v260_v9  ;;  %v332_v20 = vld [vmem:[%s608_s25 + $0x20] sm:$0xff]  ;;  %v226_v22 = vld [vmem:[%s602_s22 + $0x30] sm:$0xff] }
  0x12   : > { %v263_v21 = vmul.f32 %v596_v0, %v225_v18  ;;  %v227_v23 = vld [vmem:[%s602_s22 + $0x38] sm:$0xff]  ;;  %v299_v26 = vadd.f32 %v613_v1, %v261_v15  ;;  %v333_v28 = vld [vmem:[%s608_s25 + $0x28] sm:$0xff]  ;;  %v264_v31 = vmul.f32 %v596_v0, %v226_v22  ;;  %v228_v33 = vld [vmem:[%s602_s22 + $0x40] sm:$0xff] }
  0x13   : > { %v360_v24 = vadd.f32 %v328_v5, %v296_v12  ;;  %v361_v25 = vadd.f32 %v329_v8, %v297_v13  ;;  %v300_v27 = vadd.f32 %v613_v1, %v262_v17  ;;  %v362_v29 = vadd.f32 %v330_v14, %v298_v19  ;;  %v229_v34 = vld [vmem:[%s602_s22 + $0x48] sm:$0xff]  ;;  %v334_v39 = vld [vmem:[%s608_s25 + $0x30] sm:$0xff]  ;;  %v335_v40 = vld [vmem:[%s608_s25 + $0x38] sm:$0xff] }
  0x14   : > { %v301_v30 = vadd.f32 %v613_v1, %v263_v21  ;;  %v265_v32 = vmul.f32 %v596_v0, %v227_v23  ;;  %v363_v37 = vadd.f32 %v331_v16, %v299_v26  ;;  %v230_v41 = vld [vmem:[%s602_s22 + $0x50] sm:$0xff]  ;;  %v302_v44 = vadd.f32 %v613_v1, %v264_v31  ;;  %v231_v46 = vld [vmem:[%s602_s22 + $0x58] sm:$0xff]  ;;  %v232_v47 = vld [vmem:[%s602_s22 + $0x60] sm:$0xff] }
  0x15   : > { %v392_v35 = vmax.f32 %v360_v24, 0.0  ;;  %v393_v36 = vmax.f32 %v361_v25, 0.0  ;;  %v364_v38 = vadd.f32 %v332_v20, %v300_v27  ;;  %v394_v42 = vmax.f32 %v362_v29, 0.0  ;;  %v233_v52 = vld [vmem:[%s602_s22 + $0x68] sm:$0xff]  ;;  %v336_v56 = vld [vmem:[%s608_s25 + $0x40] sm:$0xff]  ;;  %v338_v61 = vld [vmem:[%s608_s25 + $0x50] sm:$0xff] }
  0x16   : > { %v365_v43 = vadd.f32 %v333_v28, %v301_v30  ;;  %v303_v45 = vadd.f32 %v613_v1, %v265_v32  ;;  %v395_v48 = vmax.f32 %v363_v37, 0.0  ;;  %v266_v50 = vmul.f32 %v596_v0, %v228_v33  ;;  %v337_v57 = vld [vmem:[%s608_s25 + $0x48] sm:$0xff]  ;;  %v234_v2 = vld [vmem:[%s602_s22 + $0x70] sm:$0xff]  ;;  %v235_v3 = vld [vmem:[%s602_s22 + $0x78] sm:$0xff] }
  0x17   : > { %425 = vst.msk [vmem:[%s644_s30] sm:$0xff] %vm424_vm0, %v392_v35  ;;  %426 = vst.msk [vmem:[%s644_s30 + $0x8] sm:$0xff] %vm424_vm0, %v393_v36  ;;  %v396_v49 = vmax.f32 %v364_v38, 0.0  ;;  %v267_v51 = vmul.f32 %v596_v0, %v229_v34  ;;  %v366_v54 = vadd.f32 %v334_v39, %v302_v44  ;;  %v268_v58 = vmul.f32 %v596_v0, %v230_v41  ;;  %v339_v7 = vld [vmem:[%s608_s25 + $0x58] sm:$0xff]  ;;  %v340_v8 = vld [vmem:[%s608_s25 + $0x60] sm:$0xff] }
  0x18   : > { %427 = vst.msk [vmem:[%s644_s30 + $0x10] sm:$0xff] %vm424_vm0, %v394_v42  ;;  %v397_v53 = vmax.f32 %v365_v43, 0.0  ;;  %v367_v55 = vadd.f32 %v335_v40, %v303_v45  ;;  %428 = vst.msk [vmem:[%s644_s30 + $0x18] sm:$0xff] %vm424_vm0, %v395_v48  ;;  %v304_v59 = vadd.f32 %v613_v1, %v266_v50  ;;  %v269_v62 = vmul.f32 %v596_v0, %v231_v46  ;;  %v341_v14 = vld [vmem:[%s608_s25 + $0x68] sm:$0xff]  ;;  %v236_v19 = vld [vmem:[%s602_s22 + $0x80] sm:$0xff] }
  0x19   : > { %429 = vst.msk [vmem:[%s644_s30 + $0x20] sm:$0xff] %vm424_vm0, %v396_v49  ;;  %v305_v60 = vadd.f32 %v613_v1, %v267_v51  ;;  %v270_v63 = vmul.f32 %v596_v0, %v232_v47  ;;  %v398_v4 = vmax.f32 %v366_v54, 0.0  ;;  %v306_v6 = vadd.f32 %v613_v1, %v268_v58  ;;  %v237_v20 = vld [vmem:[%s602_s22 + $0x88] sm:$0xff]  ;;  %v342_v25 = vld [vmem:[%s608_s25 + $0x70] sm:$0xff]  ;;  %v343_v26 = vld [vmem:[%s608_s25 + $0x78] sm:$0xff] }
  0x1a   : > { %430 = vst.msk [vmem:[%s644_s30 + $0x28] sm:$0xff] %vm424_vm0, %v397_v53  ;;  %v399_v5 = vmax.f32 %v367_v55, 0.0  ;;  %v271_v9 = vmul.f32 %v596_v0, %v233_v52  ;;  %v368_v10 = vadd.f32 %v336_v56, %v304_v59  ;;  %v307_v12 = vadd.f32 %v613_v1, %v269_v62  ;;  %v238_v27 = vld [vmem:[%s602_s22 + $0x90] sm:$0xff]  ;;  %v239_v32 = vld [vmem:[%s602_s22 + $0x98] sm:$0xff]  ;;  %v240_v33 = vld [vmem:[%s602_s22 + $0xa0] sm:$0xff] }
  0x1b   : > { %v369_v11 = vadd.f32 %v337_v57, %v305_v60  ;;  %v308_v13 = vadd.f32 %v613_v1, %v270_v63  ;;  %431 = vst.msk [vmem:[%s644_s30 + $0x30] sm:$0xff] %vm424_vm0, %v398_v4  ;;  %v370_v15 = vadd.f32 %v338_v61, %v306_v6  ;;  %v272_v17 = vmul.f32 %v596_v0, %v234_v2  ;;  %v241_v38 = vld [vmem:[%s602_s22 + $0xa8] sm:$0xff]  ;;  %v344_v42 = vld [vmem:[%s608_s25 + $0x80] sm:$0xff]  ;;  %v346_v47 = vld [vmem:[%s608_s25 + $0x90] sm:$0xff] }
  0x1c   : > { %432 = vst.msk [vmem:[%s644_s30 + $0x38] sm:$0xff] %vm424_vm0, %v399_v5  ;;  %v309_v16 = vadd.f32 %v613_v1, %v271_v9  ;;  %v273_v18 = vmul.f32 %v596_v0, %v235_v3  ;;  %v400_v21 = vmax.f32 %v368_v10, 0.0  ;;  %v371_v23 = vadd.f32 %v339_v7, %v307_v12  ;;  %v345_v43 = vld [vmem:[%s608_s25 + $0x88] sm:$0xff]  ;;  %v242_v50 = vld [vmem:[%s602_s22 + $0xb0] sm:$0xff]  ;;  %v243_v51 = vld [vmem:[%s602_s22 + $0xb8] sm:$0xff] }
  0x1d   : > { %v401_v22 = vmax.f32 %v369_v11, 0.0  ;;  %v372_v24 = vadd.f32 %v340_v8, %v308_v13  ;;  %v402_v28 = vmax.f32 %v370_v15, 0.0  ;;  %v310_v30 = vadd.f32 %v613_v1, %v272_v17  ;;  %v347_v55 = vld [vmem:[%s608_s25 + $0x98] sm:$0xff]  ;;  %v348_v56 = vld [vmem:[%s608_s25 + $0xa0] sm:$0xff]  ;;  %v349_v62 = vld [vmem:[%s608_s25 + $0xa8] sm:$0xff] }
  0x1e   : > { %v373_v29 = vadd.f32 %v341_v14, %v309_v16  ;;  %v311_v31 = vadd.f32 %v613_v1, %v273_v18  ;;  %433 = vst.msk [vmem:[%s644_s30 + $0x40] sm:$0xff] %vm424_vm0, %v400_v21  ;;  %v403_v34 = vmax.f32 %v371_v23, 0.0  ;;  %v274_v36 = vmul.f32 %v596_v0, %v236_v19  ;;  %v244_v5 = vld [vmem:[%s602_s22 + $0xc0] sm:$0xff]  ;;  %v245_v6 = vld [vmem:[%s602_s22 + $0xc8] sm:$0xff]  ;;  %v350_v11 = vld [vmem:[%s608_s25 + $0xb0] sm:$0xff] }
  0x1f   : > { %434 = vst.msk [vmem:[%s644_s30 + $0x48] sm:$0xff] %vm424_vm0, %v401_v22  ;;  %v404_v35 = vmax.f32 %v372_v24, 0.0  ;;  %v275_v37 = vmul.f32 %v596_v0, %v237_v20  ;;  %435 = vst.msk [vmem:[%s644_s30 + $0x50] sm:$0xff] %vm424_vm0, %v402_v28  ;;  %v374_v40 = vadd.f32 %v342_v25, %v310_v30  ;;  %v276_v44 = vmul.f32 %v596_v0, %v238_v27  ;;  %v351_v12 = vld [vmem:[%s608_s25 + $0xb8] sm:$0xff]  ;;  %v246_v13 = vld [vmem:[%s602_s22 + $0xd0] sm:$0xff] }
  0x20   : > { %v405_v39 = vmax.f32 %v373_v29, 0.0  ;;  %v375_v41 = vadd.f32 %v343_v26, %v311_v31  ;;  %436 = vst.msk [vmem:[%s644_s30 + $0x58] sm:$0xff] %vm424_vm0, %v403_v34  ;;  %v312_v45 = vadd.f32 %v613_v1, %v274_v36  ;;  %v277_v48 = vmul.f32 %v596_v0, %v239_v32  ;;  %v247_v18 = vld [vmem:[%s602_s22 + $0xd8] sm:$0xff]  ;;  %v248_v19 = vld [vmem:[%s602_s22 + $0xe0] sm:$0xff]  ;;  %v249_v24 = vld [vmem:[%s602_s22 + $0xe8] sm:$0xff] }
  0x21   : > { %437 = vst.msk [vmem:[%s644_s30 + $0x60] sm:$0xff] %vm424_vm0, %v404_v35  ;;  %v313_v46 = vadd.f32 %v613_v1, %v275_v37  ;;  %v278_v49 = vmul.f32 %v596_v0, %v240_v33  ;;  %v406_v52 = vmax.f32 %v374_v40, 0.0  ;;  %v314_v54 = vadd.f32 %v613_v1, %v276_v44  ;;  %v352_v28 = vld [vmem:[%s608_s25 + $0xc0] sm:$0xff]  ;;  %v353_v29 = vld [vmem:[%s608_s25 + $0xc8] sm:$0xff]  ;;  %v354_v33 = vld [vmem:[%s608_s25 + $0xd0] sm:$0xff] }
  0x22   : > { %438 = vst.msk [vmem:[%s644_s30 + $0x68] sm:$0xff] %vm424_vm0, %v405_v39  ;;  %v407_v53 = vmax.f32 %v375_v41, 0.0  ;;  %v279_v57 = vmul.f32 %v596_v0, %v241_v38  ;;  %v376_v58 = vadd.f32 %v344_v42, %v312_v45  ;;  %v315_v60 = vadd.f32 %v613_v1, %v277_v48  ;;  %v250_v36 = vld [vmem:[%s602_s22 + $0xf0] sm:$0xff]  ;;  %v251_v37 = vld [vmem:[%s602_s22 + $0xf8] sm:$0xff]  ;;  %v356_v42 = vld [vmem:[%s608_s25 + $0xe0] sm:$0xff] }
  0x23   : > { %v377_v59 = vadd.f32 %v345_v43, %v313_v46  ;;  %v316_v61 = vadd.f32 %v613_v1, %v278_v49  ;;  %439 = vst.msk [vmem:[%s644_s30 + $0x70] sm:$0xff] %vm424_vm0, %v406_v52  ;;  %v378_v63 = vadd.f32 %v346_v47, %v314_v54  ;;  %v280_v3 = vmul.f32 %v596_v0, %v242_v50  ;;  %v355_v41 = vld [vmem:[%s608_s25 + $0xd8] sm:$0xff]  ;;  %v357_v48 = vld [vmem:[%s608_s25 + $0xe8] sm:$0xff] }
  0x24   : > { %440 = vst.msk [vmem:[%s644_s30 + $0x78] sm:$0xff] %vm424_vm0, %v407_v53  ;;  %v317_v2 = vadd.f32 %v613_v1, %v279_v57  ;;  %v281_v4 = vmul.f32 %v596_v0, %v243_v51  ;;  %v408_v7 = vmax.f32 %v376_v58, 0.0  ;;  %v379_v9 = vadd.f32 %v347_v55, %v315_v60  ;;  %v358_v57 = vld [vmem:[%s608_s25 + $0xf0] sm:$0xff]  ;;  %v359_v58 = vld [vmem:[%s608_s25 + $0xf8] sm:$0xff] }
  0x25   : > { %v409_v8 = vmax.f32 %v377_v59, 0.0  ;;  %v380_v10 = vadd.f32 %v348_v56, %v316_v61  ;;  %v410_v14 = vmax.f32 %v378_v63, 0.0  ;;  %v318_v16 = vadd.f32 %v613_v1, %v280_v3 }
  0x26   : > { %v381_v15 = vadd.f32 %v349_v62, %v317_v2  ;;  %v319_v17 = vadd.f32 %v613_v1, %v281_v4  ;;  %441 = vst.msk [vmem:[%s644_s30 + $0x80] sm:$0xff] %vm424_vm0, %v408_v7  ;;  %v411_v20 = vmax.f32 %v379_v9, 0.0  ;;  %v282_v22 = vmul.f32 %v596_v0, %v244_v5 }
  0x27   : > { %442 = vst.msk [vmem:[%s644_s30 + $0x88] sm:$0xff] %vm424_vm0, %v409_v8  ;;  %v412_v21 = vmax.f32 %v380_v10, 0.0  ;;  %v283_v23 = vmul.f32 %v596_v0, %v245_v6  ;;  %443 = vst.msk [vmem:[%s644_s30 + $0x90] sm:$0xff] %vm424_vm0, %v410_v14  ;;  %v382_v26 = vadd.f32 %v350_v11, %v318_v16  ;;  %v284_v30 = vmul.f32 %v596_v0, %v246_v13 }
  0x28   : > { %v413_v25 = vmax.f32 %v381_v15, 0.0  ;;  %v383_v27 = vadd.f32 %v351_v12, %v319_v17  ;;  %444 = vst.msk [vmem:[%s644_s30 + $0x98] sm:$0xff] %vm424_vm0, %v411_v20  ;;  %v320_v31 = vadd.f32 %v613_v1, %v282_v22  ;;  %v285_v34 = vmul.f32 %v596_v0, %v247_v18 }
  0x29   : > { %445 = vst.msk [vmem:[%s644_s30 + $0xa0] sm:$0xff] %vm424_vm0, %v412_v21  ;;  %v321_v32 = vadd.f32 %v613_v1, %v283_v23  ;;  %v286_v35 = vmul.f32 %v596_v0, %v248_v19  ;;  %v414_v38 = vmax.f32 %v382_v26, 0.0  ;;  %v322_v40 = vadd.f32 %v613_v1, %v284_v30 }
  0x2a   : > { %446 = vst.msk [vmem:[%s644_s30 + $0xa8] sm:$0xff] %vm424_vm0, %v413_v25  ;;  %v415_v39 = vmax.f32 %v383_v27, 0.0  ;;  %v287_v43 = vmul.f32 %v596_v0, %v249_v24  ;;  %v384_v44 = vadd.f32 %v352_v28, %v320_v31  ;;  %v323_v46 = vadd.f32 %v613_v1, %v285_v34 }
  0x2b   : > { %v385_v45 = vadd.f32 %v353_v29, %v321_v32  ;;  %v324_v47 = vadd.f32 %v613_v1, %v286_v35  ;;  %447 = vst.msk [vmem:[%s644_s30 + $0xb0] sm:$0xff] %vm424_vm0, %v414_v38  ;;  %v386_v49 = vadd.f32 %v354_v33, %v322_v40  ;;  %v288_v51 = vmul.f32 %v596_v0, %v250_v36 }
  0x2c   : > { %448 = vst.msk [vmem:[%s644_s30 + $0xb8] sm:$0xff] %vm424_vm0, %v415_v39  ;;  %v325_v50 = vadd.f32 %v613_v1, %v287_v43  ;;  %v289_v52 = vmul.f32 %v596_v0, %v251_v37  ;;  %v416_v53 = vmax.f32 %v384_v44, 0.0  ;;  %v387_v55 = vadd.f32 %v355_v41, %v323_v46 }
  0x2d   : > { %v417_v54 = vmax.f32 %v385_v45, 0.0  ;;  %v388_v56 = vadd.f32 %v356_v42, %v324_v47  ;;  %v418_v59 = vmax.f32 %v386_v49, 0.0  ;;  %v326_v61 = vadd.f32 %v613_v1, %v288_v51 }
  0x2e   : > { %v389_v60 = vadd.f32 %v357_v48, %v325_v50  ;;  %v327_v62 = vadd.f32 %v613_v1, %v289_v52  ;;  %449 = vst.msk [vmem:[%s644_s30 + $0xc0] sm:$0xff] %vm424_vm0, %v416_v53  ;;  %v419_v0 = vmax.f32 %v387_v55, 0.0 }
  0x2f   : > { %450 = vst.msk [vmem:[%s644_s30 + $0xc8] sm:$0xff] %vm424_vm0, %v417_v54  ;;  %v420_v63 = vmax.f32 %v388_v56, 0.0  ;;  %451 = vst.msk [vmem:[%s644_s30 + $0xd0] sm:$0xff] %vm424_vm0, %v418_v59  ;;  %v390_v3 = vadd.f32 %v358_v57, %v326_v61 }
  0x30   : > { %v421_v2 = vmax.f32 %v389_v60, 0.0  ;;  %v391_v4 = vadd.f32 %v359_v58, %v327_v62  ;;  %452 = vst.msk [vmem:[%s644_s30 + $0xd8] sm:$0xff] %vm424_vm0, %v419_v0 }
  0x31   : > { %453 = vst.msk [vmem:[%s644_s30 + $0xe0] sm:$0xff] %vm424_vm0, %v420_v63  ;;  %v422_v5 = vmax.f32 %v390_v3, 0.0 }
  0x32   : > { %454 = vst.msk [vmem:[%s644_s30 + $0xe8] sm:$0xff] %vm424_vm0, %v421_v2  ;;  %v423_v6 = vmax.f32 %v391_v4, 0.0 }
  0x33   : > { %455 = vst.msk [vmem:[%s644_s30 + $0xf0] sm:$0xff] %vm424_vm0, %v422_v5 }
  0x34   : > { %456 = vst.msk [vmem:[%s644_s30 + $0xf8] sm:$0xff] %vm424_vm0, %v423_v6 }
  0x35 PF: > { %s14_s15 = sadd.s32 1, %s556_s15  }
  0x36   : > { %p11_p4 = scmp.ge.s32.totalorder %s14_s15, 4  }
  0x38   :  { %13 = sbr.rel (!%p11_p4) target bundleno = 1 (0x1), region = 69 }

// kernel: basic_block.4
= control target key start
LH: loop header
LB: loop body
LE: loop exit
PB: predicated region body
PF: predicated region fallthrough
CT: control target
= control target key end

     0   :  { %s3373_s18 = smov 0   ;;  %s4591_s0 = inlined_call_operand.vmem [shape: f32[2,16,16,4], index: 0, kind: input, shape index: {}]   ;;  %s4592_s1 = inlined_call_operand.vmem [shape: bf16[36,4], index: 1, kind: input, shape index: {}]   ;;  %s4593_s2 = inlined_call_operand.vmem [shape: f32[1,4], index: 2, kind: input, shape index: {}]   ;;  %s4594_s3 = inlined_call_operand.vmem [shape: f32[1,4], index: 3, kind: input, shape index: {}]   ;;  %s4595_s4 = inlined_call_operand.vmem [shape: f32[2,16,16,4], index: 4, kind: output, shape index: {0}]   ;;  %s4596_s5 = inlined_call_operand.vmem [shape: f32[2,4], index: 5, kind: output, shape index: {1}]  }
   0x1 LB: > { %s3379_s19 = sadd.s32 4294967295, %s3332_s18   ;;  %p2558_p0 = scmp.ge.s32.totalorder %s3332_s18, 1  ;;  %s3332_s18 = sphi %s3373_s18, %s16_s18  }
   0x2   : > { %p185_p1 = scmp.lt.s32.totalorder %s3332_s18, 3 }
   0x4   : > { %p186_p2 = pnand %p2558_p0, %p185_p1 }
   0x6   : > { %189 = sbr.rel (%p186_p2) target bundleno = 665 (0x299), region = 36 }
   0xb   : > { %p213_p3 = scmp.lt.s32.totalorder %s3379_s19, 1  ;;  %p2563_p4 = scmp.ne.s32.totalorder %s3379_s19, 0 }
   0xd   : > { %s214_s20 = scalar_select %p213_p3, %s3379_s19, 1 }
   0xe   : > { %227 = sbr.rel (%p2563_p4) target bundleno = 41 (0x29), region = 40 }
   0xf   : > { %s2589_s21 = sshll.u32 %s214_s20, 8 }
  0x10   : > { %s3388_s24 = scalar_lea.vmem %s4591_s0, %s2589_s21  ;;  %s3393_s27 = scalar_lea.vmem %s4595_s4, %s2589_s21 }
  0x13   : > { %vm228_vm0 = vcmask 31744   ;;  %vm231_vm1 = vcmask 25600   ;;  %vm237_vm2 = vcmask 24576   ;;  %v3334_v0 = vmov 0.0  }
  0x14   : > { %229 = vst.msk [vmem:[#allocation2] sm:$0xff] %vm228_vm0, %v3334_v0  ;;  %230 = vst.msk [vmem:[#allocation2 + $0x8] sm:$0xff] %vm228_vm0, %v3334_v0 }
  0x15   : > { %234 = vst.msk [vmem:[#allocation2 + $0x198] sm:$0xff] %vm228_vm0, %v3334_v0  ;;  %235 = vst.msk [vmem:[#allocation2 + $0x1a0] sm:$0xff] %vm228_vm0, %v3334_v0 }
  0x16   : > { %232 = vst.msk [vmem:[#allocation2 + $0x10] sm:$0x3] %vm231_vm1, %v3334_v0  ;;  %236 = vst.msk [vmem:[#allocation2 + $0x1a8] sm:$0x3] %vm231_vm1, %v3334_v0 }
  0x17   : > { %239 = vst.msk [vmem:[#allocation2 + $0x18] sm:$0x1] %vm237_vm2, %v3334_v0  ;;  %240 = vst.msk [vmem:[#allocation2 + $0x30] sm:$0x1] %vm237_vm2, %v3334_v0 }
  0x18   : > { %241 = vst.msk [vmem:[#allocation2 + $0x48] sm:$0x1] %vm237_vm2, %v3334_v0  ;;  %242 = vst.msk [vmem:[#allocation2 + $0x60] sm:$0x1] %vm237_vm2, %v3334_v0 }
  0x19   : > { %243 = vst.msk [vmem:[#allocation2 + $0x78] sm:$0x1] %vm237_vm2, %v3334_v0  ;;  %244 = vst.msk [vmem:[#allocation2 + $0x90] sm:$0x1] %vm237_vm2, %v3334_v0 }
  0x1a   : > { %245 = vst.msk [vmem:[#allocation2 + $0xa8] sm:$0x1] %vm237_vm2, %v3334_v0  ;;  %246 = vst.msk [vmem:[#allocation2 + $0xc0] sm:$0x1] %vm237_vm2, %v3334_v0 }
  0x1b   : > { %247 = vst.msk [vmem:[#allocation2 + $0xd8] sm:$0x1] %vm237_vm2, %v3334_v0  ;;  %248 = vst.msk [vmem:[#allocation2 + $0xf0] sm:$0x1] %vm237_vm2, %v3334_v0 }
  0x1c   : > { %249 = vst.msk [vmem:[#allocation2 + $0x108] sm:$0x1] %vm237_vm2, %v3334_v0  ;;  %250 = vst.msk [vmem:[#allocation2 + $0x120] sm:$0x1] %vm237_vm2, %v3334_v0 }
  0x1d   : > { %251 = vst.msk [vmem:[#allocation2 + $0x138] sm:$0x1] %vm237_vm2, %v3334_v0  ;;  %252 = vst.msk [vmem:[#allocation2 + $0x150] sm:$0x1] %vm237_vm2, %v3334_v0 }
  0x1e   : > { %253 = vst.msk [vmem:[#allocation2 + $0x168] sm:$0x1] %vm237_vm2, %v3334_v0  ;;  %254 = vst.msk [vmem:[#allocation2 + $0x180] sm:$0x1] %vm237_vm2, %v3334_v0 }
  0x1f   : > { %257 = vst.msk [vmem:[#allocation2 + $0x29] sm:$0x1] %vm237_vm2, %v3334_v0  ;;  %258 = vst.msk [vmem:[#allocation2 + $0x41] sm:$0x1] %vm237_vm2, %v3334_v0 }
  0x20   : > { %259 = vst.msk [vmem:[#allocation2 + $0x59] sm:$0x1] %vm237_vm2, %v3334_v0  ;;  %260 = vst.msk [vmem:[#allocation2 + $0x71] sm:$0x1] %vm237_vm2, %v3334_v0 }
  0x21   : > { %261 = vst.msk [vmem:[#allocation2 + $0x89] sm:$0x1] %vm237_vm2, %v3334_v0  ;;  %262 = vst.msk [vmem:[#allocation2 + $0xa1] sm:$0x1] %vm237_vm2, %v3334_v0 }
  0x22   : > { %263 = vst.msk [vmem:[#allocation2 + $0xb9] sm:$0x1] %vm237_vm2, %v3334_v0  ;;  %264 = vst.msk [vmem:[#allocation2 + $0xd1] sm:$0x1] %vm237_vm2, %v3334_v0 }
  0x23   : > { %265 = vst.msk [vmem:[#allocation2 + $0xe9] sm:$0x1] %vm237_vm2, %v3334_v0  ;;  %266 = vst.msk [vmem:[#allocation2 + $0x101] sm:$0x1] %vm237_vm2, %v3334_v0 }
  0x24   : > { %267 = vst.msk [vmem:[#allocation2 + $0x119] sm:$0x1] %vm237_vm2, %v3334_v0  ;;  %268 = vst.msk [vmem:[#allocation2 + $0x131] sm:$0x1] %vm237_vm2, %v3334_v0 }
  0x25   : > { %269 = vst.msk [vmem:[#allocation2 + $0x149] sm:$0x1] %vm237_vm2, %v3334_v0  ;;  %270 = vst.msk [vmem:[#allocation2 + $0x161] sm:$0x1] %vm237_vm2, %v3334_v0 }
  0x26   : > { %271 = vst.msk [vmem:[#allocation2 + $0x179] sm:$0x1] %vm237_vm2, %v3334_v0  ;;  %272 = vst.msk [vmem:[#allocation2 + $0x191] sm:$0x1] %vm237_vm2, %v3334_v0 }
  0x27   : > { %238 = vst.msk [vmem:[#allocation2] sm:$0x1] %vm237_vm2, %v3334_v0  ;;  %255 = vst.msk [vmem:[#allocation2 + $0x198] sm:$0x1] %vm237_vm2, %v3334_v0 }
  0x28   : > { %256 = vst.msk [vmem:[#allocation2 + $0x11] sm:$0x1] %vm237_vm2, %v3334_v0  ;;  %273 = vst.msk [vmem:[#allocation2 + $0x1a9] sm:$0x1] %vm237_vm2, %v3334_v0 }
  0x29 PF: > { %v482_v1 = vld [vmem:[#allocation2 + $0x1] sm:$0xff]  ;;  %v483_v2 = vld [vmem:[#allocation2 + $0x9] sm:$0xff]  ;;  %v277_v5 = vld [vmem:[%s3388_s24 + $0x18] sm:$0xff]  ;;  %s3335_s7 = smov 4   ;;  %vm417_vm3 = vcmask 31744   ;;  %s3336_s8 = smov 8  }
  0x2a   : > { %v276_v3 = vld [vmem:[%s3388_s24 + $0x10] sm:$0xff]  ;;  %v2673_v4 = vpack.i.bf16 %v483_v2, %v482_v1  ;;  %v3439_v6 = vld [vmem:[%s4593_s2] ss:$0 sm:$0xff]  ;;  %v275_v11 = vld [vmem:[%s3388_s24 + $0x8] sm:$0xff]  ;;  %s3337_s9 = smov 12   ;;  %vm2111_vm4 = vcmask 1041408  }
  0x2b   : > { %v3444_v7 = vld [vmem:[%s4594_s3] ss:$0 sm:$0xff]  ;;  %v316_v8 = vmul.f32 %v3439_v6, %v276_v3  ;;  %v317_v9 = vmul.f32 %v3439_v6, %v277_v5  ;;  %v315_v14 = vmul.f32 %v3439_v6, %v275_v11  ;;  %v279_v15 = vld [vmem:[%s3388_s24 + $0x28] sm:$0xff]  ;;  %v280_v17 = vld [vmem:[%s3388_s24 + $0x30] sm:$0xff]  ;;  %s3338_s12 = smov 16   ;;  %s3339_s15 = smov 20  }
  0x2c   : > { %v274_v10 = vld [vmem:[%s3388_s24] sm:$0xff]  ;;  %2674 = vrot.lane.b32.xlu0 %v2673_v4, %s3335_s7  ;;  %v281_v18 = vld [vmem:[%s3388_s24 + $0x38] sm:$0xff]  ;;  %v319_v21 = vmul.f32 %v3439_v6, %v279_v15  ;;  %v320_v22 = vmul.f32 %v3439_v6, %v280_v17  ;;  %v283_v28 = vld [vmem:[%s3388_s24 + $0x48] sm:$0xff]  ;;  %s3340_s20 = smov 24   ;;  %s3341_s21 = smov 28   ;;  %vm1795_vm5 = vcmask 64512  }
  0x2d   : > { %v278_v12 = vld [vmem:[%s3388_s24 + $0x20] sm:$0xff]  ;;  %v314_v13 = vmul.f32 %v3439_v6, %v274_v10  ;;  %v354_v19 = vadd.f32 %v3444_v7, %v316_v8  ;;  %v355_v20 = vadd.f32 %v3444_v7, %v317_v9  ;;  %v353_v24 = vadd.f32 %v3444_v7, %v315_v14  ;;  %v284_v33 = vld [vmem:[%s3388_s24 + $0x50] sm:$0xff]  ;;  %v285_v34 = vld [vmem:[%s3388_s24 + $0x58] sm:$0xff]  ;;  %s3342_s22 = smov 32  }
  0x2e   : > { %v318_v16 = vmul.f32 %v3439_v6, %v278_v12  ;;  %v321_v26 = vmul.f32 %v3439_v6, %v281_v18  ;;  %v282_v27 = vld [vmem:[%s3388_s24 + $0x40] sm:$0xff]  ;;  %v357_v31 = vadd.f32 %v3444_v7, %v319_v21  ;;  %v358_v32 = vadd.f32 %v3444_v7, %v320_v22  ;;  %v287_v40 = vld [vmem:[%s3388_s24 + $0x68] sm:$0xff]  ;;  %v288_v41 = vld [vmem:[%s3388_s24 + $0x70] sm:$0xff] }
  0x2f   : > { %v352_v23 = vadd.f32 %v3444_v7, %v314_v13  ;;  %v386_v29 = vmax.f32 %v354_v19, 0.0  ;;  %v387_v30 = vmax.f32 %v355_v20, 0.0  ;;  %v286_v35 = vld [vmem:[%s3388_s24 + $0x60] sm:$0xff]  ;;  %v385_v37 = vmax.f32 %v353_v24, 0.0  ;;  %v289_v46 = vld [vmem:[%s3388_s24 + $0x78] sm:$0xff]  ;;  %v291_v60 = vld [vmem:[%s3388_s24 + $0x88] sm:$0xff] }
  0x30   : > { %v356_v25 = vadd.f32 %v3444_v7, %v318_v16  ;;  %v359_v39 = vadd.f32 %v3444_v7, %v321_v26  ;;  %v389_v42 = vmax.f32 %v357_v31, 0.0  ;;  %v390_v43 = vmax.f32 %v358_v32, 0.0  ;;  %v290_v59 = vld [vmem:[%s3388_s24 + $0x80] sm:$0xff]  ;;  %v292_v61 = vld [vmem:[%s3388_s24 + $0x90] sm:$0xff]  ;;  %v293_v2 = vld [vmem:[%s3388_s24 + $0x98] sm:$0xff] }
  0x31   : > { %v384_v36 = vmax.f32 %v352_v23, 0.0  ;;  %420 = vst.msk [vmem:[#allocation2 + $0x31] sm:$0xff] %vm417_vm3, %v386_v29  ;;  %421 = vst.msk [vmem:[#allocation2 + $0x39] sm:$0xff] %vm417_vm3, %v387_v30  ;;  %v322_v44 = vmul.f32 %v3439_v6, %v282_v27  ;;  %v323_v45 = vmul.f32 %v3439_v6, %v283_v28  ;;  %v324_v48 = vmul.f32 %v3439_v6, %v284_v33  ;;  %v294_v3 = vld [vmem:[%s3388_s24 + $0xa0] sm:$0xff]  ;;  %v295_v10 = vld [vmem:[%s3388_s24 + $0xa8] sm:$0xff] }
  0x32   : > { %v388_v38 = vmax.f32 %v356_v25, 0.0  ;;  %419 = vst.msk [vmem:[#allocation2 + $0x21] sm:$0xff] %vm417_vm3, %v385_v37  ;;  %v391_v47 = vmax.f32 %v359_v39, 0.0  ;;  %v325_v49 = vmul.f32 %v3439_v6, %v285_v34  ;;  %v326_v50 = vmul.f32 %v3439_v6, %v286_v35  ;;  %423 = vst.msk [vmem:[#allocation2 + $0x51] sm:$0xff] %vm417_vm3, %v389_v42  ;;  %v296_v21 = vld [vmem:[%s3388_s24 + $0xb0] sm:$0xff]  ;;  %v297_v22 = vld [vmem:[%s3388_s24 + $0xb8] sm:$0xff] }
  0x33   : > { %418 = vst.msk [vmem:[#allocation2 + $0x19] sm:$0xff] %vm417_vm3, %v384_v36  ;;  %424 = vst.msk [vmem:[#allocation2 + $0x61] sm:$0xff] %vm417_vm3, %v390_v43  ;;  %v360_v51 = vadd.f32 %v3444_v7, %v322_v44  ;;  %v361_v52 = vadd.f32 %v3444_v7, %v323_v45  ;;  %v327_v53 = vmul.f32 %v3439_v6, %v287_v40  ;;  %v298_v23 = vld [vmem:[%s3388_s24 + $0xc0] sm:$0xff]  ;;  %v299_v31 = vld [vmem:[%s3388_s24 + $0xc8] sm:$0xff]  ;;  %vm1828_vm6 = vcmask 97280  }
  0x34   : > { %422 = vst.msk [vmem:[#allocation2 + $0x49] sm:$0xff] %vm417_vm3, %v388_v38  ;;  %v328_v54 = vmul.f32 %v3439_v6, %v288_v41  ;;  %425 = vst.msk [vmem:[#allocation2 + $0x69] sm:$0xff] %vm417_vm3, %v391_v47  ;;  %v362_v55 = vadd.f32 %v3444_v7, %v324_v48  ;;  %v363_v56 = vadd.f32 %v3444_v7, %v325_v49  ;;  %v300_v38 = vld [vmem:[%s3388_s24 + $0xd0] sm:$0xff]  ;;  %v301_v44 = vld [vmem:[%s3388_s24 + $0xd8] sm:$0xff]  ;;  %vm1861_vm7 = vcmask 130048  }
  0x35   : > { %v364_v57 = vadd.f32 %v3444_v7, %v326_v50  ;;  %v329_v58 = vmul.f32 %v3439_v6, %v289_v46  ;;  %v392_v62 = vmax.f32 %v360_v51, 0.0  ;;  %v393_v63 = vmax.f32 %v361_v52, 0.0  ;;  %v302_v45 = vld [vmem:[%s3388_s24 + $0xe0] sm:$0xff] }
  0x36   : > { %v365_v0 = vadd.f32 %v3444_v7, %v327_v53  ;;  %v366_v1 = vadd.f32 %v3444_v7, %v328_v54  ;;  %v394_v4 = vmax.f32 %v362_v55, 0.0  ;;  %v395_v5 = vmax.f32 %v363_v56, 0.0 }
  0x37   : > { %v396_v8 = vmax.f32 %v364_v57, 0.0  ;;  %v367_v9 = vadd.f32 %v3444_v7, %v329_v58  ;;  %426 = vst.msk [vmem:[#allocation2 + $0x79] sm:$0xff] %vm417_vm3, %v392_v62  ;;  %427 = vst.msk [vmem:[#allocation2 + $0x81] sm:$0xff] %vm417_vm3, %v393_v63  ;;  %v330_v13 = vmul.f32 %v3439_v6, %v290_v59  ;;  %v331_v14 = vmul.f32 %v3439_v6, %v291_v60 }
  0x38   : > { %v397_v11 = vmax.f32 %v365_v0, 0.0  ;;  %v398_v12 = vmax.f32 %v366_v1, 0.0  ;;  %v486_v15 = vld [vmem:[#allocation2 + $0x31] sm:$0xff]  ;;  %v487_v16 = vld [vmem:[#allocation2 + $0x39] sm:$0xff]  ;;  %428 = vst.msk [vmem:[#allocation2 + $0x91] sm:$0xff] %vm417_vm3, %v394_v4  ;;  %429 = vst.msk [vmem:[#allocation2 + $0x99] sm:$0xff] %vm417_vm3, %v395_v5  ;;  %v332_v18 = vmul.f32 %v3439_v6, %v292_v61  ;;  %v333_v19 = vmul.f32 %v3439_v6, %v293_v2 }
  0x39   : > { %430 = vst.msk [vmem:[#allocation2 + $0xa9] sm:$0xff] %vm417_vm3, %v396_v8  ;;  %v399_v17 = vmax.f32 %v367_v9, 0.0  ;;  %v334_v20 = vmul.f32 %v3439_v6, %v294_v3  ;;  %v3520_v24 = vpack.i.bf16 %v487_v16, %v486_v15  ;;  %v485_v26 = vld [vmem:[#allocation2 + $0x21] sm:$0xff]  ;;  %v368_v28 = vadd.f32 %v3444_v7, %v330_v13  ;;  %v489_v33 = vld [vmem:[#allocation2 + $0x51] sm:$0xff] }
  0x3a   : > { %v484_v25 = vld [vmem:[#allocation2 + $0x19] sm:$0xff]  ;;  %431 = vst.msk [vmem:[#allocation2 + $0xb1] sm:$0xff] %vm417_vm3, %v397_v11  ;;  %432 = vst.msk [vmem:[#allocation2 + $0xc1] sm:$0xff] %vm417_vm3, %v398_v12  ;;  %v369_v29 = vadd.f32 %v3444_v7, %v331_v14  ;;  %v335_v30 = vmul.f32 %v3439_v6, %v295_v10  ;;  %v490_v34 = vld [vmem:[#allocation2 + $0x61] sm:$0xff]  ;;  %v370_v35 = vadd.f32 %v3444_v7, %v332_v18  ;;  %vm1894_vm8 = vcmask 162816  }
  0x3b   : > { %v488_v27 = vld [vmem:[#allocation2 + $0x49] sm:$0xff]  ;;  %v3528_v32 = vpack.i.bf16 %v485_v26, %v484_v25  ;;  %433 = vst.msk [vmem:[#allocation2 + $0xc9] sm:$0xff] %vm417_vm3, %v399_v17  ;;  %v371_v36 = vadd.f32 %v3444_v7, %v333_v19  ;;  %v372_v37 = vadd.f32 %v3444_v7, %v334_v20  ;;  %2684 = vrot.lane.b32.xlu1 %v3520_v24, %s3335_s7  ;;  %v400_v41 = vmax.f32 %v368_v28, 0.0 }
  0x3c   : > { %v3537_v39 = vpack.i.bf16 %v489_v33, %v488_v27  ;;  %v491_v40 = vld [vmem:[#allocation2 + $0x69] sm:$0xff]  ;;  %v401_v42 = vmax.f32 %v369_v29, 0.0  ;;  %v373_v43 = vadd.f32 %v3444_v7, %v335_v30  ;;  %v402_v47 = vmax.f32 %v370_v35, 0.0 }
  0x3d   : > { %2679 = vrot.lane.b32.xlu0 %v3528_v32, %s3335_s7  ;;  %v3544_v46 = vpack.i.bf16 %v491_v40, %v490_v34  ;;  %v403_v48 = vmax.f32 %v371_v36, 0.0  ;;  %v404_v49 = vmax.f32 %v372_v37, 0.0  ;;  %434 = vst.msk [vmem:[#allocation2 + $0xd9] sm:$0xff] %vm417_vm3, %v400_v41  ;;  %v336_v51 = vmul.f32 %v3439_v6, %v296_v21  ;;  %v303_v10 = vld [vmem:[%s3388_s24 + $0xe8] sm:$0xff] }
  0x3e   : > { %435 = vst.msk [vmem:[#allocation2 + $0xe1] sm:$0xff] %vm417_vm3, %v401_v42  ;;  %v405_v50 = vmax.f32 %v373_v43, 0.0  ;;  %v337_v52 = vmul.f32 %v3439_v6, %v297_v22  ;;  %v338_v53 = vmul.f32 %v3439_v6, %v298_v23  ;;  %v492_v54 = vld [vmem:[#allocation2 + $0x79] sm:$0xff]  ;;  %v493_v55 = vld [vmem:[#allocation2 + $0x81] sm:$0xff]  ;;  %436 = vst.msk [vmem:[#allocation2 + $0xf1] sm:$0xff] %vm417_vm3, %v402_v47  ;;  %v339_v56 = vmul.f32 %v3439_v6, %v299_v31 }
  0x3f   : > { %437 = vst.msk [vmem:[#allocation2 + $0xf9] sm:$0xff] %vm417_vm3, %v403_v48  ;;  %438 = vst.msk [vmem:[#allocation2 + $0x109] sm:$0xff] %vm417_vm3, %v404_v49  ;;  %v340_v57 = vmul.f32 %v3439_v6, %v300_v38  ;;  %v341_v58 = vmul.f32 %v3439_v6, %v301_v44  ;;  %v342_v59 = vmul.f32 %v3439_v6, %v302_v45  ;;  %2689 = vrot.lane.b32.xlu1 %v3537_v39, %s3335_s7  ;;  %v494_v61 = vld [vmem:[#allocation2 + $0x91] sm:$0xff]  ;;  %v495_v62 = vld [vmem:[#allocation2 + $0x99] sm:$0xff]  ;;  %vm1927_vm9 = vcmask 195584  }
  0x40   : > { %v3560_v60 = vpack.i.bf16 %v493_v55, %v492_v54  ;;  %439 = vst.msk [vmem:[#allocation2 + $0x111] sm:$0xff] %vm417_vm3, %v405_v50  ;;  %v374_v63 = vadd.f32 %v3444_v7, %v336_v51  ;;  %v375_v0 = vadd.f32 %v3444_v7, %v337_v52  ;;  %v376_v1 = vadd.f32 %v3444_v7, %v338_v53  ;;  %v496_v3 = vld [vmem:[#allocation2 + $0xa9] sm:$0xff]  ;;  %v516_v54 = vld [vmem:[#allocation2 + $0x1a] sm:$0xff] }
  0x41   : > { %2694 = vrot.lane.b32.xlu0 %v3544_v46, %s3335_s7  ;;  %v3568_v2 = vpack.i.bf16 %v495_v62, %v494_v61  ;;  %v497_v4 = vld [vmem:[#allocation2 + $0xb1] sm:$0xff]  ;;  %v377_v5 = vadd.f32 %v3444_v7, %v339_v56  ;;  %v378_v8 = vadd.f32 %v3444_v7, %v340_v57  ;;  %v379_v9 = vadd.f32 %v3444_v7, %v341_v58  ;;  %v498_v11 = vld [vmem:[#allocation2 + $0xc1] sm:$0xff] }
  0x42   : > { %v499_v12 = vld [vmem:[#allocation2 + $0xc9] sm:$0xff]  ;;  %v406_v13 = vmax.f32 %v374_v63, 0.0  ;;  %v407_v14 = vmax.f32 %v375_v0, 0.0  ;;  %v408_v15 = vmax.f32 %v376_v1, 0.0  ;;  %v3576_v19 = vpack.i.bf16 %v497_v4, %v496_v3  ;;  %v518_v56 = vld [vmem:[#allocation2 + $0x32] sm:$0xff]  ;;  %v519_v57 = vld [vmem:[#allocation2 + $0x3a] sm:$0xff] }
  0x43   : > { %v409_v16 = vmax.f32 %v377_v5, 0.0  ;;  %v410_v17 = vmax.f32 %v378_v8, 0.0  ;;  %v411_v18 = vmax.f32 %v379_v9, 0.0  ;;  %2699 = vrot.lane.b32.xlu1 %v3560_v60, %s3335_s7  ;;  %v343_v20 = vmul.f32 %v3439_v6, %v303_v10  ;;  %v514_v50 = vld [vmem:[#allocation2 + $0x2] sm:$0xff]  ;;  %v515_v51 = vld [vmem:[#allocation2 + $0xa] sm:$0xff]  ;;  %v521_v62 = vld [vmem:[#allocation2 + $0x52] sm:$0xff] }
  0x44   : > { %440 = vst.msk [vmem:[#allocation2 + $0x121] sm:$0xff] %vm417_vm3, %v406_v13  ;;  %441 = vst.msk [vmem:[#allocation2 + $0x129] sm:$0xff] %vm417_vm3, %v407_v14  ;;  %v380_v21 = vadd.f32 %v3444_v7, %v342_v59  ;;  %v3585_v22 = vpack.i.bf16 %v499_v12, %v498_v11  ;;  %v500_v23 = vld [vmem:[#allocation2 + $0xd9] sm:$0xff]  ;;  %v2753_v53 = vpack.i.bf16 %v515_v51, %v514_v50  ;;  %v517_v55 = vld [vmem:[#allocation2 + $0x22] sm:$0xff]  ;;  %vm1960_vm10 = vcmask 228352  }
  0x45   : > { %442 = vst.msk [vmem:[#allocation2 + $0x139] sm:$0xff] %vm417_vm3, %v408_v15  ;;  %2704 = vrot.lane.b32.xlu0 %v3568_v2, %s3335_s7  ;;  %v501_v25 = vld [vmem:[#allocation2 + $0xe1] sm:$0xff]  ;;  %443 = vst.msk [vmem:[#allocation2 + $0x141] sm:$0xff] %vm417_vm3, %v409_v16  ;;  %v502_v26 = vld [vmem:[#allocation2 + $0xf1] sm:$0xff]  ;;  %v381_v28 = vadd.f32 %v3444_v7, %v343_v20  ;;  %v3607_v58 = vpack.i.bf16 %v517_v55, %v516_v54  ;;  %v3610_v59 = vpack.i.bf16 %v519_v57, %v518_v56  ;;  %vm1993_vm11 = vcmask 261120  }
  0x46   : > { %444 = vst.msk [vmem:[#allocation2 + $0x151] sm:$0xff] %vm417_vm3, %v410_v17  ;;  %445 = vst.msk [vmem:[#allocation2 + $0x159] sm:$0xff] %vm417_vm3, %v411_v18  ;;  %v503_v27 = vld [vmem:[#allocation2 + $0xf9] sm:$0xff]  ;;  %v412_v29 = vmax.f32 %v380_v21, 0.0  ;;  %v3593_v30 = vpack.i.bf16 %v501_v25, %v500_v23  ;;  %v504_v34 = vld [vmem:[#allocation2 + $0x109] sm:$0xff]  ;;  %vm2062_vm12 = vcmask 293888  }
  0x47   : > { %2709 = vrot.lane.b32.xlu1 %v3576_v19, %s3335_s7  ;;  %v413_v31 = vmax.f32 %v381_v28, 0.0  ;;  %v2723_v33 = vpack.i.bf16 %v503_v27, %v502_v26  ;;  %v505_v35 = vld [vmem:[#allocation2 + $0x111] sm:$0xff]  ;;  %v522_v63 = vld [vmem:[#allocation2 + $0x62] sm:$0xff]  ;;  %v524_v4 = vld [vmem:[#allocation2 + $0x7a] sm:$0xff]  ;;  %vm2478_vm13 = vcmask 1040384  }
  0x48   : > { %446 = vst.msk [vmem:[#allocation2 + $0x169] sm:$0xff] %vm417_vm3, %v412_v29  ;;  %v2728_v38 = vpack.i.bf16 %v505_v35, %v504_v34  ;;  %v520_v61 = vld [vmem:[#allocation2 + $0x4a] sm:$0xff]  ;;  %v525_v5 = vld [vmem:[#allocation2 + $0x82] sm:$0xff]  ;;  %v526_v8 = vld [vmem:[#allocation2 + $0x92] sm:$0xff] }
  0x49   : > { %2714 = vrot.lane.b32.xlu0 %v3585_v22, %s3335_s7  ;;  %447 = vst.msk [vmem:[#allocation2 + $0x171] sm:$0xff] %vm417_vm3, %v413_v31  ;;  %v523_v0 = vld [vmem:[#allocation2 + $0x6a] sm:$0xff]  ;;  %v3614_v1 = vpack.i.bf16 %v521_v62, %v520_v61  ;;  %v527_v9 = vld [vmem:[#allocation2 + $0x9a] sm:$0xff]  ;;  %v3622_v10 = vpack.i.bf16 %v525_v5, %v524_v4  ;;  %v529_v13 = vld [vmem:[#allocation2 + $0xb2] sm:$0xff] }
  0x4a   : > { %v3618_v3 = vpack.i.bf16 %v523_v0, %v522_v63  ;;  %v3626_v11 = vpack.i.bf16 %v527_v9, %v526_v8  ;;  %v528_v12 = vld [vmem:[#allocation2 + $0xaa] sm:$0xff]  ;;  %v530_v14 = vld [vmem:[#allocation2 + $0xc2] sm:$0xff]  ;;  %v532_v18 = vld [vmem:[#allocation2 + $0xda] sm:$0xff] }
  0x4b   : > { %v506_v36 = vld [vmem:[#allocation2 + $0x121] sm:$0xff]  ;;  %v507_v37 = vld [vmem:[#allocation2 + $0x129] sm:$0xff]  ;;  %2719 = vrot.lane.b32.xlu1 %v3593_v30, %s3335_s7  ;;  %v3630_v16 = vpack.i.bf16 %v529_v13, %v528_v12  ;;  %v534_v21 = vld [vmem:[#allocation2 + $0xf2] sm:$0xff] }
  0x4c   : > { %v2733_v40 = vpack.i.bf16 %v507_v37, %v506_v36  ;;  %v508_v41 = vld [vmem:[#allocation2 + $0x139] sm:$0xff]  ;;  %v509_v42 = vld [vmem:[#allocation2 + $0x141] sm:$0xff]  ;;  %v531_v15 = vld [vmem:[#allocation2 + $0xca] sm:$0xff] }
  0x4d   : > { %2724 = vrot.lane.b32.xlu0 %v2723_v33, %s3335_s7  ;;  %v510_v43 = vld [vmem:[#allocation2 + $0x151] sm:$0xff]  ;;  %v511_v44 = vld [vmem:[#allocation2 + $0x159] sm:$0xff]  ;;  %v2738_v45 = vpack.i.bf16 %v509_v42, %v508_v41  ;;  %v3634_v17 = vpack.i.bf16 %v531_v15, %v530_v14  ;;  %v533_v20 = vld [vmem:[#allocation2 + $0xe2] sm:$0xff] }
  0x4e   : > { %v2743_v47 = vpack.i.bf16 %v511_v44, %v510_v43  ;;  %v535_v23 = vld [vmem:[#allocation2 + $0xfa] sm:$0xff]  ;;  %v3638_v25 = vpack.i.bf16 %v533_v20, %v532_v18  ;;  %v536_v27 = vld [vmem:[#allocation2 + $0x10a] sm:$0xff]  ;;  %v537_v28 = vld [vmem:[#allocation2 + $0x112] sm:$0xff] }
  0x4f   : > { %2729 = vrot.lane.b32.xlu1 %v2728_v38, %s3335_s7  ;;  %v512_v48 = vld [vmem:[#allocation2 + $0x169] sm:$0xff]  ;;  %v3642_v26 = vpack.i.bf16 %v535_v23, %v534_v21  ;;  %v3646_v33 = vpack.i.bf16 %v537_v28, %v536_v27  ;;  %v540_v35 = vld [vmem:[#allocation2 + $0x13a] sm:$0xff]  ;;  %v542_v37 = vld [vmem:[#allocation2 + $0x152] sm:$0xff] }
  0x50   : > { %v513_v49 = vld [vmem:[#allocation2 + $0x171] sm:$0xff]  ;;  %v538_v29 = vld [vmem:[#allocation2 + $0x122] sm:$0xff]  ;;  %v543_v38 = vld [vmem:[#allocation2 + $0x15a] sm:$0xff] }
  0x51   : > { %2734 = vrot.lane.b32.xlu0 %v2733_v40, %s3335_s7  ;;  %v2748_v52 = vpack.i.bf16 %v513_v49, %v512_v48  ;;  %v539_v31 = vld [vmem:[#allocation2 + $0x12a] sm:$0xff]  ;;  %v541_v36 = vld [vmem:[#allocation2 + $0x142] sm:$0xff]  ;;  %v2823_v41 = vpack.i.bf16 %v543_v38, %v542_v37  ;;  %v545_v43 = vld [vmem:[#allocation2 + $0x172] sm:$0xff] }
  0x52   : > { %v2813_v34 = vpack.i.bf16 %v539_v31, %v538_v29  ;;  %v2818_v40 = vpack.i.bf16 %v541_v36, %v540_v35  ;;  %v544_v42 = vld [vmem:[#allocation2 + $0x16a] sm:$0xff]  ;;  %v3653_v44 = vld [vmem:[#allocation2 + $0x18] sm:$0xff]  ;;  %v3679_v55 = vld [vmem:[#allocation2 + $0x60] sm:$0xff] }
  0x53   : > { %2739 = vrot.lane.b32.xlu1 %v2738_v45, %s3335_s7  ;;  %v3655_v45 = vld [vmem:[#allocation2 + $0x20] sm:$0xff]  ;;  %v3661_v49 = vld [vmem:[#allocation2 + $0x30] sm:$0xff]  ;;  %v3663_v50 = vld [vmem:[#allocation2 + $0x38] sm:$0xff] }
  0x54   : > { %v2833_v48 = vpack.i.bf16 %v3655_v45, %v3653_v44  ;;  %v3665_v51 = vld [vmem:[#allocation2 + $0x48] sm:$0xff]  ;;  %v3683_v57 = vld [vmem:[#allocation2 + $0x78] sm:$0xff]  ;;  %v3685_v61 = vld [vmem:[#allocation2 + $0x80] sm:$0xff] }
  0x55   : > { %2744 = vrot.lane.b32.xlu0 %v2743_v47, %s3335_s7  ;;  %v2828_v47 = vpack.i.bf16 %v545_v43, %v544_v42  ;;  %v3681_v56 = vld [vmem:[#allocation2 + $0x68] sm:$0xff]  ;;  %v3697_v63 = vpack.i.bf16 %v3685_v61, %v3683_v57  ;;  %v556_v0 = vld [vmem:[#allocation2 + $0x90] sm:$0xff]  ;;  %v557_v4 = vld [vmem:[#allocation2 + $0x98] sm:$0xff] }
  0x56   : > { %v3691_v62 = vpack.i.bf16 %v3681_v56, %v3679_v55  ;;  %v558_v5 = vld [vmem:[#allocation2 + $0xa8] sm:$0xff]  ;;  %v559_v8 = vld [vmem:[#allocation2 + $0xb0] sm:$0xff]  ;;  %v3701_v9 = vpack.i.bf16 %v557_v4, %v556_v0  ;;  %v3707_v13 = vld [vmem:[#allocation2 + $0xc0] sm:$0xff] }
  0x57   : > { %2749 = vrot.lane.b32.xlu1 %v2748_v52, %s3335_s7  ;;  %v3667_v52 = vld [vmem:[#allocation2 + $0x50] sm:$0xff]  ;;  %v3705_v12 = vpack.i.bf16 %v559_v8, %v558_v5  ;;  %v3709_v14 = vld [vmem:[#allocation2 + $0xc8] sm:$0xff]  ;;  %v3711_v15 = vld [vmem:[#allocation2 + $0xd8] sm:$0xff] }
  0x58   : > { %v3677_v54 = vpack.i.bf16 %v3667_v52, %v3665_v51  ;;  %v3713_v18 = vld [vmem:[#allocation2 + $0xe0] sm:$0xff]  ;;  %v3719_v20 = vpack.i.bf16 %v3709_v14, %v3707_v13  ;;  %v3727_v23 = vld [vmem:[#allocation2 + $0xf0] sm:$0xff]  ;;  %v3729_v27 = vld [vmem:[#allocation2 + $0xf8] sm:$0xff] }
  0x59   : > { %2754 = vrot.lane.b32.xlu0 %v2753_v53, %s3336_s8  ;;  %v3672_v53 = vpack.i.bf16 %v3663_v50, %v3661_v49  ;;  %v3725_v21 = vpack.i.bf16 %v3713_v18, %v3711_v15  ;;  %v566_v28 = vld [vmem:[#allocation2 + $0x108] sm:$0xff]  ;;  %v567_v29 = vld [vmem:[#allocation2 + $0x110] sm:$0xff]  ;;  %v3735_v31 = vpack.i.bf16 %v3729_v27, %v3727_v23  ;;  %v3315_v38 = vld [vmem:[%s4592_s1] sm:$0xff]  }
  0x5a   : > { %v3313_v35 = vld [vmem:[%s4592_s1 + $0x10] ss:$0 sps:$4 sm:$0x33]   ;;  %v3314_v37 = vld [vmem:[%s4592_s1 + $0x8] sm:$0xff]  }
  0x5b   : > { %2759 = vrot.lane.b32.xlu1 %v3607_v58, %s3336_s8  ;;  %2654 = vmatprep.subr.msk.bf16.mxu0 %vm2111_vm4, %v3313_v35  ;;  %v2113_v36 = vsel %vm2111_vm4, %v3313_v35, 0 }
  0x5c   : > { %2655 = vmatprep.subr.msk.bf16.mxu1 %vm2111_vm4, %v3313_v35  ;;  %2611 = vmatpush3.bf16.msra.mxu0 %v2113_v36  ;;  %v596_v35 = vld [vmem:[#allocation2 + $0xf1] sm:$0xff] }
  0x5d   : > { %2764 = vrot.lane.b32.xlu0 %v3610_v59, %s3336_s8  ;;  %2651 = vmatpush3.bf16.msra.mxu1 %v2113_v36  ;;  %v597_v36 = vld [vmem:[#allocation2 + $0xf9] sm:$0xff] }
  0x5e   : > { %2612 = vmatprep.subr.bf16.mxu0 %v3314_v37  ;;  %2649 = vmatprep.subr.bf16.mxu1 %v3314_v37 }
  0x5f   : > { %2769 = vrot.lane.b32.xlu1 %v3614_v1, %s3336_s8 }
  0x60   : > { %2613 = vmatpush3.bf16.msra.mxu0 %v3314_v37 }
  0x61   : > { %2774 = vrot.lane.b32.xlu0 %v3618_v3, %s3336_s8  ;;  %2652 = vmatpush3.bf16.msra.mxu1 %v3314_v37  ;;  %v3093_v37 = vpack.i.bf16 %v597_v36, %v596_v35 }
  0x62   : > { %2614 = vmatprep.subr.bf16.mxu0 %v3315_v38  ;;  %2650 = vmatprep.subr.bf16.mxu1 %v3315_v38 }
  0x63   : > { %2779 = vrot.lane.b32.xlu1 %v3622_v10, %s3336_s8 }
  0x64   : > { %2615 = vmatpush3.bf16.msra.mxu0 %v3315_v38 }
  0x65   : > { %2784 = vrot.lane.b32.xlu0 %v3626_v11, %s3336_s8  ;;  %2653 = vmatpush3.bf16.msra.mxu1 %v3315_v38 }
  0x67   : > { %2789 = vrot.lane.b32.xlu1 %v3630_v16, %s3336_s8 }
  0x69   : > { %2794 = vrot.lane.b32.xlu0 %v3634_v17, %s3336_s8 }
  0x6b   : > { %2799 = vrot.lane.b32.xlu1 %v3638_v25, %s3336_s8 }
  0x6d   : > { %2804 = vrot.lane.b32.xlu0 %v3642_v26, %s3336_s8 }
  0x6f   : > { %2809 = vrot.lane.b32.xlu1 %v3646_v33, %s3336_s8 }
  0x71   : > { %2814 = vrot.lane.b32.xlu0 %v2813_v34, %s3336_s8  ;;  %v3739_v34 = vpack.i.bf16 %v567_v29, %v566_v28  ;;  %v595_v28 = vld [vmem:[#allocation2 + $0xe1] sm:$0xff] }
  0x73   : > { %2819 = vrot.lane.b32.xlu1 %v2818_v40, %s3336_s8  ;;  %v305_v40 = vld [vmem:[%s3388_s24 + $0xf8] sm:$0xff] }
  0x74   : > { %v345_v42 = vmul.f32 %v3439_v6, %v305_v40 }
  0x75   : > { %2824 = vrot.lane.b32.xlu0 %v2823_v41, %s3336_s8 }
  0x77   : > { %2829 = vrot.lane.b32.xlu1 %v2828_v47, %s3336_s8 }
  0x79   : > { %2834 = vrot.lane.b32.xlu0 %v2833_v48, %s3337_s9 }
  0x7b   : > { %2839 = vrot.lane.b32.xlu1 %v3672_v53, %s3337_s9 }
  0x7d   : > { %2844 = vrot.lane.b32.xlu0 %v3677_v54, %s3337_s9 }
  0x7f   : > { %2849 = vrot.lane.b32.xlu1 %v3691_v62, %s3337_s9 }
  0x81   : > { %2854 = vrot.lane.b32.xlu0 %v3697_v63, %s3337_s9 }
  0x83   : > { %2859 = vrot.lane.b32.xlu1 %v3701_v9, %s3337_s9 }
  0x85   : > { %2864 = vrot.lane.b32.xlu0 %v3705_v12, %s3337_s9 }
  0x87   : > { %2869 = vrot.lane.b32.xlu1 %v3719_v20, %s3337_s9 }
  0x89   : > { %2874 = vrot.lane.b32.xlu0 %v3725_v21, %s3337_s9 }
  0x8b   : > { %2879 = vrot.lane.b32.xlu1 %v3735_v31, %s3337_s9 }
  0x8d   : > { %2884 = vrot.lane.b32.xlu0 %v3739_v34, %s3337_s9 }
  0x8f   : > { %2889 = vrot.lane.b32.xlu1 %v3528_v32, %s3338_s12  ;;  %v304_v32 = vld [vmem:[%s3388_s24 + $0xf0] sm:$0xff] }
  0x90   : > { %v344_v41 = vmul.f32 %v3439_v6, %v304_v32 }
  0x91   : > { %2894 = vrot.lane.b32.xlu0 %v3520_v24, %s3338_s12 }
  0x92   : > { %v382_v43 = vadd.f32 %v3444_v7, %v344_v41 }
  0x93   : > { %2899 = vrot.lane.b32.xlu1 %v3607_v58, %s3339_s15  ;;  %v383_v58 = vadd.f32 %v3444_v7, %v345_v42  ;;  %v3906_v42 = vld [vmem:[#allocation2 + $0x158] sm:$0xff] }
  0x94   : > { %v414_v47 = vmax.f32 %v382_v43, 0.0 }
  0x95   : > { %2904 = vrot.lane.b32.xlu0 %v3610_v59, %s3339_s15  ;;  %v415_v48 = vmax.f32 %v383_v58, 0.0  ;;  %v693_v58 = vld [vmem:[#allocation2 + $0x109] sm:$0xff] }
  0x96   : > { %448 = vst.msk [vmem:[#allocation2 + $0x181] sm:$0xff] %vm417_vm3, %v414_v47  ;;  %v694_v47 = vld [vmem:[#allocation2 + $0x111] sm:$0xff] }
  0x97   : > { %2909 = vrot.lane.b32.xlu1 %v3672_v53, %s3340_s20  ;;  %449 = vst.msk [vmem:[#allocation2 + $0x189] sm:$0xff] %vm417_vm3, %v415_v48 }
  0x99   : > { %2914 = vrot.lane.b32.xlu0 %v3677_v54, %s3340_s20 }
  0x9b   : > { %2919 = vrot.lane.b32.xlu1 %v3520_v24, %s3341_s21 }
  0x9d   : > { %2924 = vrot.lane.b32.xlu0 %v3537_v39, %s3341_s21 }
  0x9e   : > { %v3790_v6 = vpop.permute.xlu0 %2674 }
  0x9f   : > { %2929 = vrot.lane.b32.xlu1 %v3610_v59, %s3342_s22 }
  0xa1   : > { %2934 = vrot.lane.b32.xlu0 %v3614_v1, %s3342_s22 }
  0xa3   : > { %2939 = vrot.lane.b32.xlu1 %v3537_v39, %s3338_s12 }
  0xa5   : > { %2944 = vrot.lane.b32.xlu0 %v3544_v46, %s3338_s12 }
  0xa7   : > { %2949 = vrot.lane.b32.xlu1 %v3614_v1, %s3339_s15 }
  0xa9   : > { %2954 = vrot.lane.b32.xlu0 %v3618_v3, %s3339_s15 }
  0xab   : > { %2959 = vrot.lane.b32.xlu1 %v3691_v62, %s3340_s20 }
  0xad   : > { %2964 = vrot.lane.b32.xlu0 %v3697_v63, %s3340_s20  ;;  %v3796_v7 = vpop.permute.xlu1 %2684 }
  0xaf   : > { %v3798_v24 = vpop.permute.xlu0 %2679  ;;  %2969 = vrot.lane.b32.xlu1 %v3544_v46, %s3341_s21 }
  0xb1   : > { %2974 = vrot.lane.b32.xlu0 %v3560_v60, %s3341_s21  ;;  %v3804_v39 = vpop.permute.xlu1 %2689 }
  0xb3   : > { %v3806_v59 = vpop.permute.xlu0 %2694  ;;  %2979 = vrot.lane.b32.xlu1 %v3618_v3, %s3342_s22 }
  0xb5   : > { %2984 = vrot.lane.b32.xlu0 %v3622_v10, %s3342_s22  ;;  %v3812_v1 = vpop.permute.xlu1 %2699 }
  0xb7   : > { %v3814_v53 = vpop.permute.xlu0 %2704  ;;  %2989 = vrot.lane.b32.xlu1 %v3560_v60, %s3338_s12 }
  0xb8   : > { %4609 = vst [vmem:[#allocation3_spill] sm:$0xff] %v3814_v53 }
  0xb9   : > { %2994 = vrot.lane.b32.xlu0 %v3568_v2, %s3338_s12  ;;  %v3820_v46 = vpop.permute.xlu1 %2709 }
  0xba   : > { %4610 = vst [vmem:[#allocation4_spill] sm:$0xff] %v3820_v46 }
  0xbb   : > { %v3822_v54 = vpop.permute.xlu0 %2714  ;;  %2999 = vrot.lane.b32.xlu1 %v3622_v10, %s3339_s15 }
  0xbd   : > { %3004 = vrot.lane.b32.xlu0 %v3626_v11, %s3339_s15  ;;  %v3828_v3 = vpop.permute.xlu1 %2719 }
  0xbf   : > { %v3830_v62 = vpop.permute.xlu0 %2724  ;;  %3009 = vrot.lane.b32.xlu1 %v3701_v9, %s3340_s20 }
  0xc1   : > { %3014 = vrot.lane.b32.xlu0 %v3705_v12, %s3340_s20  ;;  %v3836_v60 = vpop.permute.xlu1 %2729 }
  0xc2   : > { %4611 = vst [vmem:[#allocation5_spill] sm:$0xff] %v3836_v60  ;;  %v477_v60 = vld [vmem:[#allocation2 + $0x140] sm:$0xff] }
  0xc3   : > { %v3838_v63 = vpop.permute.xlu0 %2734  ;;  %3019 = vrot.lane.b32.xlu1 %v3568_v2, %s3341_s21 }
  0xc4   : > { %4612 = vst [vmem:[#allocation6_spill] sm:$0xff] %v3838_v63 }
  0xc5   : > { %3024 = vrot.lane.b32.xlu0 %v3576_v19, %s3341_s21  ;;  %v3844_v10 = vpop.permute.xlu1 %2739 }
  0xc6   : > { %4613 = vst [vmem:[#allocation7_spill] sm:$0xff] %v3844_v10 }
  0xc7   : > { %v2745_v0 = vpop.permute.xlu0 %2744  ;;  %3029 = vrot.lane.b32.xlu1 %v3626_v11, %s3342_s22 }
  0xc8   : > { %v2747_v40 = vunpack.i.h.bf16 %v2745_v0  ;;  %v2746_v41 = vunpack.i.l.bf16 %v2745_v0 }
  0xc9   : > { %3034 = vrot.lane.b32.xlu0 %v3630_v16, %s3342_s22  ;;  %v3850_v4 = vpop.permute.xlu1 %2749 }
  0xca   : > { %v1792_v0 = vsel %vm417_vm3, %v3906_v42, %v2747_v40 }
  0xcb   : > { %v3852_v5 = vpop.permute.xlu0 %2754  ;;  %3039 = vrot.lane.b32.xlu1 %v3576_v19, %s3338_s12 }
  0xcd   : > { %3044 = vrot.lane.b32.xlu0 %v3585_v22, %s3338_s12  ;;  %v3858_v2 = vpop.permute.xlu1 %2759 }
  0xcf   : > { %v3860_v8 = vpop.permute.xlu0 %2764  ;;  %3049 = vrot.lane.b32.xlu1 %v3630_v16, %s3339_s15  ;;  %v594_v16 = vld [vmem:[#allocation2 + $0xd9] sm:$0xff] }
  0xd1   : > { %3054 = vrot.lane.b32.xlu0 %v3634_v17, %s3339_s15  ;;  %v3866_v11 = vpop.permute.xlu1 %2769 }
  0xd3   : > { %v3868_v9 = vpop.permute.xlu0 %2774  ;;  %3059 = vrot.lane.b32.xlu1 %v3719_v20, %s3340_s20 }
  0xd5   : > { %3064 = vrot.lane.b32.xlu0 %v3725_v21, %s3340_s20  ;;  %v3874_v19 = vpop.permute.xlu1 %2779  ;;  %v3088_v21 = vpack.i.bf16 %v595_v28, %v594_v16  ;;  %v2752_v16 = vunpack.i.h.bf16 %v3850_v4  ;;  %v2751_v28 = vunpack.i.l.bf16 %v3850_v4  ;;  %v3123_v4 = vpack.i.bf16 %v694_v47, %v693_v58 }
  0xd7   : > { %v3876_v12 = vpop.permute.xlu0 %2784  ;;  %3069 = vrot.lane.b32.xlu1 %v3585_v22, %s3341_s21 }
  0xd8   : > { %4614 = vst [vmem:[#allocation8_spill] sm:$0xff] %v3876_v12 }
  0xd9   : > { %3074 = vrot.lane.b32.xlu0 %v3593_v30, %s3341_s21  ;;  %v3882_v29 = vpop.permute.xlu1 %2789 }
  0xda   : > { %4615 = vst [vmem:[#allocation9_spill] sm:$0xff] %v3882_v29 }
  0xdb   : > { %v3884_v20 = vpop.permute.xlu0 %2794  ;;  %3079 = vrot.lane.b32.xlu1 %v3634_v17, %s3342_s22  ;;  %v3902_v17 = vld [vmem:[#allocation2 + $0x150] sm:$0xff] }
  0xdc   : > { %v1791_v36 = vsel %vm417_vm3, %v3902_v17, %v2746_v41 }
  0xdd   : > { %3084 = vrot.lane.b32.xlu0 %v3638_v25, %s3342_s22  ;;  %v3890_v22 = vpop.permute.xlu1 %2799 }
  0xde   : > { %v2802_v53 = vunpack.i.h.bf16 %v3890_v22 }
  0xdf   : > { %v3892_v38 = vpop.permute.xlu0 %2804  ;;  %3089 = vrot.lane.b32.xlu1 %v3088_v21, %s3338_s12  ;;  %v3918_v21 = vld [vmem:[#allocation2 + $0x168] sm:$0xff] }
  0xe1   : > { %3094 = vrot.lane.b32.xlu0 %v3093_v37, %s3338_s12  ;;  %v3896_v30 = vpop.permute.xlu1 %2809 }
  0xe2   : > { %4616 = vst [vmem:[#allocation10_spill] sm:$0xff] %v3896_v30  ;;  %v1793_v30 = vsel %vm417_vm3, %v3918_v21, %v2751_v28  ;;  %v601_v28 = vld [vmem:[#allocation2 + $0x129] sm:$0xff] }
  0xe3   : > { %v3898_v32 = vpop.permute.xlu0 %2814  ;;  %3099 = vrot.lane.b32.xlu1 %v3638_v25, %s3339_s15 }
  0xe4   : > { %4617 = vst [vmem:[#allocation11_spill] sm:$0xff] %v3898_v32 }
  0xe5   : > { %3104 = vrot.lane.b32.xlu0 %v3642_v26, %s3339_s15  ;;  %v3908_v43 = vpop.permute.xlu1 %2819 }
  0xe6   : > { %4618 = vst [vmem:[#allocation12_spill] sm:$0xff] %v3908_v43  ;;  %v3920_v43 = vld [vmem:[#allocation2 + $0x170] sm:$0xff] }
  0xe7   : > { %v2825_v48 = vpop.permute.xlu0 %2824  ;;  %3109 = vrot.lane.b32.xlu1 %v3735_v31, %s3340_s20  ;;  %v1794_v41 = vsel %vm417_vm3, %v3920_v43, %v2752_v16 }
  0xe8   : > { %v2827_v35 = vunpack.i.h.bf16 %v2825_v48  ;;  %v2826_v25 = vunpack.i.l.bf16 %v2825_v48 }
  0xe9   : > { %3114 = vrot.lane.b32.xlu0 %v3739_v34, %s3340_s20  ;;  %v2830_v32 = vpop.permute.xlu1 %2829 }
  0xea   : > { %v3925_v48 = vsel %vm1795_vm5, %v1791_v36, %v2826_v25  ;;  %v3928_v31 = vsel %vm1795_vm5, %v1792_v0, %v2827_v35  ;;  %v2832_v40 = vunpack.i.h.bf16 %v2830_v32  ;;  %v2831_v10 = vunpack.i.l.bf16 %v2830_v32  ;;  %v474_v32 = vld [vmem:[#allocation2 + $0x120] sm:$0xff]  ;;  %v475_v35 = vld [vmem:[#allocation2 + $0x128] sm:$0xff] }
  0xeb   : > { %4619 = vst [vmem:[#allocation13_spill] sm:$0xff] %v3925_v48  ;;  %4620 = vst [vmem:[#allocation14_spill] sm:$0xff] %v3928_v31  ;;  %v3930_v63 = vpop.permute.xlu0 %2834  ;;  %3119 = vrot.lane.b32.xlu1 %v3093_v37, %s3341_s21  ;;  %v3138_v16 = vpack.i.bf16 %v475_v35, %v474_v32  ;;  %v600_v37 = vld [vmem:[#allocation2 + $0x121] sm:$0xff]  ;;  %v2716_v32 = vunpack.i.l.bf16 %v3822_v54  ;;  %v476_v48 = vld [vmem:[#allocation2 + $0x138] sm:$0xff] }
  0xec   : > { %v3938_v34 = vsel %vm1795_vm5, %v1794_v41, %v2832_v40  ;;  %v3941_v58 = vsel %vm1795_vm5, %v1793_v30, %v2831_v10  ;;  %v3148_v30 = vpack.i.bf16 %v601_v28, %v600_v37  ;;  %v632_v36 = vld [vmem:[#allocation2 + $0x122] sm:$0xff]  ;;  %v633_v40 = vld [vmem:[#allocation2 + $0x12a] sm:$0xff]  ;;  %v2797_v37 = vunpack.i.h.bf16 %v3884_v20 }
  0xed   : > { %4621 = vst [vmem:[#allocation15_spill] sm:$0xff] %v3938_v34  ;;  %4622 = vst [vmem:[#allocation16_spill] sm:$0xff] %v3941_v58  ;;  %3124 = vrot.lane.b32.xlu0 %v3123_v4, %s3341_s21  ;;  %v3944_v47 = vpop.permute.xlu1 %2839  ;;  %v697_v34 = vld [vmem:[#allocation2 + $0x139] sm:$0xff]  ;;  %v698_v58 = vld [vmem:[#allocation2 + $0x141] sm:$0xff]  ;;  %v3158_v31 = vpack.i.bf16 %v633_v40, %v632_v36  ;;  %v2722_v28 = vunpack.i.h.bf16 %v3828_v3  ;;  %v3973_v29 = vpack.i.bf16 %v477_v60, %v476_v48  ;;  %v2727_v40 = vunpack.i.h.bf16 %v3830_v62 }
  0xee   : > { %v3975_v12 = vpack.i.bf16 %v698_v58, %v697_v34  ;;  %v2807_v34 = vunpack.i.h.bf16 %v3892_v38 }
  0xef   : > { %v3946_v25 = vpop.permute.xlu0 %2844  ;;  %3129 = vrot.lane.b32.xlu1 %v3642_v26, %s3342_s22  ;;  %v2717_v26 = vunpack.i.h.bf16 %v3822_v54  ;;  %v2721_v54 = vunpack.i.l.bf16 %v3828_v3  ;;  %v2801_v3 = vunpack.i.l.bf16 %v3890_v22 }
  0xf1   : > { %3134 = vrot.lane.b32.xlu0 %v3646_v33, %s3342_s22  ;;  %v3952_v0 = vpop.permute.xlu1 %2849  ;;  %v1780_v36 = vsel %vm417_vm3, %v3709_v14, %v2717_v26  ;;  %v1781_v22 = vsel %vm417_vm3, %v3711_v15, %v2721_v54 }
  0xf2   : > { %v1813_v14 = vsel %vm1795_vm5, %v1780_v36, %v2797_v37  ;;  %v1814_v15 = vsel %vm1795_vm5, %v1781_v22, %v2801_v3  ;;  %v637_v22 = vld [vmem:[#allocation2 + $0x15a] sm:$0xff] }
  0xf3   : > { %v3954_v10 = vpop.permute.xlu0 %2854  ;;  %3139 = vrot.lane.b32.xlu1 %v3138_v16, %s3337_s9 }
  0xf5   : > { %3144 = vrot.lane.b32.xlu0 %v3123_v4, %s3338_s12  ;;  %v3958_v41 = vpop.permute.xlu1 %2859  ;;  %v2796_v4 = vunpack.i.l.bf16 %v3884_v20  ;;  %v1779_v20 = vsel %vm417_vm3, %v3707_v13, %v2716_v32  ;;  %v2806_v13 = vunpack.i.l.bf16 %v3892_v38  ;;  %v1784_v32 = vsel %vm417_vm3, %v3729_v27, %v2727_v40 }
  0xf6   : > { %v1817_v36 = vsel %vm1795_vm5, %v1784_v32, %v2807_v34  ;;  %v605_v34 = vld [vmem:[#allocation2 + $0x159] sm:$0xff]  ;;  %v451_v32 = vld [vmem:[#allocation2 + $0x8] sm:$0xff] }
  0xf7   : > { %v3962_v35 = vpop.permute.xlu0 %2864  ;;  %3149 = vrot.lane.b32.xlu1 %v3148_v30, %s3338_s12  ;;  %v1812_v48 = vsel %vm1795_vm5, %v1779_v20, %v2796_v4  ;;  %v730_v20 = vld [vmem:[#allocation2 + $0x142] sm:$0xff] }
  0xf8   : > { %4623 = vst [vmem:[#allocation17_spill] sm:$0xff] %v3962_v35 }
  0xf9   : > { %3154 = vrot.lane.b32.xlu0 %v3646_v33, %s3339_s15  ;;  %v3971_v35 = vpop.permute.xlu1 %2869  ;;  %v2726_v33 = vunpack.i.l.bf16 %v3830_v62  ;;  %v1782_v62 = vsel %vm417_vm3, %v3713_v18, %v2722_v28 }
  0xfa   : > { %4624 = vst [vmem:[#allocation18_spill] sm:$0xff] %v3971_v35  ;;  %v1815_v18 = vsel %vm1795_vm5, %v1782_v62, %v2802_v53  ;;  %v729_v53 = vld [vmem:[#allocation2 + $0x13a] sm:$0xff]  ;;  %v636_v62 = vld [vmem:[#allocation2 + $0x152] sm:$0xff] }
  0xfb   : > { %v2875_v46 = vpop.permute.xlu0 %2874  ;;  %3159 = vrot.lane.b32.xlu1 %v3158_v31, %s3339_s15  ;;  %v1783_v38 = vsel %vm417_vm3, %v3727_v23, %v2726_v33 }
  0xfc   : > { %v2877_v35 = vunpack.i.h.bf16 %v2875_v46  ;;  %v2876_v60 = vunpack.i.l.bf16 %v2875_v46 }
  0xfd   : > { %3164 = vrot.lane.b32.xlu0 %v3138_v16, %s3340_s20  ;;  %v2880_v26 = vpop.permute.xlu1 %2879 }
  0xfe   : > { %v3996_v46 = vsel %vm1828_vm6, %v1812_v48, %v2876_v60  ;;  %v3999_v58 = vsel %vm1828_vm6, %v1813_v14, %v2877_v35  ;;  %v2882_v16 = vunpack.i.h.bf16 %v2880_v26  ;;  %v2881_v37 = vunpack.i.l.bf16 %v2880_v26  ;;  %v604_v14 = vld [vmem:[#allocation2 + $0x151] sm:$0xff]  ;;  %v450_v26 = vld [vmem:[#allocation2] sm:$0xff] }
  0xff   : > { %v2885_v4 = vpop.permute.xlu0 %2884  ;;  %3169 = vrot.lane.b32.xlu1 %v3973_v29, %s3340_s20  ;;  %v1816_v35 = vsel %vm1795_vm5, %v1783_v38, %v2806_v13  ;;  %v4030_v48 = vpack.i.bf16 %v730_v20, %v729_v53  ;;  %v2676_v13 = vunpack.i.l.bf16 %v3790_v6  ;;  %v2682_v38 = vunpack.i.h.bf16 %v3798_v24 }
 0x100   : > { %v2887_v28 = vunpack.i.h.bf16 %v2885_v4  ;;  %v2886_v54 = vunpack.i.l.bf16 %v2885_v4  ;;  %v4012_v27 = vsel %vm1828_vm6, %v1814_v15, %v2881_v37  ;;  %v4015_v23 = vsel %vm1828_vm6, %v1815_v18, %v2882_v16 }
 0x101   : > { %3174 = vrot.lane.b32.xlu0 %v3148_v30, %s3341_s21  ;;  %v4024_v3 = vpop.permute.xlu1 %2889  ;;  %v2677_v30 = vunpack.i.h.bf16 %v3790_v6  ;;  %v2681_v16 = vunpack.i.l.bf16 %v3798_v24  ;;  %v2757_v37 = vunpack.i.h.bf16 %v3852_v5  ;;  %v2756_v4 = vunpack.i.l.bf16 %v3852_v5 }
 0x102   : > { %v4019_v40 = vsel %vm1828_vm6, %v1816_v35, %v2886_v54  ;;  %v4022_v33 = vsel %vm1828_vm6, %v1817_v36, %v2887_v28  ;;  %v2762_v15 = vunpack.i.h.bf16 %v3858_v2  ;;  %v2761_v6 = vunpack.i.l.bf16 %v3858_v2 }
 0x103   : > { %v4026_v60 = vpop.permute.xlu0 %2894  ;;  %3179 = vrot.lane.b32.xlu1 %v3975_v12, %s3341_s21  ;;  %v4045_v54 = vpack.i.bf16 %v605_v34, %v604_v14  ;;  %v2837_v24 = vunpack.i.h.bf16 %v3930_v63  ;;  %v2836_v35 = vunpack.i.l.bf16 %v3930_v63  ;;  %v4051_v5 = vpack.i.bf16 %v637_v22, %v636_v62 }
 0x104   : > { %v4055_v2 = vpack.i.bf16 %v3920_v43, %v3918_v21  ;;  %v1763_v36 = vsel %vm417_vm3, %v450_v26, %v2676_v13  ;;  %v2841_v53 = vunpack.i.l.bf16 %v3944_v47  ;;  %v1765_v63 = vsel %vm417_vm3, %v3653_v44, %v2681_v16 }
 0x105   : > { %3184 = vrot.lane.b32.xlu0 %v3158_v31, %s3342_s22  ;;  %v2900_v18 = vpop.permute.xlu1 %2899  ;;  %v4043_v31 = vpack.i.bf16 %v3906_v42, %v3902_v17  ;;  %v1764_v17 = vsel %vm417_vm3, %v451_v32, %v2677_v30  ;;  %v2842_v42 = vunpack.i.h.bf16 %v3944_v47  ;;  %v1766_v20 = vsel %vm417_vm3, %v3655_v45, %v2682_v38 }
 0x106   : > { %v1797_v43 = vsel %vm1795_vm5, %v1764_v17, %v2757_v37  ;;  %v1796_v21 = vsel %vm1795_vm5, %v1763_v36, %v2756_v4  ;;  %v1798_v34 = vsel %vm1795_vm5, %v1765_v63, %v2761_v6  ;;  %v1799_v47 = vsel %vm1795_vm5, %v1766_v20, %v2762_v15 }
 0x107   : > { %v2905_v28 = vpop.permute.xlu0 %2904  ;;  %3189 = vrot.lane.b32.xlu1 %v4030_v48, %s3342_s22  ;;  %v2892_v30 = vunpack.i.h.bf16 %v4024_v3  ;;  %v1829_v44 = vsel %vm1828_vm6, %v1796_v21, %v2836_v35  ;;  %v1830_v62 = vsel %vm1828_vm6, %v1797_v43, %v2837_v24  ;;  %v2897_v45 = vunpack.i.h.bf16 %v4026_v60 }
 0x108   : > { %v2896_v22 = vunpack.i.l.bf16 %v4026_v60  ;;  %v1831_v26 = vsel %vm1828_vm6, %v1798_v34, %v2841_v53  ;;  %v1832_v32 = vsel %vm1828_vm6, %v1799_v47, %v2842_v42  ;;  %v2902_v38 = vunpack.i.h.bf16 %v2900_v18 }
 0x109   : > { %3194 = vrot.lane.b32.xlu0 %v3973_v29, %s3337_s9  ;;  %v2910_v14 = vpop.permute.xlu1 %2909  ;;  %v2891_v29 = vunpack.i.l.bf16 %v4024_v3  ;;  %v2901_v16 = vunpack.i.l.bf16 %v2900_v18  ;;  %v2907_v3 = vunpack.i.h.bf16 %v2905_v28  ;;  %v2906_v37 = vunpack.i.l.bf16 %v2905_v28 }
 0x10a   : > { %v2912_v4 = vunpack.i.h.bf16 %v2910_v14  ;;  %v2911_v15 = vunpack.i.l.bf16 %v2910_v14  ;;  %v1863_v24 = vsel %vm1861_vm7, %v1830_v62, %v2892_v30  ;;  %v1864_v42 = vsel %vm1861_vm7, %v1831_v26, %v2896_v22 }
 0x10b   : > { %v2915_v13 = vpop.permute.xlu0 %2914  ;;  %3199 = vrot.lane.b32.xlu1 %v4043_v31, %s3337_s9  ;;  %v1862_v60 = vsel %vm1861_vm7, %v1829_v44, %v2891_v29  ;;  %v1865_v18 = vsel %vm1861_vm7, %v1832_v32, %v2897_v45  ;;  %v1896_v28 = vsel %vm1894_vm8, %v1863_v24, %v2902_v38  ;;  %v1897_v21 = vsel %vm1894_vm8, %v1864_v42, %v2906_v37  ;;  %v733_v42 = vld [vmem:[#allocation2 + $0x16a] sm:$0xff] }
 0x10c   : > { %v2917_v35 = vunpack.i.h.bf16 %v2915_v13  ;;  %v2916_v36 = vunpack.i.l.bf16 %v2915_v13  ;;  %v1898_v14 = vsel %vm1894_vm8, %v1865_v18, %v2907_v3  ;;  %v1929_v47 = vsel %vm1927_vm9, %v1896_v28, %v2912_v4  ;;  %v701_v4 = vld [vmem:[#allocation2 + $0x169] sm:$0xff]  ;;  %v734_v18 = vld [vmem:[#allocation2 + $0x172] sm:$0xff] }
 0x10d   : > { %3204 = vrot.lane.b32.xlu0 %v3975_v12, %s3338_s12  ;;  %v2920_v6 = vpop.permute.xlu1 %2919  ;;  %v1895_v12 = vsel %vm1894_vm8, %v1862_v60, %v2901_v16  ;;  %v2687_v28 = vunpack.i.h.bf16 %v3796_v7 }
 0x10e   : > { %v2922_v53 = vunpack.i.h.bf16 %v2920_v6  ;;  %v2921_v63 = vunpack.i.l.bf16 %v2920_v6  ;;  %v1928_v34 = vsel %vm1927_vm9, %v1895_v12, %v2911_v15  ;;  %v1930_v29 = vsel %vm1927_vm9, %v1897_v21, %v2916_v36  ;;  %v702_v15 = vld [vmem:[#allocation2 + $0x171] sm:$0xff]  ;;  %v608_v12 = vld [vmem:[#allocation2 + $0x181] sm:$0xff] }
 0x10f   : > { %v2925_v17 = vpop.permute.xlu0 %2924  ;;  %3209 = vrot.lane.b32.xlu1 %v4045_v54, %s3338_s12  ;;  %v1931_v13 = vsel %vm1927_vm9, %v1898_v14, %v2917_v35  ;;  %v640_v21 = vld [vmem:[#allocation2 + $0x182] sm:$0xff]  ;;  %v641_v14 = vld [vmem:[#allocation2 + $0x18a] sm:$0xff] }
 0x110   : > { %v2927_v20 = vunpack.i.h.bf16 %v2925_v17  ;;  %v2926_v43 = vunpack.i.l.bf16 %v2925_v17  ;;  %v1962_v32 = vsel %vm1960_vm10, %v1929_v47, %v2922_v53  ;;  %v576_v53 = vld [vmem:[#allocation2 + $0x180] sm:$0xff]  ;;  %v2691_v47 = vunpack.i.l.bf16 %v3804_v39 }
 0x111   : > { %3214 = vrot.lane.b32.xlu0 %v4030_v48, %s3339_s15  ;;  %v2930_v30 = vpop.permute.xlu1 %2929  ;;  %v1961_v48 = vsel %vm1960_vm10, %v1928_v34, %v2921_v63  ;;  %v577_v63 = vld [vmem:[#allocation2 + $0x188] sm:$0xff]  ;;  %v2692_v34 = vunpack.i.h.bf16 %v3804_v39 }
 0x112   : > { %v2932_v44 = vunpack.i.h.bf16 %v2930_v30  ;;  %v2931_v62 = vunpack.i.l.bf16 %v2930_v30  ;;  %v1963_v38 = vsel %vm1960_vm10, %v1930_v29, %v2926_v43  ;;  %v1964_v16 = vsel %vm1960_vm10, %v1931_v13, %v2927_v20  ;;  %v609_v43 = vld [vmem:[#allocation2 + $0x189] sm:$0xff] }
 0x113   : > { %v2935_v45 = vpop.permute.xlu0 %2934  ;;  %3219 = vrot.lane.b32.xlu1 %v4051_v5, %s3339_s15  ;;  %v2686_v20 = vunpack.i.l.bf16 %v3796_v7  ;;  %v2767_v30 = vunpack.i.h.bf16 %v3860_v8  ;;  %v2766_v29 = vunpack.i.l.bf16 %v3860_v8  ;;  %v2771_v7 = vunpack.i.l.bf16 %v3866_v11 }
 0x114   : > { %v2937_v22 = vunpack.i.h.bf16 %v2935_v45  ;;  %v2936_v26 = vunpack.i.l.bf16 %v2935_v45  ;;  %v1994_v3 = vsel %vm1993_vm11, %v1961_v48, %v2931_v62  ;;  %v1995_v37 = vsel %vm1993_vm11, %v1962_v32, %v2932_v44 }
 0x115   : > { %3224 = vrot.lane.b32.xlu0 %v4043_v31, %s3340_s20  ;;  %v4111_v24 = vpop.permute.xlu1 %2939  ;;  %v2026_v35 = vpack.c.bf16 %v1995_v37, %v1994_v3  ;;  %v4118_v31 = vpack.i.bf16 %v702_v15, %v701_v4  ;;  %v2772_v44 = vunpack.i.h.bf16 %v3866_v11  ;;  %v4133_v45 = vpack.i.bf16 %v577_v63, %v576_v53 }
 0x116   : > { %v1996_v6 = vsel %vm1993_vm11, %v1963_v38, %v2936_v26  ;;  %v1997_v60 = vsel %vm1993_vm11, %v1964_v16, %v2937_v22  ;;  %v2847_v22 = vunpack.i.h.bf16 %v3946_v25  ;;  %v2846_v26 = vunpack.i.l.bf16 %v3946_v25 }
 0x117   : > { %v2027_v36 = vpack.c.bf16 %v1997_v60, %v1996_v6  ;;  %v4113_v17 = vpop.permute.xlu0 %2944  ;;  %3229 = vrot.lane.b32.xlu1 %v4055_v2, %s3340_s20  ;;  %2616 = vmatprep.mubr.msk.bf16.mxu0 %vm2062_vm12, %v2026_v35  ;;  %v4139_v39 = vpack.i.bf16 %v609_v43, %v608_v12  ;;  %v4141_v8 = vpack.i.bf16 %v641_v14, %v640_v21  ;;  %v2852_v32 = vunpack.i.h.bf16 %v3952_v0 }
 0x118   : > { %v1767_v48 = vsel %vm417_vm3, %v3661_v49, %v2686_v20  ;;  %v1768_v11 = vsel %vm417_vm3, %v3663_v50, %v2687_v28  ;;  %v2851_v38 = vunpack.i.l.bf16 %v3952_v0  ;;  %v1770_v25 = vsel %vm417_vm3, %v3667_v52, %v2692_v34 }
 0x119   : > { %3234 = vrot.lane.b32.xlu0 %v4045_v54, %s3341_s21  ;;  %2617 = vmatmul.mubr.msk.bf16.vlgmr.msra.gmra.mxu0 %vm2062_vm12, %v2027_v36  ;;  %v2950_v13 = vpop.permute.xlu1 %2949  ;;  %v4131_v54 = vpack.i.bf16 %v734_v18, %v733_v42  ;;  %v1769_v16 = vsel %vm417_vm3, %v3665_v51, %v2691_v47  ;;  %v1801_v3 = vsel %vm1795_vm5, %v1768_v11, %v2767_v30  ;;  %v2942_v0 = vunpack.i.h.bf16 %v4111_v24 }
 0x11a   : > { %v1800_v49 = vsel %vm1795_vm5, %v1767_v48, %v2766_v29  ;;  %v1803_v50 = vsel %vm1795_vm5, %v1770_v25, %v2772_v44  ;;  %v1802_v4 = vsel %vm1795_vm5, %v1769_v16, %v2771_v7  ;;  %v2941_v15 = vunpack.i.l.bf16 %v4111_v24 }
 0x11b   : > { %v2955_v62 = vpop.permute.xlu0 %2954  ;;  %3239 = vrot.lane.b32.xlu1 %v4118_v31, %s3341_s21  ;;  %v1833_v6 = vsel %vm1828_vm6, %v1800_v49, %v2846_v26  ;;  %v1834_v52 = vsel %vm1828_vm6, %v1801_v3, %v2847_v22  ;;  %v2947_v51 = vunpack.i.h.bf16 %v4113_v17  ;;  %v2946_v60 = vunpack.i.l.bf16 %v4113_v17 }
 0x11c   : > { %v1835_v35 = vsel %vm1828_vm6, %v1802_v4, %v2851_v38  ;;  %v1836_v36 = vsel %vm1828_vm6, %v1803_v50, %v2852_v32  ;;  %v2952_v42 = vunpack.i.h.bf16 %v2950_v13  ;;  %v2951_v18 = vunpack.i.l.bf16 %v2950_v13 }
 0x11d   : > { %3244 = vrot.lane.b32.xlu0 %v4051_v5, %s3342_s22  ;;  %v2960_v37 = vpop.permute.xlu1 %2959  ;;  %v2957_v24 = vunpack.i.h.bf16 %v2955_v62  ;;  %v2956_v53 = vunpack.i.l.bf16 %v2955_v62  ;;  %v1866_v20 = vsel %vm1861_vm7, %v1833_v6, %v2941_v15  ;;  %v1867_v17 = vsel %vm1861_vm7, %v1834_v52, %v2942_v0  ;;  %v673_v6 = vld [vmem:[#allocation2 + $0x198] sm:$0xff]  ;;  %v674_v52 = vld [vmem:[#allocation2 + $0x1a0] sm:$0xff] }
 0x11e   : > { %v2962_v63 = vunpack.i.h.bf16 %v2960_v37  ;;  %v2961_v12 = vunpack.i.l.bf16 %v2960_v37  ;;  %v1869_v34 = vsel %vm1861_vm7, %v1836_v36, %v2947_v51  ;;  %v1868_v47 = vsel %vm1861_vm7, %v1835_v35, %v2946_v60 }
 0x11f   : > { %v2965_v5 = vpop.permute.xlu0 %2964  ;;  %3249 = vrot.lane.b32.xlu1 %v4131_v54, %s3342_s22  ;;  %v1900_v13 = vsel %vm1894_vm8, %v1867_v17, %v2952_v42  ;;  %v1901_v62 = vsel %vm1894_vm8, %v1868_v47, %v2956_v53  ;;  %v1902_v22 = vsel %vm1894_vm8, %v1869_v34, %v2957_v24  ;;  %v2697_v24 = vunpack.i.h.bf16 %v3806_v59  ;;  %v738_v34 = vld [vmem:[#allocation2 + $0x1a2] sm:$0xff] }
 0x120   : > { %v2967_v43 = vunpack.i.h.bf16 %v2965_v5  ;;  %v2966_v21 = vunpack.i.l.bf16 %v2965_v5  ;;  %v1933_v48 = vsel %vm1927_vm9, %v1900_v13, %v2962_v63  ;;  %v3288_v53 = vpack.i.bf16 %v674_v52, %v673_v6  ;;  %v705_v63 = vld [vmem:[#allocation2 + $0x199] sm:$0xff] }
 0x121   : > { %3254 = vrot.lane.b32.xlu0 %v4055_v2, %s3337_s9  ;;  %v2970_v28 = vpop.permute.xlu1 %2969  ;;  %v1899_v2 = vsel %vm1894_vm8, %v1866_v20, %v2951_v18  ;;  %v2701_v20 = vunpack.i.l.bf16 %v3812_v1  ;;  %v2777_v17 = vunpack.i.h.bf16 %v3868_v9  ;;  %v2781_v47 = vunpack.i.l.bf16 %v3874_v19 }
 0x122   : > { %v2972_v30 = vunpack.i.h.bf16 %v2970_v28  ;;  %v2971_v29 = vunpack.i.l.bf16 %v2970_v28  ;;  %v1932_v26 = vsel %vm1927_vm9, %v1899_v2, %v2961_v12  ;;  %v1934_v32 = vsel %vm1927_vm9, %v1901_v62, %v2966_v21  ;;  %v706_v12 = vld [vmem:[#allocation2 + $0x1a1] sm:$0xff] }
 0x123   : > { %v2975_v14 = vpop.permute.xlu0 %2974  ;;  %3259 = vrot.lane.b32.xlu1 %v4133_v45, %s3337_s9  ;;  %v1935_v38 = vsel %vm1927_vm9, %v1902_v22, %v2967_v43  ;;  %v2702_v28 = vunpack.i.h.bf16 %v3812_v1  ;;  %v2776_v43 = vunpack.i.l.bf16 %v3868_v9  ;;  %v2856_v2 = vunpack.i.l.bf16 %v3954_v10 }
 0x124   : > { %v2977_v44 = vunpack.i.h.bf16 %v2975_v14  ;;  %v2976_v7 = vunpack.i.l.bf16 %v2975_v14  ;;  %v1965_v49 = vsel %vm1960_vm10, %v1932_v26, %v2971_v29  ;;  %v737_v14 = vld [vmem:[#allocation2 + $0x19a] sm:$0xff]  ;;  %v2857_v29 = vunpack.i.h.bf16 %v3954_v10 }
 0x125   : > { %3264 = vrot.lane.b32.xlu0 %v4118_v31, %s3338_s12  ;;  %v2980_v11 = vpop.permute.xlu1 %2979  ;;  %v1966_v31 = vsel %vm1960_vm10, %v1933_v48, %v2972_v30  ;;  %v1772_v30 = vsel %vm417_vm3, %v3681_v56, %v2697_v24  ;;  %v3298_v1 = vpack.i.bf16 %v706_v12, %v705_v63  ;;  %v2862_v13 = vunpack.i.h.bf16 %v3958_v41 }
 0x126   : > { %v2982_v25 = vunpack.i.h.bf16 %v2980_v11  ;;  %v2981_v16 = vunpack.i.l.bf16 %v2980_v11  ;;  %v1967_v4 = vsel %vm1960_vm10, %v1934_v32, %v2976_v7  ;;  %v1968_v0 = vsel %vm1960_vm10, %v1935_v38, %v2977_v44 }
 0x127   : > { %v2985_v3 = vpop.permute.xlu0 %2984  ;;  %3269 = vrot.lane.b32.xlu1 %v4139_v39, %s3338_s12  ;;  %v2861_v44 = vunpack.i.l.bf16 %v3958_v41  ;;  %v1774_v56 = vsel %vm417_vm3, %v3685_v61, %v2702_v28  ;;  %v1773_v10 = vsel %vm417_vm3, %v3683_v57, %v2701_v20  ;;  %v1805_v62 = vsel %vm1795_vm5, %v1772_v30, %v2777_v17 }
 0x128   : > { %v2987_v37 = vunpack.i.h.bf16 %v2985_v3  ;;  %v2986_v50 = vunpack.i.l.bf16 %v2985_v3  ;;  %v1998_v15 = vsel %vm1993_vm11, %v1965_v49, %v2981_v16  ;;  %v1999_v5 = vsel %vm1993_vm11, %v1966_v31, %v2982_v25 }
 0x129   : > { %3274 = vrot.lane.b32.xlu0 %v4131_v54, %s3339_s15  ;;  %v2028_v51 = vpack.c.bf16 %v1999_v5, %v1998_v15  ;;  %v2990_v36 = vpop.permute.xlu1 %2989  ;;  %v2696_v54 = vunpack.i.l.bf16 %v3806_v59  ;;  %v2782_v59 = vunpack.i.h.bf16 %v3874_v19  ;;  %v3308_v19 = vpack.i.bf16 %v738_v34, %v737_v14 }
 0x12a   : > { %v2000_v60 = vsel %vm1993_vm11, %v1967_v4, %v2986_v50  ;;  %v2001_v35 = vsel %vm1993_vm11, %v1968_v0, %v2987_v37  ;;  %v1806_v26 = vsel %vm1795_vm5, %v1773_v10, %v2781_v47  ;;  %v2992_v41 = vunpack.i.h.bf16 %v2990_v36 }
 0x12b   : > { %v2029_v42 = vpack.c.bf16 %v2001_v35, %v2000_v60  ;;  %v4199_v18 = vpop.permute.xlu0 %2994  ;;  %3279 = vrot.lane.b32.xlu1 %v4141_v8, %s3339_s15  ;;  %2620 = vmatprep.mubr.msk.bf16.mxu0 %vm2062_vm12, %v2028_v51  ;;  %v1771_v9 = vsel %vm417_vm3, %v3679_v55, %v2696_v54  ;;  %v1807_v55 = vsel %vm1795_vm5, %v1774_v56, %v2782_v59  ;;  %v2991_v48 = vunpack.i.l.bf16 %v2990_v36 }
 0x12c   : > { %v1804_v7 = vsel %vm1795_vm5, %v1771_v9, %v2776_v43  ;;  %v1838_v32 = vsel %vm1828_vm6, %v1805_v62, %v2857_v29  ;;  %v2997_v61 = vunpack.i.h.bf16 %v4199_v18  ;;  %v2996_v57 = vunpack.i.l.bf16 %v4199_v18 }
 0x12d   : > { %3284 = vrot.lane.b32.xlu0 %v4133_v45, %s3340_s20  ;;  %2621 = vmatmul.mubr.msk.bf16.gmra.mxu0 %vm2062_vm12, %v2029_v42  ;;  %v3000_v21 = vpop.permute.xlu1 %2999  ;;  %v1839_v38 = vsel %vm1828_vm6, %v1806_v26, %v2861_v44  ;;  %v1840_v25 = vsel %vm1828_vm6, %v1807_v55, %v2862_v13  ;;  %v1871_v15 = vsel %vm1861_vm7, %v1838_v32, %v2992_v41  ;;  %v4626_v55 = vld [vmem:[#allocation4_spill] sm:$0xff] }
 0x12e   : > { %v3002_v16 = vunpack.i.h.bf16 %v3000_v21  ;;  %v3001_v3 = vunpack.i.l.bf16 %v3000_v21  ;;  %v1873_v51 = vsel %vm1861_vm7, %v1840_v25, %v2997_v61  ;;  %v1872_v60 = vsel %vm1861_vm7, %v1839_v38, %v2996_v57  ;;  %v4628_v61 = vld [vmem:[#allocation9_spill] sm:$0xff] }
 0x12f   : > { %v3005_v45 = vpop.permute.xlu0 %3004  ;;  %3289 = vrot.lane.b32.xlu1 %v3288_v53, %s3340_s20  ;;  %v2712_v26 = vunpack.i.h.bf16 %v4626_v55  ;;  %v2711_v41 = vunpack.i.l.bf16 %v4626_v55  ;;  %v2792_v57 = vunpack.i.h.bf16 %v4628_v61  ;;  %v2791_v38 = vunpack.i.l.bf16 %v4628_v61 }
 0x130   : > { %v3007_v49 = vunpack.i.h.bf16 %v3005_v45  ;;  %v3006_v31 = vunpack.i.l.bf16 %v3005_v45  ;;  %v1904_v42 = vsel %vm1894_vm8, %v1871_v15, %v3002_v16  ;;  %v4629_v16 = vld [vmem:[#allocation17_spill] sm:$0xff] }
 0x131   : > { %3294 = vrot.lane.b32.xlu0 %v4139_v39, %s3341_s21  ;;  %v3010_v22 = vpop.permute.xlu1 %3009  ;;  %v1837_v39 = vsel %vm1828_vm6, %v1804_v7, %v2856_v2  ;;  %v4625_v7 = vld [vmem:[#allocation3_spill] sm:$0xff] }
 0x132   : > { %v3012_v37 = vunpack.i.h.bf16 %v3010_v22  ;;  %v3011_v50 = vunpack.i.l.bf16 %v3010_v22  ;;  %v1870_v0 = vsel %vm1861_vm7, %v1837_v39, %v2991_v48  ;;  %v1905_v53 = vsel %vm1894_vm8, %v1872_v60, %v3006_v31  ;;  %v4627_v48 = vld [vmem:[#allocation8_spill] sm:$0xff] }
 0x133   : > { %v3015_v11 = vpop.permute.xlu0 %3014  ;;  %3299 = vrot.lane.b32.xlu1 %v3298_v1, %s3341_s21  ;;  %v1906_v54 = vsel %vm1894_vm8, %v1873_v51, %v3007_v49  ;;  %v2707_v62 = vunpack.i.h.bf16 %v4625_v7  ;;  %v2706_v22 = vunpack.i.l.bf16 %v4625_v7  ;;  %v2786_v39 = vunpack.i.l.bf16 %v4627_v48  ;;  %v3316_v31 = vld [vmem:[#allocation2 + $0x98] sm:$0xff]  ;;  %v3319_v51 = vld [vmem:[#allocation2 + $0xa8] sm:$0xff] }
 0x134   : > { %v3017_v5 = vunpack.i.h.bf16 %v3015_v11  ;;  %v3016_v6 = vunpack.i.l.bf16 %v3015_v11  ;;  %v1937_v12 = vsel %vm1927_vm9, %v1904_v42, %v3012_v37  ;;  %v2787_v11 = vunpack.i.h.bf16 %v4627_v48 }
 0x135   : > { %3304 = vrot.lane.b32.xlu0 %v4141_v8, %s3342_s22  ;;  %v3020_v4 = vpop.permute.xlu1 %3019  ;;  %v1903_v8 = vsel %vm1894_vm8, %v1870_v0, %v3001_v3  ;;  %v2867_v3 = vunpack.i.h.bf16 %v4629_v16  ;;  %v2866_v49 = vunpack.i.l.bf16 %v4629_v16  ;;  %v1776_v37 = vsel %vm417_vm3, %v3316_v31, %v2707_v62  ;;  %v4630_v0 = vld [vmem:[#allocation18_spill] sm:$0xff] }
 0x136   : > { %v3022_v35 = vunpack.i.h.bf16 %v3020_v4  ;;  %v3021_v36 = vunpack.i.l.bf16 %v3020_v4  ;;  %v1936_v63 = vsel %vm1927_vm9, %v1903_v8, %v3011_v50  ;;  %v1938_v20 = vsel %vm1927_vm9, %v1905_v53, %v3016_v6  ;;  %v3317_v50 = vld [vmem:[#allocation2 + $0x90] sm:$0xff] }
 0x137   : > { %v3025_v52 = vpop.permute.xlu0 %3024  ;;  %3309 = vrot.lane.b32.xlu1 %v3308_v19, %s3342_s22  ;;  %v1939_v17 = vsel %vm1927_vm9, %v1906_v54, %v3017_v5  ;;  %v1775_v4 = vsel %vm417_vm3, %v3317_v50, %v2706_v22  ;;  %v2872_v15 = vunpack.i.h.bf16 %v4630_v0  ;;  %v2871_v5 = vunpack.i.l.bf16 %v4630_v0  ;;  %v3318_v6 = vld [vmem:[#allocation2 + $0xb0] sm:$0xff] }
 0x138   : > { %v3027_v18 = vunpack.i.h.bf16 %v3025_v52  ;;  %v3026_v24 = vunpack.i.l.bf16 %v3025_v52  ;;  %v1969_v34 = vsel %vm1960_vm10, %v1936_v63, %v3021_v36  ;;  %v1970_v59 = vsel %vm1960_vm10, %v1937_v12, %v3022_v35 }
 0x139   : > { %v3030_v28 = vpop.permute.xlu1 %3029  ;;  %v1778_v52 = vsel %vm417_vm3, %v3318_v6, %v2712_v26  ;;  %v1777_v60 = vsel %vm417_vm3, %v3319_v51, %v2711_v41  ;;  %v1808_v35 = vsel %vm1795_vm5, %v1775_v4, %v2786_v39  ;;  %v1809_v36 = vsel %vm1795_vm5, %v1776_v37, %v2787_v11 }
 0x13a   : > { %v3032_v43 = vunpack.i.h.bf16 %v3030_v28  ;;  %v3031_v21 = vunpack.i.l.bf16 %v3030_v28  ;;  %v1971_v30 = vsel %vm1960_vm10, %v1938_v20, %v3026_v24  ;;  %v1972_v29 = vsel %vm1960_vm10, %v1939_v17, %v3027_v18 }
 0x13b   : > { %v3035_v14 = vpop.permute.xlu0 %3034  ;;  %v1811_v42 = vsel %vm1795_vm5, %v1778_v52, %v2792_v57  ;;  %v1810_v18 = vsel %vm1795_vm5, %v1777_v60, %v2791_v38  ;;  %v1841_v63 = vsel %vm1828_vm6, %v1808_v35, %v2866_v49  ;;  %v1842_v12 = vsel %vm1828_vm6, %v1809_v36, %v2867_v3 }
 0x13c   : > { %v3037_v47 = vunpack.i.h.bf16 %v3035_v14  ;;  %v3036_v45 = vunpack.i.l.bf16 %v3035_v14  ;;  %v2002_v2 = vsel %vm1993_vm11, %v1969_v34, %v3031_v21  ;;  %v2003_v1 = vsel %vm1993_vm11, %v1970_v59, %v3032_v43 }
 0x13d   : > { %v2030_v9 = vpack.c.bf16 %v2003_v1, %v2002_v2  ;;  %v3040_v19 = vpop.permute.xlu1 %3039  ;;  %v1843_v17 = vsel %vm1828_vm6, %v1810_v18, %v2871_v5  ;;  %v1844_v43 = vsel %vm1828_vm6, %v1811_v42, %v2872_v15 }
 0x13e   : > { %v2004_v13 = vsel %vm1993_vm11, %v1971_v30, %v3036_v45  ;;  %v2005_v44 = vsel %vm1993_vm11, %v1972_v29, %v3037_v47  ;;  %v3042_v24 = vunpack.i.h.bf16 %v3040_v19  ;;  %v3041_v53 = vunpack.i.l.bf16 %v3040_v19 }
 0x13f   : > { %v2031_v56 = vpack.c.bf16 %v2005_v44, %v2004_v13  ;;  %v3045_v10 = vpop.permute.xlu0 %3044  ;;  %2624 = vmatprep.mubr.msk.bf16.mxu0 %vm2062_vm12, %v2030_v9 }
 0x140   : > { %v3047_v28 = vunpack.i.h.bf16 %v3045_v10  ;;  %v3046_v20 = vunpack.i.l.bf16 %v3045_v10  ;;  %v1874_v29 = vsel %vm1861_vm7, %v1841_v63, %v3041_v53  ;;  %v1875_v2 = vsel %vm1861_vm7, %v1842_v12, %v3042_v24 }
 0x141   : > { %2625 = vmatmul.mubr.msk.bf16.gmra.mxu0 %vm2062_vm12, %v2031_v56  ;;  %v3050_v32 = vpop.permute.xlu1 %3049 }
 0x142   : > { %v3052_v21 = vunpack.i.h.bf16 %v3050_v32  ;;  %v3051_v14 = vunpack.i.l.bf16 %v3050_v32  ;;  %v1877_v44 = vsel %vm1861_vm7, %v1844_v43, %v3047_v28  ;;  %v1876_v19 = vsel %vm1861_vm7, %v1843_v17, %v3046_v20 }
 0x143   : > { %v3055_v25 = vpop.permute.xlu0 %3054 }
 0x144   : > { %v3057_v34 = vunpack.i.h.bf16 %v3055_v25  ;;  %v3056_v59 = vunpack.i.l.bf16 %v3055_v25  ;;  %v1907_v7 = vsel %vm1894_vm8, %v1874_v29, %v3051_v14  ;;  %v1908_v62 = vsel %vm1894_vm8, %v1875_v2, %v3052_v21 }
 0x145   : > { %v3060_v8 = vpop.permute.xlu1 %3059 }
 0x146   : > { %v3062_v47 = vunpack.i.h.bf16 %v3060_v8  ;;  %v3061_v45 = vunpack.i.l.bf16 %v3060_v8  ;;  %v1909_v26 = vsel %vm1894_vm8, %v1876_v19, %v3056_v59  ;;  %v1910_v41 = vsel %vm1894_vm8, %v1877_v44, %v3057_v34 }
 0x147   : > { %v3065_v54 = vpop.permute.xlu0 %3064 }
 0x148   : > { %v3067_v1 = vunpack.i.h.bf16 %v3065_v54  ;;  %v3066_v9 = vunpack.i.l.bf16 %v3065_v54  ;;  %v1940_v48 = vsel %vm1927_vm9, %v1907_v7, %v3061_v45  ;;  %v1941_v11 = vsel %vm1927_vm9, %v1908_v62, %v3062_v47 }
 0x149   : > { %v3070_v30 = vpop.permute.xlu1 %3069 }
 0x14a   : > { %v3072_v56 = vunpack.i.h.bf16 %v3070_v30  ;;  %v3071_v10 = vunpack.i.l.bf16 %v3070_v30  ;;  %v1942_v32 = vsel %vm1927_vm9, %v1909_v26, %v3066_v9  ;;  %v1943_v61 = vsel %vm1927_vm9, %v1910_v41, %v3067_v1 }
 0x14b   : > { %v3075_v13 = vpop.permute.xlu0 %3074 }
 0x14c   : > { %v3077_v22 = vunpack.i.h.bf16 %v3075_v13  ;;  %v3076_v55 = vunpack.i.l.bf16 %v3075_v13  ;;  %v1973_v16 = vsel %vm1960_vm10, %v1940_v48, %v3071_v10  ;;  %v1974_v3 = vsel %vm1960_vm10, %v1941_v11, %v3072_v56 }
 0x14d   : > { %v3080_v39 = vpop.permute.xlu1 %3079 }
 0x14e   : > { %v3082_v57 = vunpack.i.h.bf16 %v3080_v39  ;;  %v3081_v38 = vunpack.i.l.bf16 %v3080_v39  ;;  %v1975_v37 = vsel %vm1960_vm10, %v1942_v32, %v3076_v55  ;;  %v1976_v50 = vsel %vm1960_vm10, %v1943_v61, %v3077_v22 }
 0x14f   : > { %v3085_v25 = vpop.permute.xlu0 %3084 }
 0x150   : > { %v3087_v49 = vunpack.i.h.bf16 %v3085_v25  ;;  %v3086_v31 = vunpack.i.l.bf16 %v3085_v25  ;;  %v2006_v4 = vsel %vm1993_vm11, %v1973_v16, %v3081_v38  ;;  %v2007_v0 = vsel %vm1993_vm11, %v1974_v3, %v3082_v57 }
 0x151   : > { %v2032_v15 = vpack.c.bf16 %v2007_v0, %v2006_v4  ;;  %v3090_v52 = vpop.permute.xlu1 %3089  ;;  %v4631_v4 = vld [vmem:[#allocation5_spill] sm:$0xff] }
 0x152   : > { %v2008_v5 = vsel %vm1993_vm11, %v1975_v37, %v3086_v31  ;;  %v2009_v6 = vsel %vm1993_vm11, %v1976_v50, %v3087_v49  ;;  %v3092_v42 = vunpack.i.h.bf16 %v3090_v52  ;;  %v3091_v18 = vunpack.i.l.bf16 %v3090_v52 }
 0x153   : > { %v2033_v51 = vpack.c.bf16 %v2009_v6, %v2008_v5  ;;  %v3095_v60 = vpop.permute.xlu0 %3094  ;;  %2628 = vmatprep.mubr.msk.bf16.mxu0 %vm2062_vm12, %v2032_v15  ;;  %v2732_v0 = vunpack.i.h.bf16 %v4631_v4  ;;  %v2731_v15 = vunpack.i.l.bf16 %v4631_v4  ;;  %v4632_v5 = vld [vmem:[#allocation10_spill] sm:$0xff] }
 0x154   : > { %v3097_v53 = vunpack.i.h.bf16 %v3095_v60  ;;  %v3096_v54 = vunpack.i.l.bf16 %v3095_v60  ;;  %v1878_v14 = vsel %vm1861_vm7, %v3996_v46, %v3091_v18  ;;  %v1879_v34 = vsel %vm1861_vm7, %v3999_v58, %v3092_v42  ;;  %v3320_v18 = vld [vmem:[#allocation2 + $0x110] sm:$0xff] }
 0x155   : > { %2629 = vmatmul.mubr.msk.bf16.gmra.mxu0 %vm2062_vm12, %v2033_v51  ;;  %v3100_v35 = vpop.permute.xlu1 %3099  ;;  %v2812_v6 = vunpack.i.h.bf16 %v4632_v5  ;;  %v2811_v51 = vunpack.i.l.bf16 %v4632_v5 }
 0x156   : > { %v3102_v63 = vunpack.i.h.bf16 %v3100_v35  ;;  %v3101_v12 = vunpack.i.l.bf16 %v3100_v35  ;;  %v1881_v30 = vsel %vm1861_vm7, %v4015_v23, %v3097_v53  ;;  %v1880_v29 = vsel %vm1861_vm7, %v4012_v27, %v3096_v54  ;;  %v3321_v53 = vld [vmem:[#allocation2 + $0x108] sm:$0xff] }
 0x157   : > { %v3105_v36 = vpop.permute.xlu0 %3104  ;;  %v1785_v54 = vsel %vm417_vm3, %v3321_v53, %v2731_v15 }
 0x158   : > { %v3107_v28 = vunpack.i.h.bf16 %v3105_v36  ;;  %v3106_v20 = vunpack.i.l.bf16 %v3105_v36  ;;  %v1911_v9 = vsel %vm1894_vm8, %v1878_v14, %v3101_v12  ;;  %v1912_v13 = vsel %vm1894_vm8, %v1879_v34, %v3102_v63 }
 0x159   : > { %v3110_v8 = vpop.permute.xlu1 %3109 }
 0x15a   : > { %v3112_v17 = vunpack.i.h.bf16 %v3110_v8  ;;  %v3111_v43 = vunpack.i.l.bf16 %v3110_v8  ;;  %v1913_v19 = vsel %vm1894_vm8, %v1880_v29, %v3106_v20  ;;  %v1914_v58 = vsel %vm1894_vm8, %v1881_v30, %v3107_v28 }
 0x15b   : > { %v3115_v24 = vpop.permute.xlu0 %3114 }
 0x15c   : > { %v3117_v59 = vunpack.i.h.bf16 %v3115_v24  ;;  %v3116_v47 = vunpack.i.l.bf16 %v3115_v24  ;;  %v1944_v56 = vsel %vm1927_vm9, %v1911_v9, %v3111_v43  ;;  %v1945_v10 = vsel %vm1927_vm9, %v1912_v13, %v3112_v17 }
 0x15d   : > { %v3120_v21 = vpop.permute.xlu1 %3119  ;;  %v1786_v24 = vsel %vm417_vm3, %v3320_v18, %v2732_v0  ;;  %v1818_v17 = vsel %vm1795_vm5, %v1785_v54, %v2811_v51  ;;  %v4635_v18 = vld [vmem:[#allocation11_spill] sm:$0xff]  ;;  %v4636_v54 = vld [vmem:[#allocation12_spill] sm:$0xff] }
 0x15e   : > { %v3122_v2 = vunpack.i.h.bf16 %v3120_v21  ;;  %v3121_v1 = vunpack.i.l.bf16 %v3120_v21  ;;  %v1946_v7 = vsel %vm1927_vm9, %v1913_v19, %v3116_v47  ;;  %v1947_v27 = vsel %vm1927_vm9, %v1914_v58, %v3117_v59 }
 0x15f   : > { %v3125_v45 = vpop.permute.xlu0 %3124  ;;  %v1819_v63 = vsel %vm1795_vm5, %v1786_v24, %v2812_v6  ;;  %v2817_v24 = vunpack.i.h.bf16 %v4635_v18  ;;  %v2816_v53 = vunpack.i.l.bf16 %v4635_v18 }
 0x160   : > { %v3127_v44 = vunpack.i.h.bf16 %v3125_v45  ;;  %v3126_v46 = vunpack.i.l.bf16 %v3125_v45  ;;  %v1977_v48 = vsel %vm1960_vm10, %v1944_v56, %v3121_v1  ;;  %v1978_v11 = vsel %vm1960_vm10, %v1945_v10, %v3122_v2 }
 0x161   : > { %v3130_v23 = vpop.permute.xlu1 %3129 }
 0x162   : > { %v3132_v62 = vunpack.i.h.bf16 %v3130_v23  ;;  %v3131_v22 = vunpack.i.l.bf16 %v3130_v23  ;;  %v1979_v39 = vsel %vm1960_vm10, %v1946_v7, %v3126_v46  ;;  %v1980_v32 = vsel %vm1960_vm10, %v1947_v27, %v3127_v44 }
 0x163   : > { %v3135_v55 = vpop.permute.xlu0 %3134 }
 0x164   : > { %v3137_v26 = vunpack.i.h.bf16 %v3135_v55  ;;  %v3136_v41 = vunpack.i.l.bf16 %v3135_v55  ;;  %v2010_v61 = vsel %vm1993_vm11, %v1977_v48, %v3131_v22  ;;  %v2011_v57 = vsel %vm1993_vm11, %v1978_v11, %v3132_v62 }
 0x165   : > { %v3140_v16 = vpop.permute.xlu1 %3139  ;;  %v2034_v3 = vpack.c.bf16 %v2011_v57, %v2010_v61 }
 0x166   : > { %v2012_v38 = vsel %vm1993_vm11, %v1979_v39, %v3136_v41  ;;  %v2013_v25 = vsel %vm1993_vm11, %v1980_v32, %v3137_v26  ;;  %v3142_v35 = vunpack.i.h.bf16 %v3140_v16  ;;  %v3141_v36 = vunpack.i.l.bf16 %v3140_v16 }
 0x167   : > { %v2035_v49 = vpack.c.bf16 %v2013_v25, %v2012_v38  ;;  %v3145_v31 = vpop.permute.xlu0 %3144  ;;  %2632 = vmatprep.mubr.msk.bf16.mxu1 %vm2062_vm12, %v2034_v3 }
 0x168   : > { %v3147_v8 = vunpack.i.h.bf16 %v3145_v31  ;;  %v3146_v42 = vunpack.i.l.bf16 %v3145_v31  ;;  %v1851_v59 = vsel %vm1828_vm6, %v1818_v17, %v3141_v36  ;;  %v1852_v47 = vsel %vm1828_vm6, %v1819_v63, %v3142_v35  ;;  %v4634_v35 = vld [vmem:[#allocation7_spill] sm:$0xff]  ;;  %v3322_v17 = vld [vmem:[#allocation2 + $0x128] sm:$0xff] }
 0x169   : > { %2633 = vmatmul.mubr.msk.bf16.vlgmr.msra.gmra.mxu1 %vm2062_vm12, %v2035_v49  ;;  %v3150_v37 = vpop.permute.xlu1 %3149  ;;  %v2742_v36 = vunpack.i.h.bf16 %v4634_v35  ;;  %v2822_v63 = vunpack.i.h.bf16 %v4636_v54 }
 0x16a   : > { %v3151_v43 = vunpack.i.l.bf16 %v3150_v37  ;;  %v1882_v45 = vsel %vm1861_vm7, %v4019_v40, %v3146_v42  ;;  %v1883_v30 = vsel %vm1861_vm7, %v4022_v33, %v3147_v8  ;;  %v3152_v29 = vunpack.i.h.bf16 %v3150_v37 }
 0x16b   : > { %v3155_v50 = vpop.permute.xlu0 %3154  ;;  %v2741_v42 = vunpack.i.l.bf16 %v4634_v35 }
 0x16c   : > { %v3157_v12 = vunpack.i.h.bf16 %v3155_v50  ;;  %v3156_v28 = vunpack.i.l.bf16 %v3155_v50  ;;  %v1884_v56 = vsel %vm1861_vm7, %v1851_v59, %v3151_v43  ;;  %v1885_v55 = vsel %vm1861_vm7, %v1852_v47, %v3152_v29 }
 0x16d   : > { %v3160_v52 = vpop.permute.xlu1 %3159 }
 0x16e   : > { %v3161_v2 = vunpack.i.l.bf16 %v3160_v52  ;;  %v1915_v13 = vsel %vm1894_vm8, %v1882_v45, %v3156_v28  ;;  %v1916_v44 = vsel %vm1894_vm8, %v1883_v30, %v3157_v12  ;;  %v3162_v46 = vunpack.i.h.bf16 %v3160_v52  ;;  %v4633_v52 = vld [vmem:[#allocation6_spill] sm:$0xff] }
 0x16f   : > { %v3165_v60 = vpop.permute.xlu0 %3164  ;;  %v2737_v51 = vunpack.i.h.bf16 %v4633_v52  ;;  %v2821_v12 = vunpack.i.l.bf16 %v4636_v54 }
 0x170   : > { %v3167_v21 = vunpack.i.h.bf16 %v3165_v60  ;;  %v3166_v14 = vunpack.i.l.bf16 %v3165_v60  ;;  %v1917_v26 = vsel %vm1894_vm8, %v1884_v56, %v3161_v2  ;;  %v1918_v11 = vsel %vm1894_vm8, %v1885_v55, %v3162_v46 }
 0x171   : > { %v3170_v20 = vpop.permute.xlu1 %3169  ;;  %v2736_v60 = vunpack.i.l.bf16 %v4633_v52  ;;  %v1788_v43 = vsel %vm417_vm3, %v3322_v17, %v2737_v51 }
 0x172   : > { %v3171_v19 = vunpack.i.l.bf16 %v3170_v20  ;;  %v1948_v10 = vsel %vm1927_vm9, %v1915_v13, %v3166_v14  ;;  %v1949_v40 = vsel %vm1927_vm9, %v1916_v44, %v3167_v21  ;;  %v3172_v23 = vunpack.i.h.bf16 %v3170_v20  ;;  %v3323_v21 = vld [vmem:[#allocation2 + $0x120] sm:$0xff] }
 0x173   : > { %v3175_v34 = vpop.permute.xlu0 %3174  ;;  %v1787_v14 = vsel %vm417_vm3, %v3323_v21, %v2736_v60  ;;  %v1821_v46 = vsel %vm1795_vm5, %v1788_v43, %v2817_v24 }
 0x174   : > { %v3177_v1 = vunpack.i.h.bf16 %v3175_v34  ;;  %v3176_v9 = vunpack.i.l.bf16 %v3175_v34  ;;  %v1950_v39 = vsel %vm1927_vm9, %v1917_v26, %v3171_v19  ;;  %v1951_v38 = vsel %vm1927_vm9, %v1918_v11, %v3172_v23  ;;  %v3324_v34 = vld [vmem:[#allocation2 + $0x140] sm:$0xff] }
 0x175   : > { %v3180_v58 = vpop.permute.xlu1 %3179  ;;  %v1790_v59 = vsel %vm417_vm3, %v3324_v34, %v2742_v36  ;;  %v1820_v44 = vsel %vm1795_vm5, %v1787_v14, %v2816_v53 }
 0x176   : > { %v3182_v33 = vunpack.i.h.bf16 %v3180_v58  ;;  %v3181_v27 = vunpack.i.l.bf16 %v3180_v58  ;;  %v1981_v41 = vsel %vm1960_vm10, %v1948_v10, %v3176_v9  ;;  %v1982_v48 = vsel %vm1960_vm10, %v1949_v40, %v3177_v1  ;;  %v3325_v9 = vld [vmem:[#allocation2 + $0x138] sm:$0xff] }
 0x177   : > { %v3185_v7 = vpop.permute.xlu0 %3184  ;;  %v1789_v13 = vsel %vm417_vm3, %v3325_v9, %v2741_v42  ;;  %v1823_v19 = vsel %vm1795_vm5, %v1790_v59, %v2822_v63 }
 0x178   : > { %v3187_v62 = vunpack.i.h.bf16 %v3185_v7  ;;  %v3186_v22 = vunpack.i.l.bf16 %v3185_v7  ;;  %v1983_v31 = vsel %vm1960_vm10, %v1950_v39, %v3181_v27  ;;  %v1984_v37 = vsel %vm1960_vm10, %v1951_v38, %v3182_v33 }
 0x179   : > { %v3190_v57 = vpop.permute.xlu1 %3189  ;;  %v1822_v58 = vsel %vm1795_vm5, %v1789_v13, %v2821_v12 }
 0x17a   : > { %v2014_v32 = vsel %vm1993_vm11, %v1981_v41, %v3186_v22  ;;  %v2015_v61 = vsel %vm1993_vm11, %v1982_v48, %v3187_v62  ;;  %v3192_v16 = vunpack.i.h.bf16 %v3190_v57  ;;  %v3191_v3 = vunpack.i.l.bf16 %v3190_v57 }
 0x17b   : > { %v2036_v25 = vpack.c.bf16 %v2015_v61, %v2014_v32  ;;  %v3195_v49 = vpop.permute.xlu0 %3194 }
 0x17c   : > { %v2016_v50 = vsel %vm1993_vm11, %v1983_v31, %v3191_v3  ;;  %v2017_v4 = vsel %vm1993_vm11, %v1984_v37, %v3192_v16  ;;  %v3196_v28 = vunpack.i.l.bf16 %v3195_v49  ;;  %v3197_v47 = vunpack.i.h.bf16 %v3195_v49 }
 0x17d   : > { %2636 = vmatprep.mubr.msk.bf16.mxu1 %vm2062_vm12, %v2036_v25  ;;  %v2037_v0 = vpack.c.bf16 %v2017_v4, %v2016_v50  ;;  %v3200_v15 = vpop.permute.xlu1 %3199 }
 0x17e   : > { %v3202_v30 = vunpack.i.h.bf16 %v3200_v15  ;;  %v3201_v29 = vunpack.i.l.bf16 %v3200_v15  ;;  %v1853_v56 = vsel %vm1828_vm6, %v1820_v44, %v3196_v28  ;;  %v1854_v7 = vsel %vm1828_vm6, %v1821_v46, %v3197_v47 }
 0x17f   : > { %v3205_v5 = vpop.permute.xlu0 %3204  ;;  %2637 = vmatmul.mubr.msk.bf16.gmra.mxu1 %vm2062_vm12, %v2037_v0 }
 0x180   : > { %v3207_v2 = vunpack.i.h.bf16 %v3205_v5  ;;  %v3206_v1 = vunpack.i.l.bf16 %v3205_v5  ;;  %v1855_v55 = vsel %vm1828_vm6, %v1822_v58, %v3201_v29  ;;  %v1856_v26 = vsel %vm1828_vm6, %v1823_v19, %v3202_v30  ;;  %v4637_v19 = vld [vmem:[#allocation13_spill] sm:$0xff] }
 0x181   : > { %v4372_v6 = vpop.permute.xlu1 %3209 }
 0x182   : > { %v3211_v33 = vunpack.i.l.bf16 %v4372_v6  ;;  %v1886_v41 = vsel %vm1861_vm7, %v1853_v56, %v3206_v1  ;;  %v1887_v48 = vsel %vm1861_vm7, %v1854_v7, %v3207_v2  ;;  %v3212_v11 = vunpack.i.h.bf16 %v4372_v6 }
 0x183   : > { %v3215_v8 = vpop.permute.xlu0 %3214 }
 0x184   : > { %v3217_v10 = vunpack.i.h.bf16 %v3215_v8  ;;  %v3216_v40 = vunpack.i.l.bf16 %v3215_v8  ;;  %v1888_v49 = vsel %vm1861_vm7, %v1855_v55, %v3211_v33  ;;  %v1889_v52 = vsel %vm1861_vm7, %v1856_v26, %v3212_v11  ;;  %v4639_v55 = vld [vmem:[#allocation16_spill] sm:$0xff] }
 0x185   : > { %v3220_v20 = vpop.permute.xlu1 %3219 }
 0x186   : > { %v3221_v39 = vunpack.i.l.bf16 %v3220_v20  ;;  %v1919_v57 = vsel %vm1894_vm8, %v1886_v41, %v3216_v40  ;;  %v1920_v38 = vsel %vm1894_vm8, %v1887_v48, %v3217_v10  ;;  %v3222_v25 = vunpack.i.h.bf16 %v3220_v20  ;;  %v4640_v41 = vld [vmem:[#allocation15_spill] sm:$0xff] }
 0x187   : > { %v3225_v45 = vpop.permute.xlu0 %3224 }
 0x188   : > { %v3227_v27 = vunpack.i.h.bf16 %v3225_v45  ;;  %v3226_v62 = vunpack.i.l.bf16 %v3225_v45  ;;  %v1921_v51 = vsel %vm1894_vm8, %v1888_v49, %v3221_v39  ;;  %v1922_v36 = vsel %vm1894_vm8, %v1889_v52, %v3222_v25 }
 0x189   : > { %v3230_v23 = vpop.permute.xlu1 %3229 }
 0x18a   : > { %v3231_v16 = vunpack.i.l.bf16 %v3230_v23  ;;  %v1952_v31 = vsel %vm1927_vm9, %v1919_v57, %v3226_v62  ;;  %v1953_v37 = vsel %vm1927_vm9, %v1920_v38, %v3227_v27  ;;  %v3232_v50 = vunpack.i.h.bf16 %v3230_v23  ;;  %v4638_v23 = vld [vmem:[#allocation14_spill] sm:$0xff] }
 0x18b   : > { %v3235_v22 = vpop.permute.xlu0 %3234 }
 0x18c   : > { %v3237_v32 = vunpack.i.h.bf16 %v3235_v22  ;;  %v3236_v61 = vunpack.i.l.bf16 %v3235_v22  ;;  %v1954_v8 = vsel %vm1927_vm9, %v1921_v51, %v3231_v16  ;;  %v1955_v53 = vsel %vm1927_vm9, %v1922_v36, %v3232_v50 }
 0x18d   : > { %v3240_v3 = vpop.permute.xlu1 %3239 }
 0x18e   : > { %v3242_v0 = vunpack.i.h.bf16 %v3240_v3  ;;  %v3241_v15 = vunpack.i.l.bf16 %v3240_v3  ;;  %v1985_v60 = vsel %vm1960_vm10, %v1952_v31, %v3236_v61  ;;  %v1986_v35 = vsel %vm1960_vm10, %v1953_v37, %v3237_v32 }
 0x18f   : > { %v3245_v4 = vpop.permute.xlu0 %3244 }
 0x190   : > { %v3247_v5 = vunpack.i.h.bf16 %v3245_v4  ;;  %v3246_v6 = vunpack.i.l.bf16 %v3245_v4  ;;  %v1987_v20 = vsel %vm1960_vm10, %v1954_v8, %v3241_v15  ;;  %v1988_v17 = vsel %vm1960_vm10, %v1955_v53, %v3242_v0 }
 0x191   : > { %v3250_v24 = vpop.permute.xlu1 %3249 }
 0x192   : > { %v2018_v42 = vsel %vm1993_vm11, %v1985_v60, %v3246_v6  ;;  %v2019_v18 = vsel %vm1993_vm11, %v1986_v35, %v3247_v5  ;;  %v3252_v63 = vunpack.i.h.bf16 %v3250_v24  ;;  %v3251_v12 = vunpack.i.l.bf16 %v3250_v24 }
 0x193   : > { %v2038_v54 = vpack.c.bf16 %v2019_v18, %v2018_v42  ;;  %v3255_v28 = vpop.permute.xlu0 %3254 }
 0x194   : > { %v2020_v43 = vsel %vm1993_vm11, %v1987_v20, %v3251_v12  ;;  %v2021_v21 = vsel %vm1993_vm11, %v1988_v17, %v3252_v63  ;;  %v3256_v30 = vunpack.i.l.bf16 %v3255_v28  ;;  %v3257_v2 = vunpack.i.h.bf16 %v3255_v28 }
 0x195   : > { %2640 = vmatprep.mubr.msk.bf16.mxu1 %vm2062_vm12, %v2038_v54  ;;  %v2039_v14 = vpack.c.bf16 %v2021_v21, %v2020_v43  ;;  %v3260_v34 = vpop.permute.xlu1 %3259 }
 0x196   : > { %v3262_v9 = vunpack.i.h.bf16 %v3260_v34  ;;  %v3261_v13 = vunpack.i.l.bf16 %v3260_v34  ;;  %v1857_v58 = vsel %vm1828_vm6, %v4637_v19, %v3256_v30  ;;  %v1858_v7 = vsel %vm1828_vm6, %v4638_v23, %v3257_v2 }
 0x197   : > { %v3265_v59 = vpop.permute.xlu0 %3264  ;;  %2641 = vmatmul.mubr.msk.bf16.gmra.mxu1 %vm2062_vm12, %v2039_v14 }
 0x198   : > { %v3267_v44 = vunpack.i.h.bf16 %v3265_v59  ;;  %v3266_v46 = vunpack.i.l.bf16 %v3265_v59  ;;  %v1859_v26 = vsel %vm1828_vm6, %v4639_v55, %v3261_v13  ;;  %v1860_v48 = vsel %vm1828_vm6, %v4640_v41, %v3262_v9 }
 0x199   : > { %v3270_v47 = vpop.permute.xlu1 %3269 }
 0x19a   : > { %v3271_v33 = vunpack.i.l.bf16 %v3270_v47  ;;  %v1890_v11 = vsel %vm1861_vm7, %v1857_v58, %v3266_v46  ;;  %v1891_v39 = vsel %vm1861_vm7, %v1858_v7, %v3267_v44  ;;  %v3272_v32 = vunpack.i.h.bf16 %v3270_v47 }
 0x19b   : > { %v3275_v45 = vpop.permute.xlu0 %3274 }
 0x19c   : > { %v3277_v56 = vunpack.i.h.bf16 %v3275_v45  ;;  %v3276_v10 = vunpack.i.l.bf16 %v3275_v45  ;;  %v1892_v37 = vsel %vm1861_vm7, %v1859_v26, %v3271_v33  ;;  %v1893_v60 = vsel %vm1861_vm7, %v1860_v48, %v3272_v32 }
 0x19d   : > { %v3280_v29 = vpop.permute.xlu1 %3279 }
 0x19e   : > { %v3281_v61 = vunpack.i.l.bf16 %v3280_v29  ;;  %v1923_v25 = vsel %vm1894_vm8, %v1890_v11, %v3276_v10  ;;  %v1924_v16 = vsel %vm1894_vm8, %v1891_v39, %v3277_v56  ;;  %v3282_v3 = vunpack.i.h.bf16 %v3280_v29 }
 0x19f   : > { %v3285_v1 = vpop.permute.xlu0 %3284 }
 0x1a0   : > { %v3287_v27 = vunpack.i.h.bf16 %v3285_v1  ;;  %v3286_v62 = vunpack.i.l.bf16 %v3285_v1  ;;  %v1925_v35 = vsel %vm1894_vm8, %v1892_v37, %v3281_v61  ;;  %v1926_v42 = vsel %vm1894_vm8, %v1893_v60, %v3282_v3 }
 0x1a1   : > { %v3290_v40 = vpop.permute.xlu1 %3289 }
 0x1a2   : > { %v3291_v49 = vunpack.i.l.bf16 %v3290_v40  ;;  %v1956_v50 = vsel %vm1927_vm9, %v1923_v25, %v3286_v62  ;;  %v1957_v4 = vsel %vm1927_vm9, %v1924_v16, %v3287_v27  ;;  %v3292_v0 = vunpack.i.h.bf16 %v3290_v40 }
 0x1a3   : > { %v3295_v22 = vpop.permute.xlu0 %3294 }
 0x1a4   : > { %v3297_v57 = vunpack.i.h.bf16 %v3295_v22  ;;  %v3296_v38 = vunpack.i.l.bf16 %v3295_v22  ;;  %v1958_v18 = vsel %vm1927_vm9, %v1925_v35, %v3291_v49  ;;  %v1959_v63 = vsel %vm1927_vm9, %v1926_v42, %v3292_v0 }
 0x1a5   : > { %v3300_v31 = vpop.permute.xlu1 %3299 }
 0x1a6   : > { %v3302_v5 = vunpack.i.h.bf16 %v3300_v31  ;;  %v3301_v6 = vunpack.i.l.bf16 %v3300_v31  ;;  %v1989_v36 = vsel %vm1960_vm10, %v1956_v50, %v3296_v38  ;;  %v1990_v8 = vsel %vm1960_vm10, %v1957_v4, %v3297_v57 }
 0x1a7   : > { %v3305_v15 = vpop.permute.xlu0 %3304 }
 0x1a8   : > { %v3307_v52 = vunpack.i.h.bf16 %v3305_v15  ;;  %v3306_v51 = vunpack.i.l.bf16 %v3305_v15  ;;  %v1991_v17 = vsel %vm1960_vm10, %v1958_v18, %v3301_v6  ;;  %v1992_v43 = vsel %vm1960_vm10, %v1959_v63, %v3302_v5 }
 0x1a9   : > { %v3310_v54 = vpop.permute.xlu1 %3309 }
 0x1aa   : > { %v2022_v24 = vsel %vm1993_vm11, %v1989_v36, %v3306_v51  ;;  %v2023_v53 = vsel %vm1993_vm11, %v1990_v8, %v3307_v52  ;;  %v3312_v28 = vunpack.i.h.bf16 %v3310_v54  ;;  %v3311_v20 = vunpack.i.l.bf16 %v3310_v54 }
 0x1ab   : > { %v2040_v12 = vpack.c.bf16 %v2023_v53, %v2022_v24 }
 0x1ac   : > { %v2024_v21 = vsel %vm1993_vm11, %v1991_v17, %v3311_v20  ;;  %v2025_v14 = vsel %vm1993_vm11, %v1992_v43, %v3312_v28 }
 0x1ad   : > { %2644 = vmatprep.mubr.msk.bf16.mxu1 %vm2062_vm12, %v2040_v12  ;;  %v2041_v34 = vpack.c.bf16 %v2025_v14, %v2024_v21 }
 0x1af   : > { %2645 = vmatmul.mubr.msk.bf16.gmra.mxu1 %vm2062_vm12, %v2041_v34 }
 0x1d9   : > { %v2618_v59 = vpop.f32.mrf.mxu0 }
 0x1da   : > { %2278 = vst.msk [vmem:[%s3393_s27 + $0x10] sm:$0xff] %vm417_vm3, %v2618_v59  ;;  %v2379_v2 = vmul.f32 %v2618_v59, %v2618_v59  ;;  %v2311_v46 = vsel %vm417_vm3, %v2618_v59, 0.0 }
 0x1db   : > { %v2149_v47 = vpop.f32.mrf.mxu0 }
 0x1dc   : > { %2276 = vst.msk [vmem:[%s3393_s27] sm:$0xff] %vm417_vm3, %v2149_v47  ;;  %v2377_v30 = vmul.f32 %v2149_v47, %v2149_v47  ;;  %v2308_v1 = vsel %vm417_vm3, %v2149_v47, 0.0  ;;  %v2412_v23 = vsel %vm417_vm3, %v2379_v2, 0.0 }
 0x1dd   : > { %v2619_v45 = vpop.f32.mrf.mxu0 }
 0x1de   : > { %2279 = vst.msk [vmem:[%s3393_s27 + $0x18] sm:$0xff] %vm417_vm3, %v2619_v45  ;;  %v2409_v19 = vsel %vm417_vm3, %v2377_v30, 0.0  ;;  %v2380_v58 = vmul.f32 %v2619_v45, %v2619_v45  ;;  %v2313_v7 = vsel %vm417_vm3, %v2619_v45, 0.0 }
 0x1df   : > { %v2152_v29 = vpop.f32.mrf.mxu0 }
 0x1e0   : > { %2277 = vst.msk [vmem:[%s3393_s27 + $0x8] sm:$0xff] %vm417_vm3, %v2152_v29  ;;  %v2309_v9 = vsel %vm417_vm3, %v2152_v29, 0.0  ;;  %v2378_v13 = vmul.f32 %v2152_v29, %v2152_v29  ;;  %v2414_v62 = vsel %vm417_vm3, %v2380_v58, 0.0 }
 0x1e1   : > { %v2310_v44 = vadd.f32 %v2309_v9, %v2308_v1 }
 0x1e2   : > { %v2410_v56 = vsel %vm417_vm3, %v2378_v13, 0.0 }
 0x1e3   : > { %v2312_v10 = vadd.f32 %v2311_v46, %v2310_v44  ;;  %v2411_v40 = vadd.f32 %v2410_v56, %v2409_v19 }
 0x1e5   : > { %v2413_v33 = vadd.f32 %v2412_v23, %v2411_v40  ;;  %v2314_v27 = vadd.f32 %v2313_v7, %v2312_v10 }
 0x1e7   : > { %v2415_v22 = vadd.f32 %v2414_v62, %v2413_v33 }
 0x1ed   : > { %v2622_v55 = vpop.f32.mrf.mxu0 }
 0x1ee   : > { %2282 = vst.msk [vmem:[%s3393_s27 + $0x30] sm:$0xff] %vm417_vm3, %v2622_v55  ;;  %v2383_v38 = vmul.f32 %v2622_v55, %v2622_v55  ;;  %v2319_v49 = vsel %vm417_vm3, %v2622_v55, 0.0 }
 0x1ef   : > { %v2165_v26 = vpop.f32.mrf.mxu0 }
 0x1f0   : > { %2280 = vst.msk [vmem:[%s3393_s27 + $0x20] sm:$0xff] %vm417_vm3, %v2165_v26  ;;  %v2315_v41 = vsel %vm417_vm3, %v2165_v26, 0.0  ;;  %v2381_v48 = vmul.f32 %v2165_v26, %v2165_v26  ;;  %v2420_v0 = vsel %vm417_vm3, %v2383_v38, 0.0 }
 0x1f1   : > { %v2316_v11 = vadd.f32 %v2315_v41, %v2314_v27  ;;  %v2623_v39 = vpop.f32.mrf.mxu0 }
 0x1f2   : > { %v2416_v32 = vsel %vm417_vm3, %v2381_v48, 0.0  ;;  %2283 = vst.msk [vmem:[%s3393_s27 + $0x38] sm:$0xff] %vm417_vm3, %v2623_v39  ;;  %v2384_v31 = vmul.f32 %v2623_v39, %v2623_v39  ;;  %v2321_v15 = vsel %vm417_vm3, %v2623_v39, 0.0 }
 0x1f3   : > { %v2417_v61 = vadd.f32 %v2416_v32, %v2415_v22  ;;  %v2168_v57 = vpop.f32.mrf.mxu0 }
 0x1f4   : > { %2281 = vst.msk [vmem:[%s3393_s27 + $0x28] sm:$0xff] %vm417_vm3, %v2168_v57  ;;  %v2317_v25 = vsel %vm417_vm3, %v2168_v57, 0.0  ;;  %v2382_v16 = vmul.f32 %v2168_v57, %v2168_v57  ;;  %v2422_v52 = vsel %vm417_vm3, %v2384_v31, 0.0 }
 0x1f5   : > { %v2318_v3 = vadd.f32 %v2317_v25, %v2316_v11 }
 0x1f6   : > { %v2418_v37 = vsel %vm417_vm3, %v2382_v16, 0.0 }
 0x1f7   : > { %v2320_v50 = vadd.f32 %v2319_v49, %v2318_v3  ;;  %v2419_v4 = vadd.f32 %v2418_v37, %v2417_v61 }
 0x1f9   : > { %v2421_v5 = vadd.f32 %v2420_v0, %v2419_v4  ;;  %v2322_v6 = vadd.f32 %v2321_v15, %v2320_v50 }
 0x1fb   : > { %v2423_v51 = vadd.f32 %v2422_v52, %v2421_v5 }
 0x201   : > { %v2626_v60 = vpop.f32.mrf.mxu0 }
 0x202   : > { %2286 = vst.msk [vmem:[%s3393_s27 + $0x50] sm:$0xff] %vm417_vm3, %v2626_v60  ;;  %v2387_v63 = vmul.f32 %v2626_v60, %v2626_v60  ;;  %v2327_v17 = vsel %vm417_vm3, %v2626_v60, 0.0 }
 0x203   : > { %v2181_v35 = vpop.f32.mrf.mxu0 }
 0x204   : > { %2284 = vst.msk [vmem:[%s3393_s27 + $0x40] sm:$0xff] %vm417_vm3, %v2181_v35  ;;  %v2323_v36 = vsel %vm417_vm3, %v2181_v35, 0.0  ;;  %v2385_v8 = vmul.f32 %v2181_v35, %v2181_v35  ;;  %v2428_v59 = vsel %vm417_vm3, %v2387_v63, 0.0 }
 0x205   : > { %v2324_v42 = vadd.f32 %v2323_v36, %v2322_v6  ;;  %v2627_v18 = vpop.f32.mrf.mxu0 }
 0x206   : > { %v2424_v24 = vsel %vm417_vm3, %v2385_v8, 0.0  ;;  %2287 = vst.msk [vmem:[%s3393_s27 + $0x58] sm:$0xff] %vm417_vm3, %v2627_v18  ;;  %v2388_v43 = vmul.f32 %v2627_v18, %v2627_v18  ;;  %v2329_v47 = vsel %vm417_vm3, %v2627_v18, 0.0 }
 0x207   : > { %v2425_v53 = vadd.f32 %v2424_v24, %v2423_v51  ;;  %v2184_v54 = vpop.f32.mrf.mxu0 }
 0x208   : > { %2285 = vst.msk [vmem:[%s3393_s27 + $0x48] sm:$0xff] %vm417_vm3, %v2184_v54  ;;  %v2325_v12 = vsel %vm417_vm3, %v2184_v54, 0.0  ;;  %v2386_v28 = vmul.f32 %v2184_v54, %v2184_v54  ;;  %v2430_v29 = vsel %vm417_vm3, %v2388_v43, 0.0 }
 0x209   : > { %v2326_v20 = vadd.f32 %v2325_v12, %v2324_v42 }
 0x20a   : > { %v2426_v21 = vsel %vm417_vm3, %v2386_v28, 0.0 }
 0x20b   : > { %v2328_v14 = vadd.f32 %v2327_v17, %v2326_v20  ;;  %v2427_v34 = vadd.f32 %v2426_v21, %v2425_v53 }
 0x20d   : > { %v2429_v45 = vadd.f32 %v2428_v59, %v2427_v34  ;;  %v2330_v30 = vadd.f32 %v2329_v47, %v2328_v14 }
 0x20f   : > { %v2431_v2 = vadd.f32 %v2430_v29, %v2429_v45 }
 0x215   : > { %v2630_v1 = vpop.f32.mrf.mxu0 }
 0x216   : > { %2290 = vst.msk [vmem:[%s3393_s27 + $0x70] sm:$0xff] %vm417_vm3, %v2630_v1  ;;  %v2391_v10 = vmul.f32 %v2630_v1, %v2630_v1  ;;  %v2335_v27 = vsel %vm417_vm3, %v2630_v1, 0.0 }
 0x217   : > { %v2197_v9 = vpop.f32.mrf.mxu0 }
 0x218   : > { %2288 = vst.msk [vmem:[%s3393_s27 + $0x60] sm:$0xff] %vm417_vm3, %v2197_v9  ;;  %v2331_v13 = vsel %vm417_vm3, %v2197_v9, 0.0  ;;  %v2389_v44 = vmul.f32 %v2197_v9, %v2197_v9  ;;  %v2436_v41 = vsel %vm417_vm3, %v2391_v10, 0.0 }
 0x219   : > { %v2631_v46 = vpop.f32.mrf.mxu0  ;;  %v2332_v58 = vadd.f32 %v2331_v13, %v2330_v30 }
 0x21a   : > { %v2432_v19 = vsel %vm417_vm3, %v2389_v44, 0.0  ;;  %2291 = vst.msk [vmem:[%s3393_s27 + $0x78] sm:$0xff] %vm417_vm3, %v2631_v46  ;;  %v2392_v62 = vmul.f32 %v2631_v46, %v2631_v46  ;;  %v2337_v48 = vsel %vm417_vm3, %v2631_v46, 0.0 }
 0x21b   : > { %v2200_v56 = vpop.f32.mrf.mxu0  ;;  %v2433_v7 = vadd.f32 %v2432_v19, %v2431_v2 }
 0x21c   : > { %2289 = vst.msk [vmem:[%s3393_s27 + $0x68] sm:$0xff] %vm417_vm3, %v2200_v56  ;;  %v2333_v40 = vsel %vm417_vm3, %v2200_v56, 0.0  ;;  %v2390_v23 = vmul.f32 %v2200_v56, %v2200_v56  ;;  %v2438_v32 = vsel %vm417_vm3, %v2392_v62, 0.0 }
 0x21d   : > { %v2334_v33 = vadd.f32 %v2333_v40, %v2332_v58 }
 0x21e   : > { %v2434_v22 = vsel %vm417_vm3, %v2390_v23, 0.0 }
 0x21f   : > { %v2336_v55 = vadd.f32 %v2335_v27, %v2334_v33  ;;  %v2435_v26 = vadd.f32 %v2434_v22, %v2433_v7 }
 0x221   : > { %v2437_v11 = vadd.f32 %v2436_v41, %v2435_v26  ;;  %v2338_v39 = vadd.f32 %v2337_v48, %v2336_v55 }
 0x223   : > { %v2439_v61 = vadd.f32 %v2438_v32, %v2437_v11 }
 0x229   : > { %v2634_v57 = vpop.f32.mrf.mxu1 }
 0x22a   : > { %2294 = vst.msk [vmem:[%s3393_s27 + $0x90] sm:$0xff] %vm417_vm3, %v2634_v57  ;;  %v2395_v35 = vmul.f32 %v2634_v57, %v2634_v57  ;;  %v2343_v8 = vsel %vm417_vm3, %v2634_v57, 0.0 }
 0x22b   : > { %v2213_v38 = vpop.f32.mrf.mxu1 }
 0x22c   : > { %2292 = vst.msk [vmem:[%s3393_s27 + $0x80] sm:$0xff] %vm417_vm3, %v2213_v38  ;;  %v2393_v50 = vmul.f32 %v2213_v38, %v2213_v38  ;;  %v2339_v4 = vsel %vm417_vm3, %v2213_v38, 0.0  ;;  %v2444_v24 = vsel %vm417_vm3, %v2395_v35, 0.0 }
 0x22d   : > { %v2635_v25 = vpop.f32.mrf.mxu1  ;;  %v2340_v6 = vadd.f32 %v2339_v4, %v2338_v39 }
 0x22e   : > { %2295 = vst.msk [vmem:[%s3393_s27 + $0x98] sm:$0xff] %vm417_vm3, %v2635_v25  ;;  %v2440_v15 = vsel %vm417_vm3, %v2393_v50, 0.0  ;;  %v2396_v53 = vmul.f32 %v2635_v25, %v2635_v25  ;;  %v2345_v28 = vsel %vm417_vm3, %v2635_v25, 0.0 }
 0x22f   : > { %v2216_v16 = vpop.f32.mrf.mxu1  ;;  %v2441_v51 = vadd.f32 %v2440_v15, %v2439_v61 }
 0x230   : > { %2293 = vst.msk [vmem:[%s3393_s27 + $0x88] sm:$0xff] %vm417_vm3, %v2216_v16  ;;  %v2394_v0 = vmul.f32 %v2216_v16, %v2216_v16  ;;  %v2341_v5 = vsel %vm417_vm3, %v2216_v16, 0.0  ;;  %v2446_v14 = vsel %vm417_vm3, %v2396_v53, 0.0 }
 0x231   : > { %v2342_v60 = vadd.f32 %v2341_v5, %v2340_v6 }
 0x232   : > { %v2442_v52 = vsel %vm417_vm3, %v2394_v0, 0.0 }
 0x233   : > { %v2443_v36 = vadd.f32 %v2442_v52, %v2441_v51  ;;  %v2344_v42 = vadd.f32 %v2343_v8, %v2342_v60 }
 0x235   : > { %v2445_v63 = vadd.f32 %v2444_v24, %v2443_v36  ;;  %v2346_v43 = vadd.f32 %v2345_v28, %v2344_v42 }
 0x237   : > { %v2447_v45 = vadd.f32 %v2446_v14, %v2445_v63 }
 0x23f   : > { %v2638_v3 = vpop.f32.mrf.mxu1 }
 0x240   : > { %2298 = vst.msk [vmem:[%s3393_s27 + $0xb0] sm:$0xff] %vm417_vm3, %v2638_v3  ;;  %v2399_v9 = vmul.f32 %v2638_v3, %v2638_v3  ;;  %v2351_v44 = vsel %vm417_vm3, %v2638_v3, 0.0 }
 0x241   : > { %v2229_v49 = vpop.f32.mrf.mxu1 }
 0x242   : > { %2296 = vst.msk [vmem:[%s3393_s27 + $0xa0] sm:$0xff] %vm417_vm3, %v2229_v49  ;;  %v2397_v54 = vmul.f32 %v2229_v49, %v2229_v49  ;;  %v2347_v20 = vsel %vm417_vm3, %v2229_v49, 0.0  ;;  %v2452_v19 = vsel %vm417_vm3, %v2399_v9, 0.0 }
 0x243   : > { %v2639_v31 = vpop.f32.mrf.mxu1  ;;  %v2348_v47 = vadd.f32 %v2347_v20, %v2346_v43 }
 0x244   : > { %2299 = vst.msk [vmem:[%s3393_s27 + $0xb8] sm:$0xff] %vm417_vm3, %v2639_v31  ;;  %v2448_v34 = vsel %vm417_vm3, %v2397_v54, 0.0  ;;  %v2400_v58 = vmul.f32 %v2639_v31, %v2639_v31  ;;  %v2353_v40 = vsel %vm417_vm3, %v2639_v31, 0.0 }
 0x245   : > { %v2232_v37 = vpop.f32.mrf.mxu1  ;;  %v2449_v2 = vadd.f32 %v2448_v34, %v2447_v45 }
 0x246   : > { %2297 = vst.msk [vmem:[%s3393_s27 + $0xa8] sm:$0xff] %vm417_vm3, %v2232_v37  ;;  %v2398_v17 = vmul.f32 %v2232_v37, %v2232_v37  ;;  %v2349_v59 = vsel %vm417_vm3, %v2232_v37, 0.0  ;;  %v2454_v27 = vsel %vm417_vm3, %v2400_v58, 0.0 }
 0x247   : > { %v2350_v1 = vadd.f32 %v2349_v59, %v2348_v47 }
 0x248   : > { %v2450_v29 = vsel %vm417_vm3, %v2398_v17, 0.0 }
 0x249   : > { %v2451_v13 = vadd.f32 %v2450_v29, %v2449_v2  ;;  %v2352_v46 = vadd.f32 %v2351_v44, %v2350_v1 }
 0x24b   : > { %v2453_v10 = vadd.f32 %v2452_v19, %v2451_v13  ;;  %v2354_v33 = vadd.f32 %v2353_v40, %v2352_v46 }
 0x24d   : > { %v2455_v26 = vadd.f32 %v2454_v27, %v2453_v10 }
 0x257   : > { %v2642_v18 = vpop.f32.mrf.mxu1 }
 0x258   : > { %2302 = vst.msk [vmem:[%s3393_s27 + $0xd0] sm:$0xff] %vm417_vm3, %v2642_v18  ;;  %v2403_v39 = vmul.f32 %v2642_v18, %v2642_v18  ;;  %v2359_v61 = vsel %vm417_vm3, %v2642_v18, 0.0 }
 0x259   : > { %v2245_v12 = vpop.f32.mrf.mxu1 }
 0x25a   : > { %2300 = vst.msk [vmem:[%s3393_s27 + $0xc0] sm:$0xff] %vm417_vm3, %v2245_v12  ;;  %v2401_v56 = vmul.f32 %v2245_v12, %v2245_v12  ;;  %v2355_v23 = vsel %vm417_vm3, %v2245_v12, 0.0  ;;  %v2460_v25 = vsel %vm417_vm3, %v2403_v39, 0.0 }
 0x25b   : > { %v2643_v21 = vpop.f32.mrf.mxu1  ;;  %v2356_v55 = vadd.f32 %v2355_v23, %v2354_v33 }
 0x25c   : > { %2303 = vst.msk [vmem:[%s3393_s27 + $0xd8] sm:$0xff] %vm417_vm3, %v2643_v21  ;;  %v2456_v62 = vsel %vm417_vm3, %v2401_v56, 0.0  ;;  %v2404_v16 = vmul.f32 %v2643_v21, %v2643_v21  ;;  %v2361_v31 = vsel %vm417_vm3, %v2643_v21, 0.0 }
 0x25d   : > { %v2248_v30 = vpop.f32.mrf.mxu1  ;;  %v2457_v48 = vadd.f32 %v2456_v62, %v2455_v26 }
 0x25e   : > { %2301 = vst.msk [vmem:[%s3393_s27 + $0xc8] sm:$0xff] %vm417_vm3, %v2248_v30  ;;  %v2402_v7 = vmul.f32 %v2248_v30, %v2248_v30  ;;  %v2357_v22 = vsel %vm417_vm3, %v2248_v30, 0.0  ;;  %v2462_v15 = vsel %vm417_vm3, %v2404_v16, 0.0 }
 0x25f   : > { %v2358_v11 = vadd.f32 %v2357_v22, %v2356_v55 }
 0x260   : > { %v2458_v41 = vsel %vm417_vm3, %v2402_v7, 0.0 }
 0x261   : > { %v2459_v32 = vadd.f32 %v2458_v41, %v2457_v48  ;;  %v2360_v57 = vadd.f32 %v2359_v61, %v2358_v11 }
 0x263   : > { %v2461_v3 = vadd.f32 %v2460_v25, %v2459_v32  ;;  %v2362_v4 = vadd.f32 %v2361_v31, %v2360_v57 }
 0x265   : > { %v2463_v52 = vadd.f32 %v2462_v15, %v2461_v3 }
 0x26f   : > { %v2646_v38 = vpop.f32.mrf.mxu1 }
 0x270   : > { %2306 = vst.msk [vmem:[%s3393_s27 + $0xf0] sm:$0xff] %vm417_vm3, %v2646_v38  ;;  %v2407_v60 = vmul.f32 %v2646_v38, %v2646_v38  ;;  %v2367_v18 = vsel %vm417_vm3, %v2646_v38, 0.0 }
 0x271   : > { %v2261_v49 = vpop.f32.mrf.mxu1 }
 0x272   : > { %2304 = vst.msk [vmem:[%s3393_s27 + $0xe0] sm:$0xff] %vm417_vm3, %v2261_v49  ;;  %v2363_v37 = vsel %vm417_vm3, %v2261_v49, 0.0  ;;  %v2405_v50 = vmul.f32 %v2261_v49, %v2261_v49  ;;  %v2468_v12 = vsel %vm417_vm3, %v2407_v60, 0.0 }
 0x273   : > { %v2647_v0 = vpop.f32.mrf.mxu1  ;;  %v2364_v6 = vadd.f32 %v2363_v37, %v2362_v4 }
 0x274   : > { %v2464_v5 = vsel %vm417_vm3, %v2405_v50, 0.0  ;;  %2307 = vst.msk [vmem:[%s3393_s27 + $0xf8] sm:$0xff] %vm417_vm3, %v2647_v0  ;;  %v2408_v24 = vmul.f32 %v2647_v0, %v2647_v0  ;;  %v2369_v28 = vsel %vm417_vm3, %v2647_v0, 0.0 }
 0x275   : > { %v2264_v51 = vpop.f32.mrf.mxu1  ;;  %v2465_v8 = vadd.f32 %v2464_v5, %v2463_v52 }
 0x276   : > { %2305 = vst.msk [vmem:[%s3393_s27 + $0xe8] sm:$0xff] %vm417_vm3, %v2264_v51  ;;  %v2365_v35 = vsel %vm417_vm3, %v2264_v51, 0.0  ;;  %v2406_v36 = vmul.f32 %v2264_v51, %v2264_v51  ;;  %v2470_v43 = vsel %vm417_vm3, %v2408_v24, 0.0 }
 0x277   : > { %v2366_v42 = vadd.f32 %v2365_v35, %v2364_v6 }
 0x278   : > { %v2466_v53 = vsel %vm417_vm3, %v2406_v36, 0.0 }
 0x279   : > { %v2368_v54 = vadd.f32 %v2367_v18, %v2366_v42  ;;  %v2467_v63 = vadd.f32 %v2466_v53, %v2465_v8 }
 0x27b   : > { %v2370_v20 = vadd.f32 %v2369_v28, %v2368_v54  ;;  %v2469_v17 = vadd.f32 %v2468_v12, %v2467_v63 }
 0x27d   : > { %v2371_v21 = vrot.slane %v2370_v20, 4  ;;  %v2471_v14 = vadd.f32 %v2470_v43, %v2469_v17 }
 0x27f   : > { %v2372_v34 = vadd.f32 %v2371_v21, %v2370_v20  ;;  %v2472_v59 = vrot.slane %v2471_v14, 4 }
 0x281   : > { %v2373_v47 = vrot.slane %v2372_v34, 2  ;;  %v2473_v45 = vadd.f32 %v2472_v59, %v2471_v14 }
 0x283   : > { %v2374_v30 = vadd.f32 %v2373_v47, %v2372_v34  ;;  %v2474_v29 = vrot.slane %v2473_v45, 2 }
 0x285   : > { %v2375_v2 = vrot.slane %v2374_v30, 1  ;;  %v2475_v1 = vadd.f32 %v2474_v29, %v2473_v45 }
 0x287   : > { %v2476_v9 = vrot.slane %v2475_v1, 1  ;;  %v2376_v13 = vadd.f32 %v2375_v2, %v2374_v30  ;;  %2482 = sbr.rel (%p2563_p4) target bundleno = 654 (0x28e), region = 44 }
 0x289   : > { %v2477_v44 = vadd.f32 %v2476_v9, %v2475_v1 }
 0x28b   : > { %v2479_v46 = vsel %vm2478_vm13, %v2376_v13, %v2477_v44 }
 0x28c   : > { %vm2483_vm14 = vcmask 25600  }
 0x28d   : > { %2484 = vst.msk [vmem:[%s4596_s5] sm:$0x3] %vm2483_vm14, %v2479_v46 }
 0x28e PF: > { %p2586_p5 = scmp.le.s32.totalorder %s3379_s19, 0 }
 0x290   : > { %2488 = sbr.rel (%p2586_p5) target bundleno = 665 (0x299), region = 48 }
 0x295   : > { %v2489_v19 = vld [vmem:[%s4596_s5] sm:$0x3]  ;;  %vm2491_vm15 = vcmask 25600  }
 0x296   : > { %v2490_v58 = vadd.f32 %v2489_v19, %v2479_v46 }
 0x298   : > { %2492 = vst.msk [vmem:[%s4596_s5] sm:$0x3] %vm2491_vm15, %v2490_v58 }
 0x299 PF: > { %s16_s18 = sadd.s32 1, %s3332_s18  }
 0x29a   : > { %p13_p6 = scmp.ge.s32.totalorder %s16_s18, 4  }
 0x29c   :  { %15 = sbr.rel (!%p13_p6) target bundleno = 1 (0x1), region = 89 }

// kernel: basic_block.3
= control target key start
LH: loop header
LB: loop body
LE: loop exit
PB: predicated region body
PF: predicated region fallthrough
CT: control target
= control target key end

     0   :  { %s3261_s18 = smov 0   ;;  %s4398_s0 = inlined_call_operand.vmem [shape: f32[2,16,16,4], index: 0, kind: input, shape index: {}]   ;;  %s4399_s1 = inlined_call_operand.vmem [shape: bf16[36,4], index: 1, kind: input, shape index: {}]   ;;  %s4400_s2 = inlined_call_operand.vmem [shape: f32[1,4], index: 2, kind: input, shape index: {}]   ;;  %s4401_s3 = inlined_call_operand.vmem [shape: f32[1,4], index: 3, kind: input, shape index: {}]   ;;  %s4402_s4 = inlined_call_operand.vmem [shape: f32[2,16,16,4], index: 4, kind: output, shape index: {0}]   ;;  %s4403_s5 = inlined_call_operand.vmem [shape: f32[2,4], index: 5, kind: output, shape index: {1}]  }
   0x1 LB: > { %s3267_s2 = sadd.s32 4294967295, %s3220_s18   ;;  %p2448_p0 = scmp.ge.s32.totalorder %s3220_s18, 1  ;;  %s3220_s18 = sphi %s3261_s18, %s16_s18  }
   0x2   : > { %p185_p1 = scmp.lt.s32.totalorder %s3220_s18, 3 }
   0x4   : > { %p186_p2 = pnand %p2448_p0, %p185_p1 }
   0x6   : > { %189 = sbr.rel (%p186_p2) target bundleno = 661 (0x295), region = 36 }
   0xb   : > { %p213_p3 = scmp.lt.s32.totalorder %s3267_s2, 1  ;;  %p2453_p4 = scmp.ne.s32.totalorder %s3267_s2, 0 }
   0xd   : > { %s214_s3 = scalar_select %p213_p3, %s3267_s2, 1 }
   0xe   : > { %227 = sbr.rel (%p2453_p4) target bundleno = 41 (0x29), region = 40 }
   0xf   : > { %s2477_s19 = sshll.u32 %s214_s3, 8 }
  0x10   : > { %s3276_s22 = scalar_lea.vmem %s4398_s0, %s2477_s19  ;;  %s3281_s25 = scalar_lea.vmem %s4402_s4, %s2477_s19 }
  0x13   : > { %vm228_vm0 = vcmask 31744   ;;  %vm231_vm1 = vcmask 25600   ;;  %vm237_vm2 = vcmask 24576   ;;  %v3222_v0 = vmov 0.0  }
  0x14   : > { %229 = vst.msk [vmem:[#allocation2] sm:$0xff] %vm228_vm0, %v3222_v0  ;;  %230 = vst.msk [vmem:[#allocation2 + $0x8] sm:$0xff] %vm228_vm0, %v3222_v0 }
  0x15   : > { %234 = vst.msk [vmem:[#allocation2 + $0x198] sm:$0xff] %vm228_vm0, %v3222_v0  ;;  %235 = vst.msk [vmem:[#allocation2 + $0x1a0] sm:$0xff] %vm228_vm0, %v3222_v0 }
  0x16   : > { %232 = vst.msk [vmem:[#allocation2 + $0x10] sm:$0x3] %vm231_vm1, %v3222_v0  ;;  %236 = vst.msk [vmem:[#allocation2 + $0x1a8] sm:$0x3] %vm231_vm1, %v3222_v0 }
  0x17   : > { %239 = vst.msk [vmem:[#allocation2 + $0x18] sm:$0x1] %vm237_vm2, %v3222_v0  ;;  %240 = vst.msk [vmem:[#allocation2 + $0x30] sm:$0x1] %vm237_vm2, %v3222_v0 }
  0x18   : > { %241 = vst.msk [vmem:[#allocation2 + $0x48] sm:$0x1] %vm237_vm2, %v3222_v0  ;;  %242 = vst.msk [vmem:[#allocation2 + $0x60] sm:$0x1] %vm237_vm2, %v3222_v0 }
  0x19   : > { %243 = vst.msk [vmem:[#allocation2 + $0x78] sm:$0x1] %vm237_vm2, %v3222_v0  ;;  %244 = vst.msk [vmem:[#allocation2 + $0x90] sm:$0x1] %vm237_vm2, %v3222_v0 }
  0x1a   : > { %245 = vst.msk [vmem:[#allocation2 + $0xa8] sm:$0x1] %vm237_vm2, %v3222_v0  ;;  %246 = vst.msk [vmem:[#allocation2 + $0xc0] sm:$0x1] %vm237_vm2, %v3222_v0 }
  0x1b   : > { %247 = vst.msk [vmem:[#allocation2 + $0xd8] sm:$0x1] %vm237_vm2, %v3222_v0  ;;  %248 = vst.msk [vmem:[#allocation2 + $0xf0] sm:$0x1] %vm237_vm2, %v3222_v0 }
  0x1c   : > { %249 = vst.msk [vmem:[#allocation2 + $0x108] sm:$0x1] %vm237_vm2, %v3222_v0  ;;  %250 = vst.msk [vmem:[#allocation2 + $0x120] sm:$0x1] %vm237_vm2, %v3222_v0 }
  0x1d   : > { %251 = vst.msk [vmem:[#allocation2 + $0x138] sm:$0x1] %vm237_vm2, %v3222_v0  ;;  %252 = vst.msk [vmem:[#allocation2 + $0x150] sm:$0x1] %vm237_vm2, %v3222_v0 }
  0x1e   : > { %253 = vst.msk [vmem:[#allocation2 + $0x168] sm:$0x1] %vm237_vm2, %v3222_v0  ;;  %254 = vst.msk [vmem:[#allocation2 + $0x180] sm:$0x1] %vm237_vm2, %v3222_v0 }
  0x1f   : > { %257 = vst.msk [vmem:[#allocation2 + $0x29] sm:$0x1] %vm237_vm2, %v3222_v0  ;;  %258 = vst.msk [vmem:[#allocation2 + $0x41] sm:$0x1] %vm237_vm2, %v3222_v0 }
  0x20   : > { %259 = vst.msk [vmem:[#allocation2 + $0x59] sm:$0x1] %vm237_vm2, %v3222_v0  ;;  %260 = vst.msk [vmem:[#allocation2 + $0x71] sm:$0x1] %vm237_vm2, %v3222_v0 }
  0x21   : > { %261 = vst.msk [vmem:[#allocation2 + $0x89] sm:$0x1] %vm237_vm2, %v3222_v0  ;;  %262 = vst.msk [vmem:[#allocation2 + $0xa1] sm:$0x1] %vm237_vm2, %v3222_v0 }
  0x22   : > { %263 = vst.msk [vmem:[#allocation2 + $0xb9] sm:$0x1] %vm237_vm2, %v3222_v0  ;;  %264 = vst.msk [vmem:[#allocation2 + $0xd1] sm:$0x1] %vm237_vm2, %v3222_v0 }
  0x23   : > { %265 = vst.msk [vmem:[#allocation2 + $0xe9] sm:$0x1] %vm237_vm2, %v3222_v0  ;;  %266 = vst.msk [vmem:[#allocation2 + $0x101] sm:$0x1] %vm237_vm2, %v3222_v0 }
  0x24   : > { %267 = vst.msk [vmem:[#allocation2 + $0x119] sm:$0x1] %vm237_vm2, %v3222_v0  ;;  %268 = vst.msk [vmem:[#allocation2 + $0x131] sm:$0x1] %vm237_vm2, %v3222_v0 }
  0x25   : > { %269 = vst.msk [vmem:[#allocation2 + $0x149] sm:$0x1] %vm237_vm2, %v3222_v0  ;;  %270 = vst.msk [vmem:[#allocation2 + $0x161] sm:$0x1] %vm237_vm2, %v3222_v0 }
  0x26   : > { %271 = vst.msk [vmem:[#allocation2 + $0x179] sm:$0x1] %vm237_vm2, %v3222_v0  ;;  %272 = vst.msk [vmem:[#allocation2 + $0x191] sm:$0x1] %vm237_vm2, %v3222_v0 }
  0x27   : > { %238 = vst.msk [vmem:[#allocation2] sm:$0x1] %vm237_vm2, %v3222_v0  ;;  %255 = vst.msk [vmem:[#allocation2 + $0x198] sm:$0x1] %vm237_vm2, %v3222_v0 }
  0x28   : > { %256 = vst.msk [vmem:[#allocation2 + $0x11] sm:$0x1] %vm237_vm2, %v3222_v0  ;;  %273 = vst.msk [vmem:[#allocation2 + $0x1a9] sm:$0x1] %vm237_vm2, %v3222_v0 }
  0x29 PF: > { %v372_v1 = vld [vmem:[#allocation2 + $0x1] sm:$0xff]  ;;  %v373_v2 = vld [vmem:[#allocation2 + $0x9] sm:$0xff]  ;;  %vm307_vm3 = vcmask 31744   ;;  %v277_v5 = vld [vmem:[%s3276_s22 + $0x18] sm:$0xff]  ;;  %s3223_s26 = smov 4   ;;  %s3224_s27 = smov 8  }
  0x2a   : > { %v276_v3 = vld [vmem:[%s3276_s22 + $0x10] sm:$0xff]  ;;  %v2561_v4 = vpack.i.bf16 %v373_v2, %v372_v1  ;;  %v274_v6 = vld [vmem:[%s3276_s22] sm:$0xff]  ;;  %v275_v7 = vld [vmem:[%s3276_s22 + $0x8] sm:$0xff]  ;;  %311 = vst.msk [vmem:[#allocation2 + $0x39] sm:$0xff] %vm307_vm3, %v277_v5  ;;  %s3225_s28 = smov 12   ;;  %vm2001_vm4 = vcmask 1041408  }
  0x2b   : > { %310 = vst.msk [vmem:[#allocation2 + $0x31] sm:$0xff] %vm307_vm3, %v276_v3  ;;  %308 = vst.msk [vmem:[#allocation2 + $0x19] sm:$0xff] %vm307_vm3, %v274_v6  ;;  %v278_v8 = vld [vmem:[%s3276_s22 + $0x20] sm:$0xff]  ;;  %v279_v9 = vld [vmem:[%s3276_s22 + $0x28] sm:$0xff]  ;;  %s3226_s8 = smov 16   ;;  %s3227_s11 = smov 20  }
  0x2c   : > { %309 = vst.msk [vmem:[#allocation2 + $0x21] sm:$0xff] %vm307_vm3, %v275_v7  ;;  %v280_v10 = vld [vmem:[%s3276_s22 + $0x30] sm:$0xff]  ;;  %2562 = vrot.lane.b32.xlu0 %v2561_v4, %s3223_s26  ;;  %312 = vst.msk [vmem:[#allocation2 + $0x49] sm:$0xff] %vm307_vm3, %v278_v8  ;;  %v281_v11 = vld [vmem:[%s3276_s22 + $0x38] sm:$0xff]  ;;  %s3228_s12 = smov 24   ;;  %s3229_s13 = smov 28  }
  0x2d   : > { %313 = vst.msk [vmem:[#allocation2 + $0x51] sm:$0xff] %vm307_vm3, %v279_v9  ;;  %314 = vst.msk [vmem:[#allocation2 + $0x61] sm:$0xff] %vm307_vm3, %v280_v10  ;;  %v282_v12 = vld [vmem:[%s3276_s22 + $0x40] sm:$0xff]  ;;  %v283_v13 = vld [vmem:[%s3276_s22 + $0x48] sm:$0xff]  ;;  %s3230_s14 = smov 32   ;;  %vm1685_vm5 = vcmask 64512  }
  0x2e   : > { %315 = vst.msk [vmem:[#allocation2 + $0x69] sm:$0xff] %vm307_vm3, %v281_v11  ;;  %316 = vst.msk [vmem:[#allocation2 + $0x79] sm:$0xff] %vm307_vm3, %v282_v12  ;;  %v284_v14 = vld [vmem:[%s3276_s22 + $0x50] sm:$0xff]  ;;  %v285_v15 = vld [vmem:[%s3276_s22 + $0x58] sm:$0xff]  ;;  %vm1718_vm6 = vcmask 97280   ;;  %vm1751_vm7 = vcmask 130048  }
  0x2f   : > { %317 = vst.msk [vmem:[#allocation2 + $0x81] sm:$0xff] %vm307_vm3, %v283_v13  ;;  %v286_v16 = vld [vmem:[%s3276_s22 + $0x60] sm:$0xff]  ;;  %318 = vst.msk [vmem:[#allocation2 + $0x91] sm:$0xff] %vm307_vm3, %v284_v14  ;;  %v287_v17 = vld [vmem:[%s3276_s22 + $0x68] sm:$0xff]  ;;  %vm1784_vm8 = vcmask 162816   ;;  %vm1817_vm9 = vcmask 195584  }
  0x30   : > { %319 = vst.msk [vmem:[#allocation2 + $0x99] sm:$0xff] %vm307_vm3, %v285_v15  ;;  %320 = vst.msk [vmem:[#allocation2 + $0xa9] sm:$0xff] %vm307_vm3, %v286_v16  ;;  %v288_v18 = vld [vmem:[%s3276_s22 + $0x70] sm:$0xff]  ;;  %v289_v19 = vld [vmem:[%s3276_s22 + $0x78] sm:$0xff]  ;;  %vm1850_vm10 = vcmask 228352   ;;  %vm1883_vm11 = vcmask 261120  }
  0x31   : > { %321 = vst.msk [vmem:[#allocation2 + $0xb1] sm:$0xff] %vm307_vm3, %v287_v17  ;;  %322 = vst.msk [vmem:[#allocation2 + $0xc1] sm:$0xff] %vm307_vm3, %v288_v18  ;;  %v290_v20 = vld [vmem:[%s3276_s22 + $0x80] sm:$0xff]  ;;  %v291_v21 = vld [vmem:[%s3276_s22 + $0x88] sm:$0xff]  ;;  %vm1952_vm12 = vcmask 293888   ;;  %vm2368_vm13 = vcmask 1040384  }
  0x32   : > { %323 = vst.msk [vmem:[#allocation2 + $0xc9] sm:$0xff] %vm307_vm3, %v289_v19  ;;  %v292_v22 = vld [vmem:[%s3276_s22 + $0x90] sm:$0xff]  ;;  %324 = vst.msk [vmem:[#allocation2 + $0xd9] sm:$0xff] %vm307_vm3, %v290_v20  ;;  %v293_v23 = vld [vmem:[%s3276_s22 + $0x98] sm:$0xff] }
  0x33   : > { %325 = vst.msk [vmem:[#allocation2 + $0xe1] sm:$0xff] %vm307_vm3, %v291_v21  ;;  %326 = vst.msk [vmem:[#allocation2 + $0xf1] sm:$0xff] %vm307_vm3, %v292_v22  ;;  %v294_v24 = vld [vmem:[%s3276_s22 + $0xa0] sm:$0xff]  ;;  %v295_v25 = vld [vmem:[%s3276_s22 + $0xa8] sm:$0xff] }
  0x34   : > { %v376_v26 = vld [vmem:[#allocation2 + $0x31] sm:$0xff]  ;;  %327 = vst.msk [vmem:[#allocation2 + $0xf9] sm:$0xff] %vm307_vm3, %v293_v23  ;;  %328 = vst.msk [vmem:[#allocation2 + $0x109] sm:$0xff] %vm307_vm3, %v294_v24  ;;  %v377_v29 = vld [vmem:[#allocation2 + $0x39] sm:$0xff] }
  0x35   : > { %329 = vst.msk [vmem:[#allocation2 + $0x111] sm:$0xff] %vm307_vm3, %v295_v25  ;;  %v296_v27 = vld [vmem:[%s3276_s22 + $0xb0] sm:$0xff]  ;;  %v297_v28 = vld [vmem:[%s3276_s22 + $0xb8] sm:$0xff]  ;;  %v375_v31 = vld [vmem:[#allocation2 + $0x21] sm:$0xff]  ;;  %v3371_v32 = vpack.i.bf16 %v377_v29, %v376_v26 }
  0x36   : > { %v374_v30 = vld [vmem:[#allocation2 + $0x19] sm:$0xff]  ;;  %330 = vst.msk [vmem:[#allocation2 + $0x121] sm:$0xff] %vm307_vm3, %v296_v27  ;;  %331 = vst.msk [vmem:[#allocation2 + $0x129] sm:$0xff] %vm307_vm3, %v297_v28  ;;  %v378_v34 = vld [vmem:[#allocation2 + $0x49] sm:$0xff] }
  0x37   : > { %v3373_v33 = vpack.i.bf16 %v375_v31, %v374_v30  ;;  %v379_v35 = vld [vmem:[#allocation2 + $0x51] sm:$0xff]  ;;  %v380_v36 = vld [vmem:[#allocation2 + $0x61] sm:$0xff]  ;;  %v381_v37 = vld [vmem:[#allocation2 + $0x69] sm:$0xff]  ;;  %2572 = vrot.lane.b32.xlu1 %v3371_v32, %s3223_s26 }
  0x38   : > { %v3379_v38 = vpack.i.bf16 %v379_v35, %v378_v34  ;;  %v3381_v39 = vpack.i.bf16 %v381_v37, %v380_v36  ;;  %v382_v40 = vld [vmem:[#allocation2 + $0x79] sm:$0xff]  ;;  %v383_v41 = vld [vmem:[#allocation2 + $0x81] sm:$0xff]  ;;  %v384_v42 = vld [vmem:[#allocation2 + $0x91] sm:$0xff] }
  0x39   : > { %2567 = vrot.lane.b32.xlu0 %v3373_v33, %s3223_s26  ;;  %v385_v43 = vld [vmem:[#allocation2 + $0x99] sm:$0xff]  ;;  %v386_v44 = vld [vmem:[#allocation2 + $0xa9] sm:$0xff]  ;;  %v387_v45 = vld [vmem:[#allocation2 + $0xb1] sm:$0xff]  ;;  %v3387_v46 = vpack.i.bf16 %v383_v41, %v382_v40 }
  0x3a   : > { %v3389_v47 = vpack.i.bf16 %v385_v43, %v384_v42  ;;  %v388_v48 = vld [vmem:[#allocation2 + $0xc1] sm:$0xff]  ;;  %v389_v49 = vld [vmem:[#allocation2 + $0xc9] sm:$0xff]  ;;  %v301_v53 = vld [vmem:[%s3276_s22 + $0xd8] sm:$0xff]  ;;  %v3407_v56 = vpack.i.bf16 %v387_v45, %v386_v44 }
  0x3b   : > { %2577 = vrot.lane.b32.xlu1 %v3379_v38, %s3223_s26  ;;  %v298_v50 = vld [vmem:[%s3276_s22 + $0xc0] sm:$0xff]  ;;  %v299_v51 = vld [vmem:[%s3276_s22 + $0xc8] sm:$0xff]  ;;  %v300_v52 = vld [vmem:[%s3276_s22 + $0xd0] sm:$0xff]  ;;  %335 = vst.msk [vmem:[#allocation2 + $0x159] sm:$0xff] %vm307_vm3, %v301_v53  ;;  %v3409_v57 = vpack.i.bf16 %v389_v49, %v388_v48 }
  0x3c   : > { %332 = vst.msk [vmem:[#allocation2 + $0x139] sm:$0xff] %vm307_vm3, %v298_v50  ;;  %333 = vst.msk [vmem:[#allocation2 + $0x141] sm:$0xff] %vm307_vm3, %v299_v51  ;;  %v302_v54 = vld [vmem:[%s3276_s22 + $0xe0] sm:$0xff]  ;;  %v303_v55 = vld [vmem:[%s3276_s22 + $0xe8] sm:$0xff] }
  0x3d   : > { %2582 = vrot.lane.b32.xlu0 %v3381_v39, %s3223_s26  ;;  %334 = vst.msk [vmem:[#allocation2 + $0x151] sm:$0xff] %vm307_vm3, %v300_v52  ;;  %336 = vst.msk [vmem:[#allocation2 + $0x169] sm:$0xff] %vm307_vm3, %v302_v54  ;;  %v390_v58 = vld [vmem:[#allocation2 + $0xd9] sm:$0xff]  ;;  %v391_v59 = vld [vmem:[#allocation2 + $0xe1] sm:$0xff] }
  0x3e   : > { %337 = vst.msk [vmem:[#allocation2 + $0x171] sm:$0xff] %vm307_vm3, %v303_v55  ;;  %v392_v60 = vld [vmem:[#allocation2 + $0xf1] sm:$0xff]  ;;  %v393_v61 = vld [vmem:[#allocation2 + $0xf9] sm:$0xff]  ;;  %v3415_v62 = vpack.i.bf16 %v391_v59, %v390_v58  ;;  %v394_v0 = vld [vmem:[#allocation2 + $0x109] sm:$0xff] }
  0x3f   : > { %2587 = vrot.lane.b32.xlu1 %v3387_v46, %s3223_s26  ;;  %v3417_v63 = vpack.i.bf16 %v393_v61, %v392_v60  ;;  %v395_v1 = vld [vmem:[#allocation2 + $0x111] sm:$0xff]  ;;  %v396_v2 = vld [vmem:[#allocation2 + $0x121] sm:$0xff]  ;;  %v397_v3 = vld [vmem:[#allocation2 + $0x129] sm:$0xff] }
  0x40   : > { %v2616_v4 = vpack.i.bf16 %v395_v1, %v394_v0  ;;  %v2621_v5 = vpack.i.bf16 %v397_v3, %v396_v2  ;;  %v404_v12 = vld [vmem:[#allocation2 + $0x2] sm:$0xff]  ;;  %v405_v15 = vld [vmem:[#allocation2 + $0xa] sm:$0xff]  ;;  %v406_v18 = vld [vmem:[#allocation2 + $0x1a] sm:$0xff] }
  0x41   : > { %2592 = vrot.lane.b32.xlu0 %v3389_v47, %s3223_s26  ;;  %v2641_v17 = vpack.i.bf16 %v405_v15, %v404_v12  ;;  %v407_v19 = vld [vmem:[#allocation2 + $0x22] sm:$0xff]  ;;  %v408_v20 = vld [vmem:[#allocation2 + $0x32] sm:$0xff]  ;;  %v409_v21 = vld [vmem:[#allocation2 + $0x3a] sm:$0xff] }
  0x42   : > { %v401_v9 = vld [vmem:[#allocation2 + $0x159] sm:$0xff]  ;;  %v3429_v22 = vpack.i.bf16 %v407_v19, %v406_v18  ;;  %v3431_v23 = vpack.i.bf16 %v409_v21, %v408_v20  ;;  %v410_v24 = vld [vmem:[#allocation2 + $0x4a] sm:$0xff]  ;;  %v412_v26 = vld [vmem:[#allocation2 + $0x62] sm:$0xff] }
  0x43   : > { %2597 = vrot.lane.b32.xlu1 %v3407_v56, %s3223_s26  ;;  %v398_v6 = vld [vmem:[#allocation2 + $0x139] sm:$0xff]  ;;  %v399_v7 = vld [vmem:[#allocation2 + $0x141] sm:$0xff]  ;;  %v413_v27 = vld [vmem:[#allocation2 + $0x6a] sm:$0xff] }
  0x44   : > { %v400_v8 = vld [vmem:[#allocation2 + $0x151] sm:$0xff]  ;;  %v2626_v10 = vpack.i.bf16 %v399_v7, %v398_v6  ;;  %v402_v13 = vld [vmem:[#allocation2 + $0x169] sm:$0xff]  ;;  %v3439_v29 = vpack.i.bf16 %v413_v27, %v412_v26  ;;  %v414_v30 = vld [vmem:[#allocation2 + $0x7a] sm:$0xff] }
  0x45   : > { %2602 = vrot.lane.b32.xlu0 %v3409_v57, %s3223_s26  ;;  %v2631_v11 = vpack.i.bf16 %v401_v9, %v400_v8  ;;  %v403_v14 = vld [vmem:[#allocation2 + $0x171] sm:$0xff]  ;;  %v415_v31 = vld [vmem:[#allocation2 + $0x82] sm:$0xff]  ;;  %v417_v35 = vld [vmem:[#allocation2 + $0x9a] sm:$0xff] }
  0x46   : > { %v2636_v16 = vpack.i.bf16 %v403_v14, %v402_v13  ;;  %v411_v25 = vld [vmem:[#allocation2 + $0x52] sm:$0xff]  ;;  %v3445_v36 = vpack.i.bf16 %v415_v31, %v414_v30  ;;  %v418_v40 = vld [vmem:[#allocation2 + $0xaa] sm:$0xff]  ;;  %v420_v42 = vld [vmem:[#allocation2 + $0xc2] sm:$0xff] }
  0x47   : > { %2607 = vrot.lane.b32.xlu1 %v3415_v62, %s3223_s26  ;;  %v3437_v28 = vpack.i.bf16 %v411_v25, %v410_v24  ;;  %v416_v34 = vld [vmem:[#allocation2 + $0x92] sm:$0xff]  ;;  %v421_v43 = vld [vmem:[#allocation2 + $0xca] sm:$0xff]  ;;  %v422_v48 = vld [vmem:[#allocation2 + $0xda] sm:$0xff] }
  0x48   : > { %v3447_v37 = vpack.i.bf16 %v417_v35, %v416_v34  ;;  %v419_v41 = vld [vmem:[#allocation2 + $0xb2] sm:$0xff]  ;;  %v3455_v45 = vpack.i.bf16 %v421_v43, %v420_v42  ;;  %v423_v49 = vld [vmem:[#allocation2 + $0xe2] sm:$0xff]  ;;  %v425_v51 = vld [vmem:[#allocation2 + $0xfa] sm:$0xff] }
  0x49   : > { %2612 = vrot.lane.b32.xlu0 %v3417_v63, %s3223_s26  ;;  %v3453_v44 = vpack.i.bf16 %v419_v41, %v418_v40  ;;  %v424_v50 = vld [vmem:[#allocation2 + $0xf2] sm:$0xff]  ;;  %v3461_v52 = vpack.i.bf16 %v423_v49, %v422_v48  ;;  %v426_v54 = vld [vmem:[#allocation2 + $0x10a] sm:$0xff]  ;;  %v428_v58 = vld [vmem:[#allocation2 + $0x122] sm:$0xff] }
  0x4a   : > { %v3463_v53 = vpack.i.bf16 %v425_v51, %v424_v50  ;;  %v427_v55 = vld [vmem:[#allocation2 + $0x112] sm:$0xff]  ;;  %v429_v59 = vld [vmem:[#allocation2 + $0x12a] sm:$0xff]  ;;  %v430_v0 = vld [vmem:[#allocation2 + $0x13a] sm:$0xff] }
  0x4b   : > { %2617 = vrot.lane.b32.xlu1 %v2616_v4, %s3223_s26  ;;  %v3469_v60 = vpack.i.bf16 %v427_v55, %v426_v54  ;;  %v2701_v61 = vpack.i.bf16 %v429_v59, %v428_v58  ;;  %v431_v1 = vld [vmem:[#allocation2 + $0x142] sm:$0xff]  ;;  %v432_v2 = vld [vmem:[#allocation2 + $0x152] sm:$0xff]  ;;  %v433_v3 = vld [vmem:[#allocation2 + $0x15a] sm:$0xff] }
  0x4c   : > { %v2706_v4 = vpack.i.bf16 %v431_v1, %v430_v0  ;;  %v434_v6 = vld [vmem:[#allocation2 + $0x16a] sm:$0xff]  ;;  %v435_v7 = vld [vmem:[#allocation2 + $0x172] sm:$0xff]  ;;  %v3476_v9 = vld [vmem:[#allocation2 + $0x20] sm:$0xff] }
  0x4d   : > { %2622 = vrot.lane.b32.xlu0 %v2621_v5, %s3223_s26  ;;  %v2711_v5 = vpack.i.bf16 %v433_v3, %v432_v2  ;;  %v3474_v8 = vld [vmem:[#allocation2 + $0x18] sm:$0xff]  ;;  %v3482_v12 = vld [vmem:[#allocation2 + $0x30] sm:$0xff]  ;;  %v3486_v14 = vld [vmem:[#allocation2 + $0x48] sm:$0xff] }
  0x4e   : > { %v3484_v13 = vld [vmem:[#allocation2 + $0x38] sm:$0xff]  ;;  %v3488_v15 = vld [vmem:[#allocation2 + $0x50] sm:$0xff]  ;;  %v3496_v18 = vld [vmem:[#allocation2 + $0x60] sm:$0xff] }
  0x4f   : > { %2627 = vrot.lane.b32.xlu1 %v2626_v10, %s3223_s26  ;;  %v2716_v10 = vpack.i.bf16 %v435_v7, %v434_v6  ;;  %v3498_v19 = vld [vmem:[#allocation2 + $0x68] sm:$0xff]  ;;  %v3500_v20 = vld [vmem:[#allocation2 + $0x78] sm:$0xff]  ;;  %v3502_v21 = vld [vmem:[#allocation2 + $0x80] sm:$0xff] }
  0x50   : > { %v3508_v24 = vpack.i.bf16 %v3498_v19, %v3496_v18  ;;  %v3512_v25 = vpack.i.bf16 %v3502_v21, %v3500_v20  ;;  %v446_v26 = vld [vmem:[#allocation2 + $0x90] sm:$0xff]  ;;  %v447_v27 = vld [vmem:[#allocation2 + $0x98] sm:$0xff]  ;;  %v448_v30 = vld [vmem:[#allocation2 + $0xa8] sm:$0xff] }
  0x51   : > { %2632 = vrot.lane.b32.xlu0 %v2631_v11, %s3223_s26  ;;  %v2721_v11 = vpack.i.bf16 %v3476_v9, %v3474_v8  ;;  %v449_v31 = vld [vmem:[#allocation2 + $0xb0] sm:$0xff]  ;;  %v3518_v34 = vpack.i.bf16 %v447_v27, %v446_v26  ;;  %v3522_v40 = vld [vmem:[#allocation2 + $0xc0] sm:$0xff]  ;;  %v3524_v41 = vld [vmem:[#allocation2 + $0xc8] sm:$0xff] }
  0x52   : > { %v3520_v35 = vpack.i.bf16 %v449_v31, %v448_v30  ;;  %v3526_v42 = vld [vmem:[#allocation2 + $0xd8] sm:$0xff]  ;;  %v3528_v43 = vld [vmem:[#allocation2 + $0xe0] sm:$0xff]  ;;  %v3536_v48 = vpack.i.bf16 %v3524_v41, %v3522_v40  ;;  %v3542_v50 = vld [vmem:[#allocation2 + $0xf0] sm:$0xff] }
  0x53   : > { %2637 = vrot.lane.b32.xlu1 %v2636_v16, %s3223_s26  ;;  %v2726_v16 = vpack.i.bf16 %v3484_v13, %v3482_v12  ;;  %v3540_v49 = vpack.i.bf16 %v3528_v43, %v3526_v42  ;;  %v3544_v51 = vld [vmem:[#allocation2 + $0xf8] sm:$0xff]  ;;  %v456_v54 = vld [vmem:[#allocation2 + $0x108] sm:$0xff]  ;;  %v457_v55 = vld [vmem:[#allocation2 + $0x110] sm:$0xff] }
  0x54   : > { %v3552_v58 = vpack.i.bf16 %v3544_v51, %v3542_v50  ;;  %v3554_v59 = vpack.i.bf16 %v457_v55, %v456_v54  ;;  %v3202_v1 = vld [vmem:[%s4399_s1 + $0x8] sm:$0xff]   ;;  %v3203_v2 = vld [vmem:[%s4399_s1] sm:$0xff]   ;;  %v305_v3 = vld [vmem:[%s3276_s22 + $0xf8] sm:$0xff] }
  0x55   : > { %2642 = vrot.lane.b32.xlu0 %v2641_v17, %s3224_s27  ;;  %v2731_v17 = vpack.i.bf16 %v3488_v15, %v3486_v14  ;;  %339 = vst.msk [vmem:[#allocation2 + $0x189] sm:$0xff] %vm307_vm3, %v305_v3  ;;  %v583_v54 = vld [vmem:[#allocation2 + $0x109] sm:$0xff]  ;;  %v584_v55 = vld [vmem:[#allocation2 + $0x111] sm:$0xff] }
  0x56   : > { %v3011_v3 = vpack.i.bf16 %v584_v55, %v583_v54 }
  0x57   : > { %2647 = vrot.lane.b32.xlu1 %v3429_v22, %s3224_s27 }
  0x59   : > { %2652 = vrot.lane.b32.xlu0 %v3431_v23, %s3224_s27 }
  0x5b   : > { %2657 = vrot.lane.b32.xlu1 %v3437_v28, %s3224_s27 }
  0x5d   : > { %2662 = vrot.lane.b32.xlu0 %v3439_v29, %s3224_s27 }
  0x5f   : > { %2667 = vrot.lane.b32.xlu1 %v3445_v36, %s3224_s27 }
  0x61   : > { %2672 = vrot.lane.b32.xlu0 %v3447_v37, %s3224_s27 }
  0x63   : > { %2677 = vrot.lane.b32.xlu1 %v3453_v44, %s3224_s27 }
  0x65   : > { %2682 = vrot.lane.b32.xlu0 %v3455_v45, %s3224_s27 }
  0x67   : > { %2687 = vrot.lane.b32.xlu1 %v3461_v52, %s3224_s27 }
  0x69   : > { %2692 = vrot.lane.b32.xlu0 %v3463_v53, %s3224_s27 }
  0x6b   : > { %2697 = vrot.lane.b32.xlu1 %v3469_v60, %s3224_s27 }
  0x6d   : > { %2702 = vrot.lane.b32.xlu0 %v2701_v61, %s3224_s27  ;;  %v3201_v61 = vld [vmem:[%s4399_s1 + $0x10] ss:$0 sps:$4 sm:$0x33]  }
  0x6e   : > { %2542 = vmatprep.subr.msk.bf16.mxu0 %vm2001_vm4, %v3201_v61  ;;  %v2003_v0 = vsel %vm2001_vm4, %v3201_v61, 0  ;;  %2543 = vmatprep.subr.msk.bf16.mxu1 %vm2001_vm4, %v3201_v61  ;;  %v3715_v61 = vld [vmem:[#allocation2 + $0x158] sm:$0xff] }
  0x6f   : > { %2707 = vrot.lane.b32.xlu1 %v2706_v4, %s3224_s27  ;;  %2499 = vmatpush3.bf16.msra.mxu0 %v2003_v0 }
  0x70   : > { %2539 = vmatpush3.bf16.msra.mxu1 %v2003_v0  ;;  %2500 = vmatprep.subr.bf16.mxu0 %v3202_v1 }
  0x71   : > { %2712 = vrot.lane.b32.xlu0 %v2711_v5, %s3224_s27  ;;  %2537 = vmatprep.subr.bf16.mxu1 %v3202_v1 }
  0x73   : > { %2717 = vrot.lane.b32.xlu1 %v2716_v10, %s3224_s27  ;;  %2501 = vmatpush3.bf16.msra.mxu0 %v3202_v1 }
  0x74   : > { %2540 = vmatpush3.bf16.msra.mxu1 %v3202_v1  ;;  %2502 = vmatprep.subr.bf16.mxu0 %v3203_v2 }
  0x75   : > { %2722 = vrot.lane.b32.xlu0 %v2721_v11, %s3225_s28  ;;  %2538 = vmatprep.subr.bf16.mxu1 %v3203_v2 }
  0x77   : > { %2727 = vrot.lane.b32.xlu1 %v2726_v16, %s3225_s28  ;;  %2503 = vmatpush3.bf16.msra.mxu0 %v3203_v2 }
  0x78   : > { %2541 = vmatpush3.bf16.msra.mxu1 %v3203_v2 }
  0x79   : > { %2732 = vrot.lane.b32.xlu0 %v2731_v17, %s3225_s28 }
  0x7b   : > { %2737 = vrot.lane.b32.xlu1 %v3508_v24, %s3225_s28 }
  0x7d   : > { %2742 = vrot.lane.b32.xlu0 %v3512_v25, %s3225_s28 }
  0x7f   : > { %2747 = vrot.lane.b32.xlu1 %v3518_v34, %s3225_s28 }
  0x81   : > { %2752 = vrot.lane.b32.xlu0 %v3520_v35, %s3225_s28 }
  0x83   : > { %2757 = vrot.lane.b32.xlu1 %v3536_v48, %s3225_s28 }
  0x85   : > { %2762 = vrot.lane.b32.xlu0 %v3540_v49, %s3225_s28 }
  0x87   : > { %2767 = vrot.lane.b32.xlu1 %v3552_v58, %s3225_s28 }
  0x89   : > { %2772 = vrot.lane.b32.xlu0 %v3554_v59, %s3225_s28 }
  0x8b   : > { %2777 = vrot.lane.b32.xlu1 %v3373_v33, %s3226_s8  ;;  %v304_v33 = vld [vmem:[%s3276_s22 + $0xf0] sm:$0xff] }
  0x8c   : > { %338 = vst.msk [vmem:[#allocation2 + $0x181] sm:$0xff] %vm307_vm3, %v304_v33 }
  0x8d   : > { %2782 = vrot.lane.b32.xlu0 %v3371_v32, %s3226_s8 }
  0x8f   : > { %2787 = vrot.lane.b32.xlu1 %v3429_v22, %s3227_s11 }
  0x91   : > { %2792 = vrot.lane.b32.xlu0 %v3431_v23, %s3227_s11 }
  0x93   : > { %2797 = vrot.lane.b32.xlu1 %v2726_v16, %s3228_s12 }
  0x95   : > { %2802 = vrot.lane.b32.xlu0 %v2731_v17, %s3228_s12 }
  0x97   : > { %2807 = vrot.lane.b32.xlu1 %v3371_v32, %s3229_s13 }
  0x99   : > { %2812 = vrot.lane.b32.xlu0 %v3379_v38, %s3229_s13 }
  0x9b   : > { %2817 = vrot.lane.b32.xlu1 %v3431_v23, %s3230_s14 }
  0x9d   : > { %2822 = vrot.lane.b32.xlu0 %v3437_v28, %s3230_s14 }
  0x9e   : > { %v3599_v32 = vpop.permute.xlu0 %2562 }
  0x9f   : > { %2827 = vrot.lane.b32.xlu1 %v3379_v38, %s3226_s8 }
  0xa1   : > { %2832 = vrot.lane.b32.xlu0 %v3381_v39, %s3226_s8 }
  0xa3   : > { %2837 = vrot.lane.b32.xlu1 %v3437_v28, %s3227_s11 }
  0xa5   : > { %2842 = vrot.lane.b32.xlu0 %v3439_v29, %s3227_s11 }
  0xa7   : > { %2847 = vrot.lane.b32.xlu1 %v3508_v24, %s3228_s12 }
  0xa9   : > { %2852 = vrot.lane.b32.xlu0 %v3512_v25, %s3228_s12  ;;  %v3605_v22 = vpop.permute.xlu1 %2572 }
  0xab   : > { %v3607_v38 = vpop.permute.xlu0 %2567  ;;  %2857 = vrot.lane.b32.xlu1 %v3381_v39, %s3229_s13 }
  0xad   : > { %2862 = vrot.lane.b32.xlu0 %v3387_v46, %s3229_s13  ;;  %v3613_v23 = vpop.permute.xlu1 %2577 }
  0xaf   : > { %v3615_v28 = vpop.permute.xlu0 %2582  ;;  %2867 = vrot.lane.b32.xlu1 %v3439_v29, %s3230_s14 }
  0xb1   : > { %2872 = vrot.lane.b32.xlu0 %v3445_v36, %s3230_s14  ;;  %v3621_v4 = vpop.permute.xlu1 %2587 }
  0xb3   : > { %v3623_v5 = vpop.permute.xlu0 %2592  ;;  %2877 = vrot.lane.b32.xlu1 %v3387_v46, %s3226_s8 }
  0xb4   : > { %4416 = vst [vmem:[#allocation3_spill] sm:$0xff] %v3623_v5 }
  0xb5   : > { %2882 = vrot.lane.b32.xlu0 %v3389_v47, %s3226_s8  ;;  %v3629_v39 = vpop.permute.xlu1 %2597 }
  0xb6   : > { %4417 = vst [vmem:[#allocation4_spill] sm:$0xff] %v3629_v39 }
  0xb7   : > { %v3631_v6 = vpop.permute.xlu0 %2602  ;;  %2887 = vrot.lane.b32.xlu1 %v3445_v36, %s3227_s11 }
  0xb9   : > { %2892 = vrot.lane.b32.xlu0 %v3447_v37, %s3227_s11  ;;  %v3637_v29 = vpop.permute.xlu1 %2607 }
  0xbb   : > { %v3639_v7 = vpop.permute.xlu0 %2612  ;;  %2897 = vrot.lane.b32.xlu1 %v3518_v34, %s3228_s12 }
  0xbd   : > { %2902 = vrot.lane.b32.xlu0 %v3520_v35, %s3228_s12  ;;  %v3645_v46 = vpop.permute.xlu1 %2617  ;;  %v581_v35 = vld [vmem:[#allocation2 + $0xf1] sm:$0xff] }
  0xbe   : > { %4418 = vst [vmem:[#allocation5_spill] sm:$0xff] %v3645_v46 }
  0xbf   : > { %v3647_v10 = vpop.permute.xlu0 %2622  ;;  %2907 = vrot.lane.b32.xlu1 %v3389_v47, %s3229_s13 }
  0xc0   : > { %4419 = vst [vmem:[#allocation6_spill] sm:$0xff] %v3647_v10  ;;  %v3729_v10 = vld [vmem:[#allocation2 + $0x170] sm:$0xff] }
  0xc1   : > { %2912 = vrot.lane.b32.xlu0 %v3407_v56, %s3229_s13  ;;  %v3653_v36 = vpop.permute.xlu1 %2627 }
  0xc2   : > { %4420 = vst [vmem:[#allocation7_spill] sm:$0xff] %v3653_v36 }
  0xc3   : > { %v2633_v11 = vpop.permute.xlu0 %2632  ;;  %2917 = vrot.lane.b32.xlu1 %v3447_v37, %s3230_s14 }
  0xc5   : > { %2922 = vrot.lane.b32.xlu0 %v3453_v44, %s3230_s14  ;;  %v2638_v16 = vpop.permute.xlu1 %2637 }
  0xc6   : > { %v2639_v36 = vunpack.i.l.bf16 %v2638_v16 }
  0xc7   : > { %v3659_v17 = vpop.permute.xlu0 %2642  ;;  %2927 = vrot.lane.b32.xlu1 %v3407_v56, %s3226_s8 }
  0xc9   : > { %2932 = vrot.lane.b32.xlu0 %v3409_v57, %s3226_s8  ;;  %v3665_v47 = vpop.permute.xlu1 %2647 }
  0xcb   : > { %v3667_v24 = vpop.permute.xlu0 %2652  ;;  %2937 = vrot.lane.b32.xlu1 %v3453_v44, %s3227_s11 }
  0xcd   : > { %2942 = vrot.lane.b32.xlu0 %v3455_v45, %s3227_s11  ;;  %v3673_v37 = vpop.permute.xlu1 %2657 }
  0xcf   : > { %v3675_v25 = vpop.permute.xlu0 %2662  ;;  %2947 = vrot.lane.b32.xlu1 %v3536_v48, %s3228_s12  ;;  %v2635_v48 = vunpack.i.h.bf16 %v2633_v11 }
  0xd1   : > { %2952 = vrot.lane.b32.xlu0 %v3540_v49, %s3228_s12  ;;  %v3681_v56 = vpop.permute.xlu1 %2667  ;;  %v582_v49 = vld [vmem:[#allocation2 + $0xf9] sm:$0xff] }
  0xd2   : > { %v3006_v33 = vpack.i.bf16 %v582_v49, %v581_v35 }
  0xd3   : > { %v3683_v26 = vpop.permute.xlu0 %2672  ;;  %2957 = vrot.lane.b32.xlu1 %v3409_v57, %s3229_s13 }
  0xd4   : > { %4421 = vst [vmem:[#allocation8_spill] sm:$0xff] %v3683_v26 }
  0xd5   : > { %2962 = vrot.lane.b32.xlu0 %v3415_v62, %s3229_s13  ;;  %v3689_v44 = vpop.permute.xlu1 %2677 }
  0xd6   : > { %4422 = vst [vmem:[#allocation9_spill] sm:$0xff] %v3689_v44 }
  0xd7   : > { %v3691_v27 = vpop.permute.xlu0 %2682  ;;  %2967 = vrot.lane.b32.xlu1 %v3455_v45, %s3230_s14  ;;  %v2634_v45 = vunpack.i.l.bf16 %v2633_v11 }
  0xd9   : > { %2972 = vrot.lane.b32.xlu0 %v3461_v52, %s3230_s14  ;;  %v3697_v30 = vpop.permute.xlu1 %2687 }
  0xda   : > { %v2690_v44 = vunpack.i.h.bf16 %v3697_v30  ;;  %v2689_v39 = vunpack.i.l.bf16 %v3697_v30 }
  0xdb   : > { %v3699_v31 = vpop.permute.xlu0 %2692  ;;  %2977 = vrot.lane.b32.xlu1 %v3415_v62, %s3226_s8  ;;  %v3713_v62 = vld [vmem:[#allocation2 + $0x150] sm:$0xff] }
  0xdc   : > { %v1681_v11 = vsel %vm307_vm3, %v3713_v62, %v2634_v45  ;;  %v2694_v5 = vunpack.i.l.bf16 %v3699_v31 }
  0xdd   : > { %2982 = vrot.lane.b32.xlu0 %v3417_v63, %s3226_s8  ;;  %v3705_v57 = vpop.permute.xlu1 %2697 }
  0xde   : > { %4423 = vst [vmem:[#allocation10_spill] sm:$0xff] %v3705_v57  ;;  %v2685_v57 = vunpack.i.h.bf16 %v3691_v27 }
  0xdf   : > { %v3707_v34 = vpop.permute.xlu0 %2702  ;;  %2987 = vrot.lane.b32.xlu1 %v3461_v52, %s3227_s11  ;;  %v1682_v52 = vsel %vm307_vm3, %v3715_v61, %v2635_v48 }
  0xe0   : > { %4424 = vst [vmem:[#allocation11_spill] sm:$0xff] %v3707_v34  ;;  %v2640_v34 = vunpack.i.h.bf16 %v2638_v16 }
  0xe1   : > { %2992 = vrot.lane.b32.xlu0 %v3463_v53, %s3227_s11  ;;  %v3717_v63 = vpop.permute.xlu1 %2707 }
  0xe2   : > { %4425 = vst [vmem:[#allocation12_spill] sm:$0xff] %v3717_v63  ;;  %v3727_v63 = vld [vmem:[#allocation2 + $0x168] sm:$0xff] }
  0xe3   : > { %v2713_v0 = vpop.permute.xlu0 %2712  ;;  %2997 = vrot.lane.b32.xlu1 %v3552_v58, %s3228_s12  ;;  %v1684_v58 = vsel %vm307_vm3, %v3729_v10, %v2640_v34  ;;  %v490_v34 = vld [vmem:[#allocation2 + $0x121] sm:$0xff] }
  0xe4   : > { %v2715_v1 = vunpack.i.h.bf16 %v2713_v0  ;;  %v2714_v2 = vunpack.i.l.bf16 %v2713_v0 }
  0xe5   : > { %3002 = vrot.lane.b32.xlu0 %v3554_v59, %s3228_s12  ;;  %v2718_v49 = vpop.permute.xlu1 %2717  ;;  %v1683_v59 = vsel %vm307_vm3, %v3727_v63, %v2639_v36 }
  0xe6   : > { %v3732_v35 = vsel %vm1685_vm5, %v1681_v11, %v2714_v2  ;;  %v3735_v48 = vsel %vm1685_vm5, %v1682_v52, %v2715_v1  ;;  %v2720_v16 = vunpack.i.h.bf16 %v2718_v49  ;;  %v2719_v54 = vunpack.i.l.bf16 %v2718_v49  ;;  %v364_v52 = vld [vmem:[#allocation2 + $0x120] sm:$0xff]  ;;  %v365_v11 = vld [vmem:[#allocation2 + $0x128] sm:$0xff] }
  0xe7   : > { %4426 = vst [vmem:[#allocation13_spill] sm:$0xff] %v3732_v35  ;;  %4427 = vst [vmem:[#allocation14_spill] sm:$0xff] %v3735_v48  ;;  %v3737_v45 = vpop.permute.xlu0 %2722  ;;  %3007 = vrot.lane.b32.xlu1 %v3006_v33, %s3229_s13  ;;  %v3026_v36 = vpack.i.bf16 %v365_v11, %v364_v52  ;;  %v491_v33 = vld [vmem:[#allocation2 + $0x129] sm:$0xff]  ;;  %v2605_v52 = vunpack.i.h.bf16 %v3631_v6  ;;  %v2684_v11 = vunpack.i.l.bf16 %v3691_v27  ;;  %v366_v48 = vld [vmem:[#allocation2 + $0x138] sm:$0xff]  ;;  %v2614_v27 = vunpack.i.l.bf16 %v3639_v7 }
  0xe8   : > { %v3746_v55 = vsel %vm1685_vm5, %v1684_v58, %v2720_v16  ;;  %v3749_v0 = vsel %vm1685_vm5, %v1683_v59, %v2719_v54  ;;  %v3036_v54 = vpack.i.bf16 %v491_v33, %v490_v34  ;;  %v2604_v58 = vunpack.i.l.bf16 %v3631_v6  ;;  %v522_v59 = vld [vmem:[#allocation2 + $0x122] sm:$0xff] }
  0xe9   : > { %3012 = vrot.lane.b32.xlu0 %v3011_v3, %s3229_s13  ;;  %4428 = vst [vmem:[#allocation15_spill] sm:$0xff] %v3746_v55  ;;  %4429 = vst [vmem:[#allocation16_spill] sm:$0xff] %v3749_v0  ;;  %v3751_v1 = vpop.permute.xlu1 %2727  ;;  %v523_v55 = vld [vmem:[#allocation2 + $0x12a] sm:$0xff]  ;;  %v367_v35 = vld [vmem:[#allocation2 + $0x140] sm:$0xff]  ;;  %v2610_v33 = vunpack.i.h.bf16 %v3637_v29  ;;  %v2609_v6 = vunpack.i.l.bf16 %v3637_v29 }
  0xea   : > { %v1669_v34 = vsel %vm307_vm3, %v3522_v40, %v2604_v58  ;;  %v3779_v46 = vpack.i.bf16 %v367_v35, %v366_v48  ;;  %v1670_v40 = vsel %vm307_vm3, %v3524_v41, %v2605_v52 }
  0xeb   : > { %v3753_v2 = vpop.permute.xlu0 %2732  ;;  %3017 = vrot.lane.b32.xlu1 %v3463_v53, %s3230_s14  ;;  %v1702_v58 = vsel %vm1685_vm5, %v1669_v34, %v2684_v11  ;;  %v1703_v29 = vsel %vm1685_vm5, %v1670_v40, %v2685_v57  ;;  %v1671_v30 = vsel %vm307_vm3, %v3526_v42, %v2609_v6 }
  0xed   : > { %3022 = vrot.lane.b32.xlu0 %v3469_v60, %s3230_s14  ;;  %v3759_v49 = vpop.permute.xlu1 %2737 }
  0xef   : > { %v3761_v16 = vpop.permute.xlu0 %2742  ;;  %3027 = vrot.lane.b32.xlu1 %v3026_v36, %s3225_s28 }
  0xf1   : > { %3032 = vrot.lane.b32.xlu0 %v3011_v3, %s3226_s8  ;;  %v3766_v53 = vpop.permute.xlu1 %2747  ;;  %v3046_v3 = vpack.i.bf16 %v523_v55, %v522_v59  ;;  %v587_v55 = vld [vmem:[#allocation2 + $0x139] sm:$0xff]  ;;  %v588_v59 = vld [vmem:[#allocation2 + $0x141] sm:$0xff] }
  0xf2   : > { %v3804_v57 = vpack.i.bf16 %v588_v59, %v587_v55  ;;  %v1704_v55 = vsel %vm1685_vm5, %v1671_v30, %v2689_v39  ;;  %v527_v30 = vld [vmem:[#allocation2 + $0x15a] sm:$0xff] }
  0xf3   : > { %v3768_v0 = vpop.permute.xlu0 %2752  ;;  %3037 = vrot.lane.b32.xlu1 %v3036_v54, %s3226_s8 }
  0xf4   : > { %4430 = vst [vmem:[#allocation17_spill] sm:$0xff] %v3768_v0  ;;  %v2615_v0 = vunpack.i.h.bf16 %v3639_v7  ;;  %v2695_v7 = vunpack.i.h.bf16 %v3699_v31 }
  0xf5   : > { %3042 = vrot.lane.b32.xlu0 %v3469_v60, %s3227_s11  ;;  %v3785_v26 = vpop.permute.xlu1 %2757 }
  0xf6   : > { %4431 = vst [vmem:[#allocation18_spill] sm:$0xff] %v3785_v26  ;;  %v1672_v26 = vsel %vm307_vm3, %v3528_v43, %v2610_v33  ;;  %v1674_v31 = vsel %vm307_vm3, %v3544_v51, %v2615_v0 }
  0xf7   : > { %v2763_v60 = vpop.permute.xlu0 %2762  ;;  %3047 = vrot.lane.b32.xlu1 %v3046_v3, %s3227_s11  ;;  %v1705_v11 = vsel %vm1685_vm5, %v1672_v26, %v2690_v44  ;;  %v1707_v42 = vsel %vm1685_vm5, %v1674_v31, %v2695_v7  ;;  %v620_v44 = vld [vmem:[#allocation2 + $0x142] sm:$0xff]  ;;  %v526_v7 = vld [vmem:[#allocation2 + $0x152] sm:$0xff]  ;;  %v2564_v31 = vunpack.i.l.bf16 %v3599_v32 }
  0xf8   : > { %v2765_v35 = vunpack.i.h.bf16 %v2763_v60  ;;  %v2764_v48 = vunpack.i.l.bf16 %v2763_v60 }
  0xf9   : > { %3052 = vrot.lane.b32.xlu0 %v3026_v36, %s3228_s12  ;;  %v1673_v36 = vsel %vm307_vm3, %v3542_v50, %v2614_v27  ;;  %v2768_v43 = vpop.permute.xlu1 %2767  ;;  %v494_v27 = vld [vmem:[#allocation2 + $0x151] sm:$0xff] }
  0xfa   : > { %v3799_v41 = vsel %vm1718_vm6, %v1702_v58, %v2764_v48  ;;  %v3802_v52 = vsel %vm1718_vm6, %v1703_v29, %v2765_v35  ;;  %v2770_v33 = vunpack.i.h.bf16 %v2768_v43  ;;  %v2769_v60 = vunpack.i.l.bf16 %v2768_v43 }
  0xfb   : > { %v2773_v34 = vpop.permute.xlu0 %2772  ;;  %v1706_v59 = vsel %vm1685_vm5, %v1673_v36, %v2694_v5  ;;  %3057 = vrot.lane.b32.xlu1 %v3779_v46, %s3228_s12  ;;  %v619_v5 = vld [vmem:[#allocation2 + $0x13a] sm:$0xff]  ;;  %v2565_v35 = vunpack.i.h.bf16 %v3599_v32  ;;  %v3843_v29 = vpack.i.bf16 %v3715_v61, %v3713_v62  ;;  %v341_v36 = vld [vmem:[#allocation2 + $0x8] sm:$0xff]  ;;  %v2569_v43 = vunpack.i.l.bf16 %v3607_v38 }
  0xfc   : > { %v2775_v40 = vunpack.i.h.bf16 %v2773_v34  ;;  %v2774_v58 = vunpack.i.l.bf16 %v2773_v34  ;;  %v3820_v50 = vsel %vm1718_vm6, %v1704_v55, %v2769_v60  ;;  %v3823_v51 = vsel %vm1718_vm6, %v1705_v11, %v2770_v33  ;;  %v340_v33 = vld [vmem:[#allocation2] sm:$0xff] }
  0xfd   : > { %3062 = vrot.lane.b32.xlu0 %v3036_v54, %s3229_s13  ;;  %v3831_v0 = vpop.permute.xlu1 %2777  ;;  %v495_v54 = vld [vmem:[#allocation2 + $0x159] sm:$0xff]  ;;  %v3839_v48 = vpack.i.bf16 %v620_v44, %v619_v5  ;;  %v2570_v11 = vunpack.i.h.bf16 %v3607_v38  ;;  %v2645_v34 = vunpack.i.h.bf16 %v3659_v17  ;;  %v2650_v60 = vunpack.i.h.bf16 %v3665_v47 }
  0xfe   : > { %v3826_v26 = vsel %vm1718_vm6, %v1706_v59, %v2774_v58  ;;  %v3829_v39 = vsel %vm1718_vm6, %v1707_v42, %v2775_v40  ;;  %v2649_v62 = vunpack.i.l.bf16 %v3665_v47  ;;  %v3852_v58 = vpack.i.bf16 %v495_v54, %v494_v27 }
  0xff   : > { %v3833_v6 = vpop.permute.xlu0 %2782  ;;  %3067 = vrot.lane.b32.xlu1 %v3804_v57, %s3229_s13  ;;  %v2724_v32 = vunpack.i.l.bf16 %v3737_v45  ;;  %v3855_v55 = vpack.i.bf16 %v527_v30, %v526_v7  ;;  %v3859_v38 = vpack.i.bf16 %v3729_v10, %v3727_v63  ;;  %v2725_v59 = vunpack.i.h.bf16 %v3737_v45 }
 0x100   : > { %v2730_v47 = vunpack.i.h.bf16 %v3751_v1  ;;  %v2729_v42 = vunpack.i.l.bf16 %v3751_v1  ;;  %v1653_v5 = vsel %vm307_vm3, %v340_v33, %v2564_v31  ;;  %v1655_v10 = vsel %vm307_vm3, %v3474_v8, %v2569_v43 }
 0x101   : > { %3072 = vrot.lane.b32.xlu0 %v3046_v3, %s3230_s14  ;;  %v2644_v3 = vunpack.i.l.bf16 %v3659_v17  ;;  %v2788_v61 = vpop.permute.xlu1 %2787  ;;  %v1654_v17 = vsel %vm307_vm3, %v341_v36, %v2565_v35  ;;  %v1656_v63 = vsel %vm307_vm3, %v3476_v9, %v2570_v11  ;;  %v1688_v1 = vsel %vm1685_vm5, %v1655_v10, %v2649_v62 }
 0x102   : > { %v1687_v45 = vsel %vm1685_vm5, %v1654_v17, %v2645_v34  ;;  %v1689_v27 = vsel %vm1685_vm5, %v1656_v63, %v2650_v60  ;;  %v2779_v54 = vunpack.i.l.bf16 %v3831_v0  ;;  %v2780_v8 = vunpack.i.h.bf16 %v3831_v0 }
 0x103   : > { %v2793_v40 = vpop.permute.xlu0 %2792  ;;  %3077 = vrot.lane.b32.xlu1 %v3839_v48, %s3230_s14  ;;  %v1686_v44 = vsel %vm1685_vm5, %v1653_v5, %v2644_v3  ;;  %v2785_v30 = vunpack.i.h.bf16 %v3833_v6  ;;  %v2784_v9 = vunpack.i.l.bf16 %v3833_v6  ;;  %v1720_v31 = vsel %vm1718_vm6, %v1687_v45, %v2725_v59 }
 0x104   : > { %v1719_v7 = vsel %vm1718_vm6, %v1686_v44, %v2724_v32  ;;  %v1721_v36 = vsel %vm1718_vm6, %v1688_v1, %v2729_v42  ;;  %v1722_v11 = vsel %vm1718_vm6, %v1689_v27, %v2730_v47  ;;  %v2794_v43 = vunpack.i.l.bf16 %v2793_v40 }
 0x105   : > { %3082 = vrot.lane.b32.xlu0 %v3779_v46, %s3225_s28  ;;  %v2798_v35 = vpop.permute.xlu1 %2797  ;;  %v2790_v34 = vunpack.i.h.bf16 %v2788_v61  ;;  %v2789_v33 = vunpack.i.l.bf16 %v2788_v61  ;;  %v2795_v0 = vunpack.i.h.bf16 %v2793_v40  ;;  %v1752_v60 = vsel %vm1751_vm7, %v1719_v7, %v2779_v54 }
 0x106   : > { %v2800_v6 = vunpack.i.h.bf16 %v2798_v35  ;;  %v2799_v62 = vunpack.i.l.bf16 %v2798_v35  ;;  %v1753_v47 = vsel %vm1751_vm7, %v1720_v31, %v2780_v8  ;;  %v1754_v42 = vsel %vm1751_vm7, %v1721_v36, %v2784_v9 }
 0x107   : > { %v2803_v46 = vpop.permute.xlu0 %2802  ;;  %3087 = vrot.lane.b32.xlu1 %v3843_v29, %s3225_s28  ;;  %v1755_v5 = vsel %vm1751_vm7, %v1722_v11, %v2785_v30  ;;  %v1785_v45 = vsel %vm1784_vm8, %v1752_v60, %v2789_v33  ;;  %v1786_v44 = vsel %vm1784_vm8, %v1753_v47, %v2790_v34  ;;  %v623_v47 = vld [vmem:[#allocation2 + $0x16a] sm:$0xff] }
 0x108   : > { %v2804_v3 = vunpack.i.l.bf16 %v2803_v46  ;;  %v2805_v32 = vunpack.i.h.bf16 %v2803_v46  ;;  %v1788_v1 = vsel %vm1784_vm8, %v1755_v5, %v2795_v0  ;;  %v1818_v54 = vsel %vm1817_vm9, %v1785_v45, %v2799_v62  ;;  %v592_v62 = vld [vmem:[#allocation2 + $0x171] sm:$0xff]  ;;  %v466_v5 = vld [vmem:[#allocation2 + $0x180] sm:$0xff] }
 0x109   : > { %3092 = vrot.lane.b32.xlu0 %v3804_v57, %s3226_s8  ;;  %v2808_v17 = vpop.permute.xlu1 %2807  ;;  %v1787_v57 = vsel %vm1784_vm8, %v1754_v42, %v2794_v43  ;;  %v1819_v35 = vsel %vm1817_vm9, %v1786_v44, %v2800_v6  ;;  %v591_v6 = vld [vmem:[#allocation2 + $0x169] sm:$0xff]  ;;  %v624_v42 = vld [vmem:[#allocation2 + $0x172] sm:$0xff] }
 0x10a   : > { %v2810_v63 = vunpack.i.h.bf16 %v2808_v17  ;;  %v2809_v61 = vunpack.i.l.bf16 %v2808_v17  ;;  %v1820_v27 = vsel %vm1817_vm9, %v1787_v57, %v2804_v3  ;;  %v1821_v46 = vsel %vm1817_vm9, %v1788_v1, %v2805_v32  ;;  %v498_v57 = vld [vmem:[#allocation2 + $0x181] sm:$0xff]  ;;  %v531_v44 = vld [vmem:[#allocation2 + $0x18a] sm:$0xff] }
 0x10b   : > { %v2813_v59 = vpop.permute.xlu0 %2812  ;;  %3097 = vrot.lane.b32.xlu1 %v3852_v58, %s3226_s8  ;;  %v530_v45 = vld [vmem:[#allocation2 + $0x182] sm:$0xff]  ;;  %v2574_v1 = vunpack.i.l.bf16 %v3605_v22 }
 0x10c   : > { %v2814_v10 = vunpack.i.l.bf16 %v2813_v59  ;;  %v2815_v40 = vunpack.i.h.bf16 %v2813_v59  ;;  %v1851_v43 = vsel %vm1850_vm10, %v1818_v54, %v2809_v61  ;;  %v1852_v34 = vsel %vm1850_vm10, %v1819_v35, %v2810_v63 }
 0x10d   : > { %3102 = vrot.lane.b32.xlu0 %v3839_v48, %s3227_s11  ;;  %v2818_v8 = vpop.permute.xlu1 %2817  ;;  %v2575_v63 = vunpack.i.h.bf16 %v3605_v22  ;;  %v3927_v61 = vpack.i.bf16 %v592_v62, %v591_v6  ;;  %v2579_v54 = vunpack.i.l.bf16 %v3613_v23  ;;  %v2655_v35 = vunpack.i.h.bf16 %v3667_v24 }
 0x10e   : > { %v1853_v7 = vsel %vm1850_vm10, %v1820_v27, %v2814_v10  ;;  %v2820_v9 = vunpack.i.h.bf16 %v2818_v8  ;;  %v2819_v48 = vunpack.i.l.bf16 %v2818_v8  ;;  %v1854_v11 = vsel %vm1850_vm10, %v1821_v46, %v2815_v40  ;;  %v467_v10 = vld [vmem:[#allocation2 + $0x188] sm:$0xff] }
 0x10f   : > { %v2823_v30 = vpop.permute.xlu0 %2822  ;;  %3107 = vrot.lane.b32.xlu1 %v3855_v55, %s3227_s11  ;;  %v499_v40 = vld [vmem:[#allocation2 + $0x189] sm:$0xff]  ;;  %v2580_v27 = vunpack.i.h.bf16 %v3613_v23  ;;  %v2654_v46 = vunpack.i.l.bf16 %v3667_v24  ;;  %v2734_v22 = vunpack.i.l.bf16 %v3753_v2  ;;  %v1658_v24 = vsel %vm307_vm3, %v3484_v13, %v2575_v63 }
 0x110   : > { %v2825_v31 = vunpack.i.h.bf16 %v2823_v30  ;;  %v2824_v36 = vunpack.i.l.bf16 %v2823_v30  ;;  %v1884_v3 = vsel %vm1883_vm11, %v1851_v43, %v2819_v48  ;;  %v1885_v60 = vsel %vm1883_vm11, %v1852_v34, %v2820_v9 }
 0x111   : > { %3112 = vrot.lane.b32.xlu0 %v3843_v29, %s3228_s12  ;;  %v3918_v17 = vpop.permute.xlu1 %2827  ;;  %v1916_v29 = vpack.c.bf16 %v1885_v60, %v1884_v3  ;;  %v3938_v9 = vpack.i.bf16 %v624_v42, %v623_v47  ;;  %v3941_v48 = vpack.i.bf16 %v467_v10, %v466_v5  ;;  %v3943_v23 = vpack.i.bf16 %v499_v40, %v498_v57 }
 0x112   : > { %v1886_v33 = vsel %vm1883_vm11, %v1853_v7, %v2824_v36  ;;  %v1887_v0 = vsel %vm1883_vm11, %v1854_v11, %v2825_v31  ;;  %v2660_v7 = vunpack.i.h.bf16 %v3673_v37  ;;  %v3945_v31 = vpack.i.bf16 %v531_v44, %v530_v45 }
 0x113   : > { %v1917_v32 = vpack.c.bf16 %v1887_v0, %v1886_v33  ;;  %v3920_v59 = vpop.permute.xlu0 %2832  ;;  %3117 = vrot.lane.b32.xlu1 %v3859_v38, %s3228_s12  ;;  %2504 = vmatprep.mubr.msk.bf16.mxu0 %vm1952_vm12, %v1916_v29  ;;  %v2735_v36 = vunpack.i.h.bf16 %v3753_v2  ;;  %v2739_v11 = vunpack.i.l.bf16 %v3759_v49  ;;  %v1657_v43 = vsel %vm307_vm3, %v3482_v12, %v2574_v1 }
 0x114   : > { %v1660_v34 = vsel %vm307_vm3, %v3488_v15, %v2580_v27  ;;  %v1659_v13 = vsel %vm307_vm3, %v3486_v14, %v2579_v54  ;;  %v1691_v2 = vsel %vm1685_vm5, %v1658_v24, %v2655_v35  ;;  %v1690_v33 = vsel %vm1685_vm5, %v1657_v43, %v2654_v46 }
 0x115   : > { %3122 = vrot.lane.b32.xlu0 %v3852_v58, %s3229_s13  ;;  %v2659_v58 = vunpack.i.l.bf16 %v3673_v37  ;;  %2505 = vmatmul.mubr.msk.bf16.vlgmr.msra.gmra.mxu0 %vm1952_vm12, %v1917_v32  ;;  %v2838_v8 = vpop.permute.xlu1 %2837  ;;  %v2740_v37 = vunpack.i.h.bf16 %v3759_v49  ;;  %v1693_v49 = vsel %vm1685_vm5, %v1660_v34, %v2660_v7  ;;  %v2829_v3 = vunpack.i.l.bf16 %v3918_v17 }
 0x116   : > { %v1723_v12 = vsel %vm1718_vm6, %v1690_v33, %v2734_v22  ;;  %v2830_v6 = vunpack.i.h.bf16 %v3918_v17  ;;  %v2835_v15 = vunpack.i.h.bf16 %v3920_v59  ;;  %v2834_v14 = vunpack.i.l.bf16 %v3920_v59 }
 0x117   : > { %v2843_v30 = vpop.permute.xlu0 %2842  ;;  %3127 = vrot.lane.b32.xlu1 %v3927_v61, %s3229_s13  ;;  %v1692_v0 = vsel %vm1685_vm5, %v1659_v13, %v2659_v58  ;;  %v1724_v62 = vsel %vm1718_vm6, %v1691_v2, %v2735_v36  ;;  %v1726_v29 = vsel %vm1718_vm6, %v1693_v49, %v2740_v37  ;;  %v2839_v47 = vunpack.i.l.bf16 %v2838_v8 }
 0x118   : > { %v1725_v32 = vsel %vm1718_vm6, %v1692_v0, %v2739_v11  ;;  %v2840_v42 = vunpack.i.h.bf16 %v2838_v8  ;;  %v2845_v5 = vunpack.i.h.bf16 %v2843_v30  ;;  %v2844_v17 = vunpack.i.l.bf16 %v2843_v30 }
 0x119   : > { %3132 = vrot.lane.b32.xlu0 %v3855_v55, %s3230_s14  ;;  %v2848_v55 = vpop.permute.xlu1 %2847  ;;  %v1756_v57 = vsel %vm1751_vm7, %v1723_v12, %v2829_v3  ;;  %v1757_v1 = vsel %vm1751_vm7, %v1724_v62, %v2830_v6  ;;  %v1759_v27 = vsel %vm1751_vm7, %v1726_v29, %v2835_v15  ;;  %v1758_v54 = vsel %vm1751_vm7, %v1725_v32, %v2834_v14  ;;  %v563_v14 = vld [vmem:[#allocation2 + $0x198] sm:$0xff]  ;;  %v564_v62 = vld [vmem:[#allocation2 + $0x1a0] sm:$0xff] }
 0x11a   : > { %v2849_v10 = vunpack.i.l.bf16 %v2848_v55  ;;  %v2850_v59 = vunpack.i.h.bf16 %v2848_v55  ;;  %v1790_v8 = vsel %vm1784_vm8, %v1757_v1, %v2840_v42  ;;  %v1791_v30 = vsel %vm1784_vm8, %v1758_v54, %v2844_v17  ;;  %v627_v54 = vld [vmem:[#allocation2 + $0x19a] sm:$0xff] }
 0x11b   : > { %v2853_v60 = vpop.permute.xlu0 %2852  ;;  %3137 = vrot.lane.b32.xlu1 %v3938_v9, %s3230_s14  ;;  %v1792_v22 = vsel %vm1784_vm8, %v1759_v27, %v2845_v5  ;;  %v2585_v5 = vunpack.i.h.bf16 %v3615_v28  ;;  %v2584_v17 = vunpack.i.l.bf16 %v3615_v28  ;;  %v2670_v28 = vunpack.i.h.bf16 %v3681_v56 }
 0x11c   : > { %v2855_v63 = vunpack.i.h.bf16 %v2853_v60  ;;  %v2854_v40 = vunpack.i.l.bf16 %v2853_v60  ;;  %v1823_v36 = vsel %vm1817_vm9, %v1790_v8, %v2850_v59  ;;  %v2590_v59 = vunpack.i.h.bf16 %v3621_v4 }
 0x11d   : > { %3142 = vrot.lane.b32.xlu0 %v3859_v38, %s3225_s28  ;;  %v2858_v45 = vpop.permute.xlu1 %2857  ;;  %v1789_v38 = vsel %vm1784_vm8, %v1756_v57, %v2839_v47  ;;  %v596_v57 = vld [vmem:[#allocation2 + $0x1a1] sm:$0xff]  ;;  %v2744_v1 = vunpack.i.l.bf16 %v3761_v16 }
 0x11e   : > { %v2859_v35 = vunpack.i.l.bf16 %v2858_v45  ;;  %v2860_v46 = vunpack.i.h.bf16 %v2858_v45  ;;  %v1822_v24 = vsel %vm1817_vm9, %v1789_v38, %v2849_v10  ;;  %v1824_v37 = vsel %vm1817_vm9, %v1791_v30, %v2854_v40  ;;  %v595_v10 = vld [vmem:[#allocation2 + $0x199] sm:$0xff] }
 0x11f   : > { %v2863_v44 = vpop.permute.xlu0 %2862  ;;  %3147 = vrot.lane.b32.xlu1 %v3941_v48, %s3225_s28  ;;  %v1825_v11 = vsel %vm1817_vm9, %v1792_v22, %v2855_v63  ;;  %v2589_v63 = vunpack.i.l.bf16 %v3621_v4  ;;  %v2664_v40 = vunpack.i.l.bf16 %v3675_v25  ;;  %v2665_v45 = vunpack.i.h.bf16 %v3675_v25 }
 0x120   : > { %v2865_v7 = vunpack.i.h.bf16 %v2863_v44  ;;  %v2864_v58 = vunpack.i.l.bf16 %v2863_v44  ;;  %v1855_v43 = vsel %vm1850_vm10, %v1822_v24, %v2859_v35  ;;  %v1856_v0 = vsel %vm1850_vm10, %v1823_v36, %v2860_v46  ;;  %v628_v35 = vld [vmem:[#allocation2 + $0x1a2] sm:$0xff] }
 0x121   : > { %3152 = vrot.lane.b32.xlu0 %v3927_v61, %s3226_s8  ;;  %v2868_v34 = vpop.permute.xlu1 %2867  ;;  %v2669_v44 = vunpack.i.l.bf16 %v3681_v56  ;;  %v1662_v4 = vsel %vm307_vm3, %v3498_v19, %v2585_v5  ;;  %v3186_v38 = vpack.i.bf16 %v596_v57, %v595_v10  ;;  %v1661_v46 = vsel %vm307_vm3, %v3496_v18, %v2584_v17 }
 0x122   : > { %v2870_v2 = vunpack.i.h.bf16 %v2868_v34  ;;  %v2869_v61 = vunpack.i.l.bf16 %v2868_v34  ;;  %v1857_v3 = vsel %vm1850_vm10, %v1824_v37, %v2864_v58  ;;  %v1858_v55 = vsel %vm1850_vm10, %v1825_v11, %v2865_v7 }
 0x123   : > { %v2873_v13 = vpop.permute.xlu0 %2872  ;;  %3157 = vrot.lane.b32.xlu1 %v3943_v23, %s3226_s8  ;;  %v2745_v25 = vunpack.i.h.bf16 %v3761_v16  ;;  %v2750_v7 = vunpack.i.h.bf16 %v3766_v53  ;;  %v2749_v56 = vunpack.i.l.bf16 %v3766_v53  ;;  %v1664_v58 = vsel %vm307_vm3, %v3502_v21, %v2590_v59 }
 0x124   : > { %v2875_v33 = vunpack.i.h.bf16 %v2873_v13  ;;  %v2874_v49 = vunpack.i.l.bf16 %v2873_v13  ;;  %v1888_v60 = vsel %vm1883_vm11, %v1855_v43, %v2869_v61  ;;  %v1889_v12 = vsel %vm1883_vm11, %v1856_v0, %v2870_v2 }
 0x125   : > { %3162 = vrot.lane.b32.xlu0 %v3938_v9, %s3227_s11  ;;  %v1918_v32 = vpack.c.bf16 %v1889_v12, %v1888_v60  ;;  %v2878_v47 = vpop.permute.xlu1 %2877  ;;  %v3176_v9 = vpack.i.bf16 %v564_v62, %v563_v14  ;;  %v1663_v19 = vsel %vm307_vm3, %v3500_v20, %v2589_v63  ;;  %v1694_v8 = vsel %vm1685_vm5, %v1661_v46, %v2664_v40 }
 0x126   : > { %v1890_v6 = vsel %vm1883_vm11, %v1857_v3, %v2874_v49  ;;  %v1891_v15 = vsel %vm1883_vm11, %v1858_v55, %v2875_v33  ;;  %v3196_v18 = vpack.i.bf16 %v628_v35, %v627_v54  ;;  %v1695_v16 = vsel %vm1685_vm5, %v1662_v4, %v2665_v45 }
 0x127   : > { %v1919_v29 = vpack.c.bf16 %v1891_v15, %v1890_v6  ;;  %v4006_v42 = vpop.permute.xlu0 %2882  ;;  %3167 = vrot.lane.b32.xlu1 %v3945_v31, %s3227_s11  ;;  %2508 = vmatprep.mubr.msk.bf16.mxu0 %vm1952_vm12, %v1918_v32  ;;  %v1697_v30 = vsel %vm1685_vm5, %v1664_v58, %v2670_v28  ;;  %v1696_v53 = vsel %vm1685_vm5, %v1663_v19, %v2669_v44  ;;  %v2879_v37 = vunpack.i.l.bf16 %v2878_v47 }
 0x128   : > { %v1727_v22 = vsel %vm1718_vm6, %v1694_v8, %v2744_v1  ;;  %v2885_v21 = vunpack.i.h.bf16 %v4006_v42  ;;  %v2884_v11 = vunpack.i.l.bf16 %v4006_v42  ;;  %v1728_v20 = vsel %vm1718_vm6, %v1695_v16, %v2745_v25 }
 0x129   : > { %3172 = vrot.lane.b32.xlu0 %v3941_v48, %s3228_s12  ;;  %2509 = vmatmul.mubr.msk.bf16.gmra.mxu0 %vm1952_vm12, %v1919_v29  ;;  %v2888_v48 = vpop.permute.xlu1 %2887  ;;  %v1729_v43 = vsel %vm1718_vm6, %v1696_v53, %v2749_v56  ;;  %v1730_v34 = vsel %vm1718_vm6, %v1697_v30, %v2750_v7  ;;  %v1760_v6 = vsel %vm1751_vm7, %v1727_v22, %v2879_v37  ;;  %v4433_v53 = vld [vmem:[#allocation4_spill] sm:$0xff] }
 0x12a   : > { %v2890_v13 = vunpack.i.h.bf16 %v2888_v48  ;;  %v2889_v2 = vunpack.i.l.bf16 %v2888_v48  ;;  %v1763_v14 = vsel %vm1751_vm7, %v1730_v34, %v2885_v21  ;;  %v1762_v62 = vsel %vm1751_vm7, %v1729_v43, %v2884_v11  ;;  %v4435_v21 = vld [vmem:[#allocation9_spill] sm:$0xff] }
 0x12b   : > { %v2893_v27 = vpop.permute.xlu0 %2892  ;;  %3177 = vrot.lane.b32.xlu1 %v3176_v9, %s3228_s12  ;;  %v2600_v22 = vunpack.i.h.bf16 %v4433_v53  ;;  %v2680_v11 = vunpack.i.h.bf16 %v4435_v21 }
 0x12c   : > { %v2895_v61 = vunpack.i.h.bf16 %v2893_v27  ;;  %v2894_v33 = vunpack.i.l.bf16 %v2893_v27  ;;  %v1793_v42 = vsel %vm1784_vm8, %v1760_v6, %v2889_v2  ;;  %v3206_v6 = vld [vmem:[#allocation2 + $0xb0] sm:$0xff] }
 0x12d   : > { %3182 = vrot.lane.b32.xlu0 %v3943_v23, %s3229_s13  ;;  %v2898_v24 = vpop.permute.xlu1 %2897  ;;  %v2880_v23 = vunpack.i.h.bf16 %v2878_v47 }
 0x12e   : > { %v2900_v49 = vunpack.i.h.bf16 %v2898_v24  ;;  %v2899_v0 = vunpack.i.l.bf16 %v2898_v24  ;;  %v1795_v17 = vsel %vm1784_vm8, %v1762_v62, %v2894_v33  ;;  %v1796_v9 = vsel %vm1784_vm8, %v1763_v14, %v2895_v61  ;;  %v4437_v33 = vld [vmem:[#allocation18_spill] sm:$0xff] }
 0x12f   : > { %v2903_v36 = vpop.permute.xlu0 %2902  ;;  %3187 = vrot.lane.b32.xlu1 %v3186_v38, %s3229_s13  ;;  %v1761_v15 = vsel %vm1751_vm7, %v1728_v20, %v2880_v23  ;;  %v2599_v24 = vunpack.i.l.bf16 %v4433_v53  ;;  %v2679_v20 = vunpack.i.l.bf16 %v4435_v21  ;;  %v3207_v14 = vld [vmem:[#allocation2 + $0xa8] sm:$0xff] }
 0x130   : > { %v2905_v3 = vunpack.i.h.bf16 %v2903_v36  ;;  %v2904_v55 = vunpack.i.l.bf16 %v2903_v36  ;;  %v1794_v5 = vsel %vm1784_vm8, %v1761_v15, %v2890_v13  ;;  %v1826_v10 = vsel %vm1817_vm9, %v1793_v42, %v2899_v0  ;;  %v4434_v36 = vld [vmem:[#allocation8_spill] sm:$0xff]  ;;  %v4436_v13 = vld [vmem:[#allocation17_spill] sm:$0xff] }
 0x131   : > { %3192 = vrot.lane.b32.xlu0 %v3945_v31, %s3230_s14  ;;  %v2908_v60 = vpop.permute.xlu1 %2907  ;;  %v1827_v57 = vsel %vm1817_vm9, %v1794_v5, %v2900_v49  ;;  %v2675_v23 = vunpack.i.h.bf16 %v4434_v36  ;;  %v2674_v37 = vunpack.i.l.bf16 %v4434_v36  ;;  %v2755_v2 = vunpack.i.h.bf16 %v4436_v13 }
 0x132   : > { %v2910_v32 = vunpack.i.h.bf16 %v2908_v60  ;;  %v2909_v31 = vunpack.i.l.bf16 %v2908_v60  ;;  %v1828_v59 = vsel %vm1817_vm9, %v1795_v17, %v2904_v55  ;;  %v1829_v63 = vsel %vm1817_vm9, %v1796_v9, %v2905_v3  ;;  %v3204_v3 = vld [vmem:[#allocation2 + $0x98] sm:$0xff]  ;;  %v3205_v60 = vld [vmem:[#allocation2 + $0x90] sm:$0xff] }
 0x133   : > { %v2913_v12 = vpop.permute.xlu0 %2912  ;;  %3197 = vrot.lane.b32.xlu1 %v3196_v18, %s3230_s14  ;;  %v4432_v18 = vld [vmem:[#allocation3_spill] sm:$0xff]  ;;  %v2754_v61 = vunpack.i.l.bf16 %v4436_v13  ;;  %v2760_v49 = vunpack.i.h.bf16 %v4437_v33  ;;  %v2759_v0 = vunpack.i.l.bf16 %v4437_v33  ;;  %v1668_v15 = vsel %vm307_vm3, %v3206_v6, %v2600_v22 }
 0x134   : > { %v2915_v29 = vunpack.i.h.bf16 %v2913_v12  ;;  %v2914_v47 = vunpack.i.l.bf16 %v2913_v12  ;;  %v1859_v27 = vsel %vm1850_vm10, %v1826_v10, %v2909_v31  ;;  %v1860_v54 = vsel %vm1850_vm10, %v1827_v57, %v2910_v32 }
 0x135   : > { %v2918_v40 = vpop.permute.xlu1 %2917  ;;  %v2595_v16 = vunpack.i.h.bf16 %v4432_v18  ;;  %v2594_v30 = vunpack.i.l.bf16 %v4432_v18  ;;  %v1667_v62 = vsel %vm307_vm3, %v3207_v14, %v2599_v24 }
 0x136   : > { %v2920_v28 = vunpack.i.h.bf16 %v2918_v40  ;;  %v2919_v44 = vunpack.i.l.bf16 %v2918_v40  ;;  %v1861_v35 = vsel %vm1850_vm10, %v1828_v59, %v2914_v47  ;;  %v1862_v4 = vsel %vm1850_vm10, %v1829_v63, %v2915_v29 }
 0x137   : > { %v2923_v45 = vpop.permute.xlu0 %2922  ;;  %v1666_v55 = vsel %vm307_vm3, %v3204_v3, %v2595_v16  ;;  %v1665_v12 = vsel %vm307_vm3, %v3205_v60, %v2594_v30  ;;  %v1701_v29 = vsel %vm1685_vm5, %v1668_v15, %v2680_v11  ;;  %v1700_v47 = vsel %vm1685_vm5, %v1667_v62, %v2679_v20 }
 0x138   : > { %v2925_v1 = vunpack.i.h.bf16 %v2923_v45  ;;  %v2924_v48 = vunpack.i.l.bf16 %v2923_v45  ;;  %v1892_v38 = vsel %vm1883_vm11, %v1859_v27, %v2919_v44  ;;  %v1893_v46 = vsel %vm1883_vm11, %v1860_v54, %v2920_v28 }
 0x139   : > { %v1920_v56 = vpack.c.bf16 %v1893_v46, %v1892_v38  ;;  %v2928_v19 = vpop.permute.xlu1 %2927  ;;  %v1698_v32 = vsel %vm1685_vm5, %v1665_v12, %v2674_v37  ;;  %v1699_v31 = vsel %vm1685_vm5, %v1666_v55, %v2675_v23  ;;  %v1733_v40 = vsel %vm1718_vm6, %v1700_v47, %v2759_v0 }
 0x13a   : > { %v1894_v25 = vsel %vm1883_vm11, %v1861_v35, %v2924_v48  ;;  %v1895_v7 = vsel %vm1883_vm11, %v1862_v4, %v2925_v1  ;;  %v2930_v17 = vunpack.i.h.bf16 %v2928_v19  ;;  %v2929_v9 = vunpack.i.l.bf16 %v2928_v19 }
 0x13b   : > { %v1921_v58 = vpack.c.bf16 %v1895_v7, %v1894_v25  ;;  %v2933_v8 = vpop.permute.xlu0 %2932  ;;  %2512 = vmatprep.mubr.msk.bf16.mxu0 %vm1952_vm12, %v1920_v56  ;;  %v1731_v59 = vsel %vm1718_vm6, %v1698_v32, %v2754_v61  ;;  %v1732_v63 = vsel %vm1718_vm6, %v1699_v31, %v2755_v2  ;;  %v1734_v45 = vsel %vm1718_vm6, %v1701_v29, %v2760_v49 }
 0x13c   : > { %v2935_v10 = vunpack.i.h.bf16 %v2933_v8  ;;  %v2934_v57 = vunpack.i.l.bf16 %v2933_v8  ;;  %v1764_v25 = vsel %vm1751_vm7, %v1731_v59, %v2929_v9  ;;  %v1765_v7 = vsel %vm1751_vm7, %v1732_v63, %v2930_v17 }
 0x13d   : > { %2513 = vmatmul.mubr.msk.bf16.gmra.mxu0 %vm1952_vm12, %v1921_v58  ;;  %v2938_v43 = vpop.permute.xlu1 %2937 }
 0x13e   : > { %v2940_v28 = vunpack.i.h.bf16 %v2938_v43  ;;  %v2939_v44 = vunpack.i.l.bf16 %v2938_v43  ;;  %v1767_v56 = vsel %vm1751_vm7, %v1734_v45, %v2935_v10  ;;  %v1766_v58 = vsel %vm1751_vm7, %v1733_v40, %v2934_v57 }
 0x13f   : > { %v2943_v34 = vpop.permute.xlu0 %2942 }
 0x140   : > { %v2945_v1 = vunpack.i.h.bf16 %v2943_v34  ;;  %v2944_v48 = vunpack.i.l.bf16 %v2943_v34  ;;  %v1797_v30 = vsel %vm1784_vm8, %v1764_v25, %v2939_v44  ;;  %v1798_v53 = vsel %vm1784_vm8, %v1765_v7, %v2940_v28 }
 0x141   : > { %v2948_v42 = vpop.permute.xlu1 %2947 }
 0x142   : > { %v2950_v27 = vunpack.i.h.bf16 %v2948_v42  ;;  %v2949_v54 = vunpack.i.l.bf16 %v2948_v42  ;;  %v1799_v22 = vsel %vm1784_vm8, %v1766_v58, %v2944_v48  ;;  %v1800_v24 = vsel %vm1784_vm8, %v1767_v56, %v2945_v1 }
 0x143   : > { %v2953_v5 = vpop.permute.xlu0 %2952 }
 0x144   : > { %v2955_v35 = vunpack.i.h.bf16 %v2953_v5  ;;  %v2954_v4 = vunpack.i.l.bf16 %v2953_v5  ;;  %v1830_v36 = vsel %vm1817_vm9, %v1797_v30, %v2949_v54  ;;  %v1831_v23 = vsel %vm1817_vm9, %v1798_v53, %v2950_v27 }
 0x145   : > { %v2958_v38 = vpop.permute.xlu1 %2957 }
 0x146   : > { %v2960_v19 = vunpack.i.h.bf16 %v2958_v38  ;;  %v2959_v8 = vunpack.i.l.bf16 %v2958_v38  ;;  %v1832_v37 = vsel %vm1817_vm9, %v1799_v22, %v2954_v4  ;;  %v1833_v21 = vsel %vm1817_vm9, %v1800_v24, %v2955_v35 }
 0x147   : > { %v2963_v46 = vpop.permute.xlu0 %2962 }
 0x148   : > { %v2965_v18 = vunpack.i.h.bf16 %v2963_v46  ;;  %v2964_v16 = vunpack.i.l.bf16 %v2963_v46  ;;  %v1863_v61 = vsel %vm1850_vm10, %v1830_v36, %v2959_v8  ;;  %v1864_v33 = vsel %vm1850_vm10, %v1831_v23, %v2960_v19 }
 0x149   : > { %v2968_v11 = vpop.permute.xlu1 %2967 }
 0x14a   : > { %v2970_v43 = vunpack.i.h.bf16 %v2968_v11  ;;  %v2969_v34 = vunpack.i.l.bf16 %v2968_v11  ;;  %v1865_v49 = vsel %vm1850_vm10, %v1832_v37, %v2964_v16  ;;  %v1866_v0 = vsel %vm1850_vm10, %v1833_v21, %v2965_v18 }
 0x14b   : > { %v2973_v20 = vpop.permute.xlu0 %2972 }
 0x14c   : > { %v2975_v13 = vunpack.i.h.bf16 %v2973_v20  ;;  %v2974_v2 = vunpack.i.l.bf16 %v2973_v20  ;;  %v1896_v3 = vsel %vm1883_vm11, %v1863_v61, %v2969_v34  ;;  %v1897_v55 = vsel %vm1883_vm11, %v1864_v33, %v2970_v43 }
 0x14d   : > { %v1922_v6 = vpack.c.bf16 %v1897_v55, %v1896_v3  ;;  %v2978_v14 = vpop.permute.xlu1 %2977  ;;  %v4438_v3 = vld [vmem:[#allocation5_spill] sm:$0xff] }
 0x14e   : > { %v1898_v60 = vsel %vm1883_vm11, %v1865_v49, %v2974_v2  ;;  %v1899_v12 = vsel %vm1883_vm11, %v1866_v0, %v2975_v13  ;;  %v2980_v42 = vunpack.i.h.bf16 %v2978_v14  ;;  %v2979_v5 = vunpack.i.l.bf16 %v2978_v14 }
 0x14f   : > { %v1923_v15 = vpack.c.bf16 %v1899_v12, %v1898_v60  ;;  %v2983_v62 = vpop.permute.xlu0 %2982  ;;  %2516 = vmatprep.mubr.msk.bf16.mxu0 %vm1952_vm12, %v1922_v6  ;;  %v2620_v55 = vunpack.i.h.bf16 %v4438_v3  ;;  %v2619_v60 = vunpack.i.l.bf16 %v4438_v3  ;;  %v4439_v12 = vld [vmem:[#allocation10_spill] sm:$0xff] }
 0x150   : > { %v2985_v17 = vunpack.i.h.bf16 %v2983_v62  ;;  %v2984_v9 = vunpack.i.l.bf16 %v2983_v62  ;;  %v1768_v27 = vsel %vm1751_vm7, %v3799_v41, %v2979_v5  ;;  %v1769_v54 = vsel %vm1751_vm7, %v3802_v52, %v2980_v42  ;;  %v3208_v42 = vld [vmem:[#allocation2 + $0x110] sm:$0xff] }
 0x151   : > { %2517 = vmatmul.mubr.msk.bf16.gmra.mxu0 %vm1952_vm12, %v1923_v15  ;;  %v2988_v32 = vpop.permute.xlu1 %2987  ;;  %v2700_v6 = vunpack.i.h.bf16 %v4439_v12  ;;  %v2699_v15 = vunpack.i.l.bf16 %v4439_v12  ;;  %v1676_v5 = vsel %vm307_vm3, %v3208_v42, %v2620_v55  ;;  %v4442_v42 = vld [vmem:[#allocation11_spill] sm:$0xff] }
 0x152   : > { %v2990_v10 = vunpack.i.h.bf16 %v2988_v32  ;;  %v2989_v57 = vunpack.i.l.bf16 %v2988_v32  ;;  %v1771_v35 = vsel %vm1751_vm7, %v3823_v51, %v2985_v17  ;;  %v1770_v4 = vsel %vm1751_vm7, %v3820_v50, %v2984_v9  ;;  %v3209_v17 = vld [vmem:[#allocation2 + $0x108] sm:$0xff] }
 0x153   : > { %v2993_v31 = vpop.permute.xlu0 %2992  ;;  %v1675_v9 = vsel %vm307_vm3, %v3209_v17, %v2619_v60  ;;  %v2704_v17 = vunpack.i.l.bf16 %v4442_v42 }
 0x154   : > { %v2995_v59 = vunpack.i.h.bf16 %v2993_v31  ;;  %v2994_v63 = vunpack.i.l.bf16 %v2993_v31  ;;  %v1801_v56 = vsel %vm1784_vm8, %v1768_v27, %v2989_v57  ;;  %v1802_v58 = vsel %vm1784_vm8, %v1769_v54, %v2990_v10 }
 0x155   : > { %v2998_v29 = vpop.permute.xlu1 %2997 }
 0x156   : > { %v3000_v40 = vunpack.i.h.bf16 %v2998_v29  ;;  %v2999_v45 = vunpack.i.l.bf16 %v2998_v29  ;;  %v1803_v19 = vsel %vm1784_vm8, %v1770_v4, %v2994_v63  ;;  %v1804_v41 = vsel %vm1784_vm8, %v1771_v35, %v2995_v59 }
 0x157   : > { %v3003_v47 = vpop.permute.xlu0 %3002  ;;  %v1709_v59 = vsel %vm1685_vm5, %v1676_v5, %v2700_v6  ;;  %v1708_v63 = vsel %vm1685_vm5, %v1675_v9, %v2699_v15  ;;  %v4440_v6 = vld [vmem:[#allocation6_spill] sm:$0xff]  ;;  %v2705_v5 = vunpack.i.h.bf16 %v4442_v42 }
 0x158   : > { %v3005_v28 = vunpack.i.h.bf16 %v3003_v47  ;;  %v3004_v44 = vunpack.i.l.bf16 %v3003_v47  ;;  %v1834_v52 = vsel %vm1817_vm9, %v1801_v56, %v2999_v45  ;;  %v1835_v8 = vsel %vm1817_vm9, %v1802_v58, %v3000_v40  ;;  %v3210_v9 = vld [vmem:[#allocation2 + $0x128] sm:$0xff] }
 0x159   : > { %v3008_v1 = vpop.permute.xlu1 %3007  ;;  %v2625_v15 = vunpack.i.h.bf16 %v4440_v6 }
 0x15a   : > { %v3010_v38 = vunpack.i.h.bf16 %v3008_v1  ;;  %v3009_v46 = vunpack.i.l.bf16 %v3008_v1  ;;  %v1836_v51 = vsel %vm1817_vm9, %v1803_v19, %v3004_v44  ;;  %v1837_v50 = vsel %vm1817_vm9, %v1804_v41, %v3005_v28 }
 0x15b   : > { %v3013_v48 = vpop.permute.xlu0 %3012 }
 0x15c   : > { %v3015_v25 = vunpack.i.h.bf16 %v3013_v48  ;;  %v3014_v7 = vunpack.i.l.bf16 %v3013_v48  ;;  %v1867_v37 = vsel %vm1850_vm10, %v1834_v52, %v3009_v46  ;;  %v1868_v21 = vsel %vm1850_vm10, %v1835_v8, %v3010_v38 }
 0x15d   : > { %v3018_v18 = vpop.permute.xlu1 %3017 }
 0x15e   : > { %v3020_v30 = vunpack.i.h.bf16 %v3018_v18  ;;  %v3019_v53 = vunpack.i.l.bf16 %v3018_v18  ;;  %v1869_v36 = vsel %vm1850_vm10, %v1836_v51, %v3014_v7  ;;  %v1870_v23 = vsel %vm1850_vm10, %v1837_v50, %v3015_v25 }
 0x15f   : > { %v3023_v16 = vpop.permute.xlu0 %3022 }
 0x160   : > { %v3025_v22 = vunpack.i.h.bf16 %v3023_v16  ;;  %v3024_v24 = vunpack.i.l.bf16 %v3023_v16  ;;  %v1900_v43 = vsel %vm1883_vm11, %v1867_v37, %v3019_v53  ;;  %v1901_v34 = vsel %vm1883_vm11, %v1868_v21, %v3020_v30 }
 0x161   : > { %v3028_v2 = vpop.permute.xlu1 %3027  ;;  %v1924_v33 = vpack.c.bf16 %v1901_v34, %v1900_v43 }
 0x162   : > { %v1902_v11 = vsel %vm1883_vm11, %v1869_v36, %v3024_v24  ;;  %v1903_v20 = vsel %vm1883_vm11, %v1870_v23, %v3025_v22  ;;  %v3030_v32 = vunpack.i.h.bf16 %v3028_v2  ;;  %v3029_v31 = vunpack.i.l.bf16 %v3028_v2 }
 0x163   : > { %v1925_v13 = vpack.c.bf16 %v1903_v20, %v1902_v11  ;;  %v3033_v61 = vpop.permute.xlu0 %3032  ;;  %2520 = vmatprep.mubr.msk.bf16.mxu1 %vm1952_vm12, %v1924_v33 }
 0x164   : > { %v3035_v29 = vunpack.i.h.bf16 %v3033_v61  ;;  %v3034_v47 = vunpack.i.l.bf16 %v3033_v61  ;;  %v1741_v1 = vsel %vm1718_vm6, %v1708_v63, %v3029_v31  ;;  %v1742_v48 = vsel %vm1718_vm6, %v1709_v59, %v3030_v32  ;;  %v4441_v31 = vld [vmem:[#allocation7_spill] sm:$0xff]  ;;  %v4443_v63 = vld [vmem:[#allocation12_spill] sm:$0xff] }
 0x165   : > { %2521 = vmatmul.mubr.msk.bf16.vlgmr.msra.gmra.mxu1 %vm1952_vm12, %v1925_v13  ;;  %v3038_v49 = vpop.permute.xlu1 %3037 }
 0x166   : > { %v1772_v27 = vsel %vm1751_vm7, %v3826_v26, %v3034_v47  ;;  %v1773_v54 = vsel %vm1751_vm7, %v3829_v39, %v3035_v29  ;;  %v3040_v38 = vunpack.i.h.bf16 %v3038_v49  ;;  %v3039_v46 = vunpack.i.l.bf16 %v3038_v49 }
 0x167   : > { %v3043_v0 = vpop.permute.xlu0 %3042  ;;  %v2630_v29 = vunpack.i.h.bf16 %v4441_v31  ;;  %v2629_v47 = vunpack.i.l.bf16 %v4441_v31 }
 0x168   : > { %v3045_v10 = vunpack.i.h.bf16 %v3043_v0  ;;  %v3044_v57 = vunpack.i.l.bf16 %v3043_v0  ;;  %v1774_v22 = vsel %vm1751_vm7, %v1741_v1, %v3039_v46  ;;  %v1775_v24 = vsel %vm1751_vm7, %v1742_v48, %v3040_v38  ;;  %v3213_v38 = vld [vmem:[#allocation2 + $0x138] sm:$0xff] }
 0x169   : > { %v3048_v14 = vpop.permute.xlu1 %3047  ;;  %v1679_v46 = vsel %vm307_vm3, %v3213_v38, %v2629_v47 }
 0x16a   : > { %v1805_v25 = vsel %vm1784_vm8, %v1772_v27, %v3044_v57  ;;  %v1806_v7 = vsel %vm1784_vm8, %v1773_v54, %v3045_v10  ;;  %v3050_v56 = vunpack.i.h.bf16 %v3048_v14  ;;  %v3049_v58 = vunpack.i.l.bf16 %v3048_v14  ;;  %v3211_v57 = vld [vmem:[#allocation2 + $0x120] sm:$0xff] }
 0x16b   : > { %v3053_v62 = vpop.permute.xlu0 %3052  ;;  %v2624_v14 = vunpack.i.l.bf16 %v4440_v6  ;;  %v1678_v10 = vsel %vm307_vm3, %v3210_v9, %v2625_v15 }
 0x16c   : > { %v3055_v40 = vunpack.i.h.bf16 %v3053_v62  ;;  %v3054_v45 = vunpack.i.l.bf16 %v3053_v62  ;;  %v1807_v37 = vsel %vm1784_vm8, %v1774_v22, %v3049_v58  ;;  %v1808_v21 = vsel %vm1784_vm8, %v1775_v24, %v3050_v56 }
 0x16d   : > { %v3058_v28 = vpop.permute.xlu1 %3057  ;;  %v1677_v59 = vsel %vm307_vm3, %v3211_v57, %v2624_v14  ;;  %v1711_v58 = vsel %vm1685_vm5, %v1678_v10, %v2705_v5 }
 0x16e   : > { %v1838_v19 = vsel %vm1817_vm9, %v1805_v25, %v3054_v45  ;;  %v1839_v41 = vsel %vm1817_vm9, %v1806_v7, %v3055_v40  ;;  %v3060_v26 = vunpack.i.h.bf16 %v3058_v28  ;;  %v3059_v51 = vunpack.i.l.bf16 %v3058_v28 }
 0x16f   : > { %v3063_v44 = vpop.permute.xlu0 %3062  ;;  %v2710_v40 = vunpack.i.h.bf16 %v4443_v63  ;;  %v2709_v45 = vunpack.i.l.bf16 %v4443_v63  ;;  %v1710_v56 = vsel %vm1685_vm5, %v1677_v59, %v2704_v17 }
 0x170   : > { %v3065_v35 = vunpack.i.h.bf16 %v3063_v44  ;;  %v3064_v4 = vunpack.i.l.bf16 %v3063_v44  ;;  %v1840_v34 = vsel %vm1817_vm9, %v1807_v37, %v3059_v51  ;;  %v1841_v13 = vsel %vm1817_vm9, %v1808_v21, %v3060_v26 }
 0x171   : > { %v3068_v52 = vpop.permute.xlu1 %3067 }
 0x172   : > { %v1871_v18 = vsel %vm1850_vm10, %v1838_v19, %v3064_v4  ;;  %v1872_v16 = vsel %vm1850_vm10, %v1839_v41, %v3065_v35  ;;  %v3070_v30 = vunpack.i.h.bf16 %v3068_v52  ;;  %v3069_v53 = vunpack.i.l.bf16 %v3068_v52  ;;  %v3212_v35 = vld [vmem:[#allocation2 + $0x140] sm:$0xff] }
 0x173   : > { %v3073_v8 = vpop.permute.xlu0 %3072  ;;  %v1680_v4 = vsel %vm307_vm3, %v3212_v35, %v2630_v29 }
 0x174   : > { %v3075_v50 = vunpack.i.h.bf16 %v3073_v8  ;;  %v3074_v39 = vunpack.i.l.bf16 %v3073_v8  ;;  %v1873_v33 = vsel %vm1850_vm10, %v1840_v34, %v3069_v53  ;;  %v1874_v49 = vsel %vm1850_vm10, %v1841_v13, %v3070_v30 }
 0x175   : > { %v3078_v20 = vpop.permute.xlu1 %3077  ;;  %v1713_v52 = vsel %vm1685_vm5, %v1680_v4, %v2710_v40  ;;  %v1712_v8 = vsel %vm1685_vm5, %v1679_v46, %v2709_v45 }
 0x176   : > { %v1904_v36 = vsel %vm1883_vm11, %v1871_v18, %v3074_v39  ;;  %v1905_v23 = vsel %vm1883_vm11, %v1872_v16, %v3075_v50  ;;  %v3080_v2 = vunpack.i.h.bf16 %v3078_v20  ;;  %v3079_v61 = vunpack.i.l.bf16 %v3078_v20 }
 0x177   : > { %v1926_v11 = vpack.c.bf16 %v1905_v23, %v1904_v36  ;;  %v3083_v43 = vpop.permute.xlu0 %3082 }
 0x178   : > { %v1906_v0 = vsel %vm1883_vm11, %v1873_v33, %v3079_v61  ;;  %v1907_v3 = vsel %vm1883_vm11, %v1874_v49, %v3080_v2  ;;  %v3085_v1 = vunpack.i.h.bf16 %v3083_v43  ;;  %v3084_v48 = vunpack.i.l.bf16 %v3083_v43 }
 0x179   : > { %2524 = vmatprep.mubr.msk.bf16.mxu1 %vm1952_vm12, %v1926_v11  ;;  %v1927_v55 = vpack.c.bf16 %v1907_v3, %v1906_v0  ;;  %v3088_v60 = vpop.permute.xlu1 %3087 }
 0x17a   : > { %v3090_v27 = vunpack.i.h.bf16 %v3088_v60  ;;  %v3089_v54 = vunpack.i.l.bf16 %v3088_v60  ;;  %v1743_v18 = vsel %vm1718_vm6, %v1710_v56, %v3084_v48  ;;  %v1744_v16 = vsel %vm1718_vm6, %v1711_v58, %v3085_v1 }
 0x17b   : > { %v3093_v12 = vpop.permute.xlu0 %3092  ;;  %2525 = vmatmul.mubr.msk.bf16.gmra.mxu1 %vm1952_vm12, %v1927_v55 }
 0x17c   : > { %v3095_v25 = vunpack.i.h.bf16 %v3093_v12  ;;  %v3094_v7 = vunpack.i.l.bf16 %v3093_v12  ;;  %v1745_v30 = vsel %vm1718_vm6, %v1712_v8, %v3089_v54  ;;  %v1746_v53 = vsel %vm1718_vm6, %v1713_v52, %v3090_v27 }
 0x17d   : > { %v4181_v62 = vpop.permute.xlu1 %3097 }
 0x17e   : > { %v1776_v22 = vsel %vm1751_vm7, %v1743_v18, %v3094_v7  ;;  %v1777_v24 = vsel %vm1751_vm7, %v1744_v16, %v3095_v25  ;;  %v3100_v37 = vunpack.i.h.bf16 %v4181_v62  ;;  %v3099_v21 = vunpack.i.l.bf16 %v4181_v62  ;;  %v4445_v18 = vld [vmem:[#allocation14_spill] sm:$0xff] }
 0x17f   : > { %v3103_v32 = vpop.permute.xlu0 %3102 }
 0x180   : > { %v3105_v19 = vunpack.i.h.bf16 %v3103_v32  ;;  %v3104_v41 = vunpack.i.l.bf16 %v3103_v32  ;;  %v1778_v14 = vsel %vm1751_vm7, %v1745_v30, %v3099_v21  ;;  %v1779_v62 = vsel %vm1751_vm7, %v1746_v53, %v3100_v37  ;;  %v4446_v30 = vld [vmem:[#allocation16_spill] sm:$0xff] }
 0x181   : > { %v3108_v28 = vpop.permute.xlu1 %3107 }
 0x182   : > { %v1809_v11 = vsel %vm1784_vm8, %v1776_v22, %v3104_v41  ;;  %v1810_v20 = vsel %vm1784_vm8, %v1777_v24, %v3105_v19  ;;  %v3110_v43 = vunpack.i.h.bf16 %v3108_v28  ;;  %v3109_v34 = vunpack.i.l.bf16 %v3108_v28  ;;  %v4447_v22 = vld [vmem:[#allocation15_spill] sm:$0xff] }
 0x183   : > { %v3113_v44 = vpop.permute.xlu0 %3112 }
 0x184   : > { %v3115_v26 = vunpack.i.h.bf16 %v3113_v44  ;;  %v3114_v51 = vunpack.i.l.bf16 %v3113_v44  ;;  %v1811_v29 = vsel %vm1784_vm8, %v1778_v14, %v3109_v34  ;;  %v1812_v47 = vsel %vm1784_vm8, %v1779_v62, %v3110_v43 }
 0x185   : > { %v3118_v50 = vpop.permute.xlu1 %3117 }
 0x186   : > { %v1842_v13 = vsel %vm1817_vm9, %v1809_v11, %v3114_v51  ;;  %v1843_v2 = vsel %vm1817_vm9, %v1810_v20, %v3115_v26  ;;  %v3120_v49 = vunpack.i.h.bf16 %v3118_v50  ;;  %v3119_v0 = vunpack.i.l.bf16 %v3118_v50  ;;  %v4444_v50 = vld [vmem:[#allocation13_spill] sm:$0xff] }
 0x187   : > { %v3123_v39 = vpop.permute.xlu0 %3122 }
 0x188   : > { %v3125_v36 = vunpack.i.h.bf16 %v3123_v39  ;;  %v3124_v23 = vunpack.i.l.bf16 %v3123_v39  ;;  %v1844_v9 = vsel %vm1817_vm9, %v1811_v29, %v3119_v0  ;;  %v1845_v10 = vsel %vm1817_vm9, %v1812_v47, %v3120_v49 }
 0x189   : > { %v3128_v61 = vpop.permute.xlu1 %3127 }
 0x18a   : > { %v1875_v60 = vsel %vm1850_vm10, %v1842_v13, %v3124_v23  ;;  %v1876_v12 = vsel %vm1850_vm10, %v1843_v2, %v3125_v36  ;;  %v3130_v6 = vunpack.i.h.bf16 %v3128_v61  ;;  %v3129_v15 = vunpack.i.l.bf16 %v3128_v61 }
 0x18b   : > { %v3133_v33 = vpop.permute.xlu0 %3132 }
 0x18c   : > { %v3135_v3 = vunpack.i.h.bf16 %v3133_v33  ;;  %v3134_v55 = vunpack.i.l.bf16 %v3133_v33  ;;  %v1877_v63 = vsel %vm1850_vm10, %v1844_v9, %v3129_v15  ;;  %v1878_v40 = vsel %vm1850_vm10, %v1845_v10, %v3130_v6 }
 0x18d   : > { %v3138_v5 = vpop.permute.xlu1 %3137 }
 0x18e   : > { %v1908_v32 = vsel %vm1883_vm11, %v1875_v60, %v3134_v55  ;;  %v1909_v31 = vsel %vm1883_vm11, %v1876_v12, %v3135_v3  ;;  %v3140_v57 = vunpack.i.h.bf16 %v3138_v5  ;;  %v3139_v59 = vunpack.i.l.bf16 %v3138_v5 }
 0x18f   : > { %v1928_v42 = vpack.c.bf16 %v1909_v31, %v1908_v32  ;;  %v3143_v17 = vpop.permute.xlu0 %3142 }
 0x190   : > { %v1910_v45 = vsel %vm1883_vm11, %v1877_v63, %v3139_v59  ;;  %v1911_v28 = vsel %vm1883_vm11, %v1878_v40, %v3140_v57  ;;  %v3145_v38 = vunpack.i.h.bf16 %v3143_v17  ;;  %v3144_v46 = vunpack.i.l.bf16 %v3143_v17 }
 0x191   : > { %2528 = vmatprep.mubr.msk.bf16.mxu1 %vm1952_vm12, %v1928_v42  ;;  %v1929_v44 = vpack.c.bf16 %v1911_v28, %v1910_v45  ;;  %v3148_v1 = vpop.permute.xlu1 %3147 }
 0x192   : > { %v3150_v25 = vunpack.i.h.bf16 %v3148_v1  ;;  %v3149_v7 = vunpack.i.l.bf16 %v3148_v1  ;;  %v1747_v39 = vsel %vm1718_vm6, %v4444_v50, %v3144_v46  ;;  %v1748_v16 = vsel %vm1718_vm6, %v4445_v18, %v3145_v38 }
 0x193   : > { %v3153_v48 = vpop.permute.xlu0 %3152  ;;  %2529 = vmatmul.mubr.msk.bf16.gmra.mxu1 %vm1952_vm12, %v1929_v44 }
 0x194   : > { %v3155_v56 = vunpack.i.h.bf16 %v3153_v48  ;;  %v3154_v58 = vunpack.i.l.bf16 %v3153_v48  ;;  %v1749_v53 = vsel %vm1718_vm6, %v4446_v30, %v3149_v7  ;;  %v1750_v24 = vsel %vm1718_vm6, %v4447_v22, %v3150_v25 }
 0x195   : > { %v3158_v27 = vpop.permute.xlu1 %3157 }
 0x196   : > { %v1780_v36 = vsel %vm1751_vm7, %v1747_v39, %v3154_v58  ;;  %v1781_v23 = vsel %vm1751_vm7, %v1748_v16, %v3155_v56  ;;  %v3160_v11 = vunpack.i.h.bf16 %v3158_v27  ;;  %v3159_v20 = vunpack.i.l.bf16 %v3158_v27 }
 0x197   : > { %v3163_v54 = vpop.permute.xlu0 %3162 }
 0x198   : > { %v3165_v19 = vunpack.i.h.bf16 %v3163_v54  ;;  %v3164_v41 = vunpack.i.l.bf16 %v3163_v54  ;;  %v1782_v32 = vsel %vm1751_vm7, %v1749_v53, %v3159_v20  ;;  %v1783_v31 = vsel %vm1751_vm7, %v1750_v24, %v3160_v11 }
 0x199   : > { %v3168_v35 = vpop.permute.xlu1 %3167 }
 0x19a   : > { %v1813_v43 = vsel %vm1784_vm8, %v1780_v36, %v3164_v41  ;;  %v1814_v34 = vsel %vm1784_vm8, %v1781_v23, %v3165_v19  ;;  %v3170_v13 = vunpack.i.h.bf16 %v3168_v35  ;;  %v3169_v2 = vunpack.i.l.bf16 %v3168_v35 }
 0x19b   : > { %v3173_v4 = vpop.permute.xlu0 %3172 }
 0x19c   : > { %v3175_v52 = vunpack.i.h.bf16 %v3173_v4  ;;  %v3174_v8 = vunpack.i.l.bf16 %v3173_v4  ;;  %v1815_v42 = vsel %vm1784_vm8, %v1782_v32, %v3169_v2  ;;  %v1816_v5 = vsel %vm1784_vm8, %v1783_v31, %v3170_v13 }
 0x19d   : > { %v3178_v26 = vpop.permute.xlu1 %3177 }
 0x19e   : > { %v1846_v61 = vsel %vm1817_vm9, %v1813_v43, %v3174_v8  ;;  %v1847_v33 = vsel %vm1817_vm9, %v1814_v34, %v3175_v52  ;;  %v3180_v3 = vunpack.i.h.bf16 %v3178_v26  ;;  %v3179_v55 = vunpack.i.l.bf16 %v3178_v26 }
 0x19f   : > { %v3183_v51 = vpop.permute.xlu0 %3182 }
 0x1a0   : > { %v3185_v37 = vunpack.i.h.bf16 %v3183_v51  ;;  %v3184_v21 = vunpack.i.l.bf16 %v3183_v51  ;;  %v1848_v10 = vsel %vm1817_vm9, %v1815_v42, %v3179_v55  ;;  %v1849_v57 = vsel %vm1817_vm9, %v1816_v5, %v3180_v3 }
 0x1a1   : > { %v3188_v49 = vpop.permute.xlu1 %3187 }
 0x1a2   : > { %v1879_v6 = vsel %vm1850_vm10, %v1846_v61, %v3184_v21  ;;  %v1880_v15 = vsel %vm1850_vm10, %v1847_v33, %v3185_v37  ;;  %v3190_v14 = vunpack.i.h.bf16 %v3188_v49  ;;  %v3189_v62 = vunpack.i.l.bf16 %v3188_v49 }
 0x1a3   : > { %v3193_v0 = vpop.permute.xlu0 %3192 }
 0x1a4   : > { %v3195_v60 = vunpack.i.h.bf16 %v3193_v0  ;;  %v3194_v12 = vunpack.i.l.bf16 %v3193_v0  ;;  %v1881_v40 = vsel %vm1850_vm10, %v1848_v10, %v3189_v62  ;;  %v1882_v45 = vsel %vm1850_vm10, %v1849_v57, %v3190_v14 }
 0x1a5   : > { %v3198_v9 = vpop.permute.xlu1 %3197 }
 0x1a6   : > { %v1912_v29 = vsel %vm1883_vm11, %v1879_v6, %v3194_v12  ;;  %v1913_v47 = vsel %vm1883_vm11, %v1880_v15, %v3195_v60  ;;  %v3200_v59 = vunpack.i.h.bf16 %v3198_v9  ;;  %v3199_v63 = vunpack.i.l.bf16 %v3198_v9 }
 0x1a7   : > { %v1930_v17 = vpack.c.bf16 %v1913_v47, %v1912_v29 }
 0x1a8   : > { %v1914_v28 = vsel %vm1883_vm11, %v1881_v40, %v3199_v63  ;;  %v1915_v44 = vsel %vm1883_vm11, %v1882_v45, %v3200_v59 }
 0x1a9   : > { %2532 = vmatprep.mubr.msk.bf16.mxu1 %vm1952_vm12, %v1930_v17  ;;  %v1931_v1 = vpack.c.bf16 %v1915_v44, %v1914_v28 }
 0x1ab   : > { %2533 = vmatmul.mubr.msk.bf16.gmra.mxu1 %vm1952_vm12, %v1931_v1 }
 0x1d5   : > { %v2506_v48 = vpop.f32.mrf.mxu0 }
 0x1d6   : > { %2168 = vst.msk [vmem:[%s3281_s25 + $0x10] sm:$0xff] %vm307_vm3, %v2506_v48  ;;  %v2269_v38 = vmul.f32 %v2506_v48, %v2506_v48  ;;  %v2201_v58 = vsel %vm307_vm3, %v2506_v48, 0.0 }
 0x1d7   : > { %v2039_v27 = vpop.f32.mrf.mxu0 }
 0x1d8   : > { %2166 = vst.msk [vmem:[%s3281_s25] sm:$0xff] %vm307_vm3, %v2039_v27  ;;  %v2267_v35 = vmul.f32 %v2039_v27, %v2039_v27  ;;  %v2198_v46 = vsel %vm307_vm3, %v2039_v27, 0.0  ;;  %v2302_v51 = vsel %vm307_vm3, %v2269_v38, 0.0 }
 0x1d9   : > { %v2507_v54 = vpop.f32.mrf.mxu0 }
 0x1da   : > { %2169 = vst.msk [vmem:[%s3281_s25 + $0x18] sm:$0xff] %vm307_vm3, %v2507_v54  ;;  %v2299_v19 = vsel %vm307_vm3, %v2267_v35, 0.0  ;;  %v2270_v41 = vmul.f32 %v2507_v54, %v2507_v54  ;;  %v2203_v50 = vsel %vm307_vm3, %v2507_v54, 0.0 }
 0x1db   : > { %v2042_v4 = vpop.f32.mrf.mxu0 }
 0x1dc   : > { %2167 = vst.msk [vmem:[%s3281_s25 + $0x8] sm:$0xff] %vm307_vm3, %v2042_v4  ;;  %v2199_v25 = vsel %vm307_vm3, %v2042_v4, 0.0  ;;  %v2268_v7 = vmul.f32 %v2042_v4, %v2042_v4  ;;  %v2304_v16 = vsel %vm307_vm3, %v2270_v41, 0.0 }
 0x1dd   : > { %v2200_v56 = vadd.f32 %v2199_v25, %v2198_v46 }
 0x1de   : > { %v2300_v52 = vsel %vm307_vm3, %v2268_v7, 0.0 }
 0x1df   : > { %v2202_v8 = vadd.f32 %v2201_v58, %v2200_v56  ;;  %v2301_v26 = vadd.f32 %v2300_v52, %v2299_v19 }
 0x1e1   : > { %v2303_v39 = vadd.f32 %v2302_v51, %v2301_v26  ;;  %v2204_v18 = vadd.f32 %v2203_v50, %v2202_v8 }
 0x1e3   : > { %v2305_v30 = vadd.f32 %v2304_v16, %v2303_v39 }
 0x1e9   : > { %v2510_v53 = vpop.f32.mrf.mxu0 }
 0x1ea   : > { %2172 = vst.msk [vmem:[%s3281_s25 + $0x30] sm:$0xff] %vm307_vm3, %v2510_v53  ;;  %v2273_v43 = vmul.f32 %v2510_v53, %v2510_v53  ;;  %v2209_v61 = vsel %vm307_vm3, %v2510_v53, 0.0 }
 0x1eb   : > { %v2055_v22 = vpop.f32.mrf.mxu0 }
 0x1ec   : > { %2170 = vst.msk [vmem:[%s3281_s25 + $0x20] sm:$0xff] %vm307_vm3, %v2055_v22  ;;  %v2205_v24 = vsel %vm307_vm3, %v2055_v22, 0.0  ;;  %v2271_v36 = vmul.f32 %v2055_v22, %v2055_v22  ;;  %v2310_v55 = vsel %vm307_vm3, %v2273_v43, 0.0 }
 0x1ed   : > { %v2206_v23 = vadd.f32 %v2205_v24, %v2204_v18  ;;  %v2511_v37 = vpop.f32.mrf.mxu0 }
 0x1ee   : > { %v2306_v21 = vsel %vm307_vm3, %v2271_v36, 0.0  ;;  %2173 = vst.msk [vmem:[%s3281_s25 + $0x38] sm:$0xff] %vm307_vm3, %v2511_v37  ;;  %v2274_v33 = vmul.f32 %v2511_v37, %v2511_v37  ;;  %v2211_v60 = vsel %vm307_vm3, %v2511_v37, 0.0 }
 0x1ef   : > { %v2307_v11 = vadd.f32 %v2306_v21, %v2305_v30  ;;  %v2058_v20 = vpop.f32.mrf.mxu0 }
 0x1f0   : > { %2171 = vst.msk [vmem:[%s3281_s25 + $0x28] sm:$0xff] %vm307_vm3, %v2058_v20  ;;  %v2207_v34 = vsel %vm307_vm3, %v2058_v20, 0.0  ;;  %v2272_v13 = vmul.f32 %v2058_v20, %v2058_v20  ;;  %v2312_v15 = vsel %vm307_vm3, %v2274_v33, 0.0 }
 0x1f1   : > { %v2208_v2 = vadd.f32 %v2207_v34, %v2206_v23 }
 0x1f2   : > { %v2308_v49 = vsel %vm307_vm3, %v2272_v13, 0.0 }
 0x1f3   : > { %v2210_v0 = vadd.f32 %v2209_v61, %v2208_v2  ;;  %v2309_v3 = vadd.f32 %v2308_v49, %v2307_v11 }
 0x1f5   : > { %v2311_v12 = vadd.f32 %v2310_v55, %v2309_v3  ;;  %v2212_v6 = vadd.f32 %v2211_v60, %v2210_v0 }
 0x1f7   : > { %v2313_v14 = vadd.f32 %v2312_v15, %v2311_v12 }
 0x1fd   : > { %v2514_v62 = vpop.f32.mrf.mxu0 }
 0x1fe   : > { %2176 = vst.msk [vmem:[%s3281_s25 + $0x50] sm:$0xff] %vm307_vm3, %v2514_v62  ;;  %v2277_v10 = vmul.f32 %v2514_v62, %v2514_v62  ;;  %v2217_v40 = vsel %vm307_vm3, %v2514_v62, 0.0 }
 0x1ff   : > { %v2071_v32 = vpop.f32.mrf.mxu0 }
 0x200   : > { %2174 = vst.msk [vmem:[%s3281_s25 + $0x40] sm:$0xff] %vm307_vm3, %v2071_v32  ;;  %v2213_v31 = vsel %vm307_vm3, %v2071_v32, 0.0  ;;  %v2275_v29 = vmul.f32 %v2071_v32, %v2071_v32  ;;  %v2318_v48 = vsel %vm307_vm3, %v2277_v10, 0.0 }
 0x201   : > { %v2214_v47 = vadd.f32 %v2213_v31, %v2212_v6  ;;  %v2515_v42 = vpop.f32.mrf.mxu0 }
 0x202   : > { %v2314_v5 = vsel %vm307_vm3, %v2275_v29, 0.0  ;;  %2177 = vst.msk [vmem:[%s3281_s25 + $0x58] sm:$0xff] %vm307_vm3, %v2515_v42  ;;  %v2278_v45 = vmul.f32 %v2515_v42, %v2515_v42  ;;  %v2219_v27 = vsel %vm307_vm3, %v2515_v42, 0.0 }
 0x203   : > { %v2315_v17 = vadd.f32 %v2314_v5, %v2313_v14  ;;  %v2074_v9 = vpop.f32.mrf.mxu0 }
 0x204   : > { %2175 = vst.msk [vmem:[%s3281_s25 + $0x48] sm:$0xff] %vm307_vm3, %v2074_v9  ;;  %v2215_v57 = vsel %vm307_vm3, %v2074_v9, 0.0  ;;  %v2276_v59 = vmul.f32 %v2074_v9, %v2074_v9  ;;  %v2320_v4 = vsel %vm307_vm3, %v2278_v45, 0.0 }
 0x205   : > { %v2216_v63 = vadd.f32 %v2215_v57, %v2214_v47 }
 0x206   : > { %v2316_v28 = vsel %vm307_vm3, %v2276_v59, 0.0 }
 0x207   : > { %v2218_v44 = vadd.f32 %v2217_v40, %v2216_v63  ;;  %v2317_v1 = vadd.f32 %v2316_v28, %v2315_v17 }
 0x209   : > { %v2319_v54 = vadd.f32 %v2318_v48, %v2317_v1  ;;  %v2220_v35 = vadd.f32 %v2219_v27, %v2218_v44 }
 0x20b   : > { %v2321_v38 = vadd.f32 %v2320_v4, %v2319_v54 }
 0x211   : > { %v2518_v46 = vpop.f32.mrf.mxu0 }
 0x212   : > { %2180 = vst.msk [vmem:[%s3281_s25 + $0x70] sm:$0xff] %vm307_vm3, %v2518_v46  ;;  %v2281_v8 = vmul.f32 %v2518_v46, %v2518_v46  ;;  %v2225_v18 = vsel %vm307_vm3, %v2518_v46, 0.0 }
 0x213   : > { %v2087_v25 = vpop.f32.mrf.mxu0 }
 0x214   : > { %2178 = vst.msk [vmem:[%s3281_s25 + $0x60] sm:$0xff] %vm307_vm3, %v2087_v25  ;;  %v2221_v7 = vsel %vm307_vm3, %v2087_v25, 0.0  ;;  %v2279_v56 = vmul.f32 %v2087_v25, %v2087_v25  ;;  %v2326_v24 = vsel %vm307_vm3, %v2281_v8, 0.0 }
 0x215   : > { %v2519_v58 = vpop.f32.mrf.mxu0  ;;  %v2222_v41 = vadd.f32 %v2221_v7, %v2220_v35 }
 0x216   : > { %v2322_v19 = vsel %vm307_vm3, %v2279_v56, 0.0  ;;  %2181 = vst.msk [vmem:[%s3281_s25 + $0x78] sm:$0xff] %vm307_vm3, %v2519_v58  ;;  %v2282_v16 = vmul.f32 %v2519_v58, %v2519_v58  ;;  %v2227_v36 = vsel %vm307_vm3, %v2519_v58, 0.0 }
 0x217   : > { %v2090_v52 = vpop.f32.mrf.mxu0  ;;  %v2323_v50 = vadd.f32 %v2322_v19, %v2321_v38 }
 0x218   : > { %2179 = vst.msk [vmem:[%s3281_s25 + $0x68] sm:$0xff] %vm307_vm3, %v2090_v52  ;;  %v2223_v26 = vsel %vm307_vm3, %v2090_v52, 0.0  ;;  %v2280_v51 = vmul.f32 %v2090_v52, %v2090_v52  ;;  %v2328_v21 = vsel %vm307_vm3, %v2282_v16, 0.0 }
 0x219   : > { %v2224_v39 = vadd.f32 %v2223_v26, %v2222_v41 }
 0x21a   : > { %v2324_v30 = vsel %vm307_vm3, %v2280_v51, 0.0 }
 0x21b   : > { %v2226_v53 = vadd.f32 %v2225_v18, %v2224_v39  ;;  %v2325_v22 = vadd.f32 %v2324_v30, %v2323_v50 }
 0x21d   : > { %v2327_v23 = vadd.f32 %v2326_v24, %v2325_v22  ;;  %v2228_v37 = vadd.f32 %v2227_v36, %v2226_v53 }
 0x21f   : > { %v2329_v11 = vadd.f32 %v2328_v21, %v2327_v23 }
 0x225   : > { %v2522_v20 = vpop.f32.mrf.mxu1 }
 0x226   : > { %2184 = vst.msk [vmem:[%s3281_s25 + $0x90] sm:$0xff] %vm307_vm3, %v2522_v20  ;;  %v2285_v32 = vmul.f32 %v2522_v20, %v2522_v20  ;;  %v2233_v29 = vsel %vm307_vm3, %v2522_v20, 0.0 }
 0x227   : > { %v2103_v43 = vpop.f32.mrf.mxu1 }
 0x228   : > { %2182 = vst.msk [vmem:[%s3281_s25 + $0x80] sm:$0xff] %vm307_vm3, %v2103_v43  ;;  %v2283_v0 = vmul.f32 %v2103_v43, %v2103_v43  ;;  %v2229_v3 = vsel %vm307_vm3, %v2103_v43, 0.0  ;;  %v2334_v5 = vsel %vm307_vm3, %v2285_v32, 0.0 }
 0x229   : > { %v2523_v34 = vpop.f32.mrf.mxu1  ;;  %v2230_v6 = vadd.f32 %v2229_v3, %v2228_v37 }
 0x22a   : > { %2185 = vst.msk [vmem:[%s3281_s25 + $0x98] sm:$0xff] %vm307_vm3, %v2523_v34  ;;  %v2330_v60 = vsel %vm307_vm3, %v2283_v0, 0.0  ;;  %v2286_v17 = vmul.f32 %v2523_v34, %v2523_v34  ;;  %v2235_v59 = vsel %vm307_vm3, %v2523_v34, 0.0 }
 0x22b   : > { %v2106_v13 = vpop.f32.mrf.mxu1  ;;  %v2331_v14 = vadd.f32 %v2330_v60, %v2329_v11 }
 0x22c   : > { %2183 = vst.msk [vmem:[%s3281_s25 + $0x88] sm:$0xff] %vm307_vm3, %v2106_v13  ;;  %v2284_v55 = vmul.f32 %v2106_v13, %v2106_v13  ;;  %v2231_v12 = vsel %vm307_vm3, %v2106_v13, 0.0  ;;  %v2336_v44 = vsel %vm307_vm3, %v2286_v17, 0.0 }
 0x22d   : > { %v2232_v62 = vadd.f32 %v2231_v12, %v2230_v6 }
 0x22e   : > { %v2332_v15 = vsel %vm307_vm3, %v2284_v55, 0.0 }
 0x22f   : > { %v2333_v31 = vadd.f32 %v2332_v15, %v2331_v14  ;;  %v2234_v47 = vadd.f32 %v2233_v29, %v2232_v62 }
 0x231   : > { %v2335_v10 = vadd.f32 %v2334_v5, %v2333_v31  ;;  %v2236_v45 = vadd.f32 %v2235_v59, %v2234_v47 }
 0x233   : > { %v2337_v54 = vadd.f32 %v2336_v44, %v2335_v10 }
 0x23b   : > { %v2526_v2 = vpop.f32.mrf.mxu1 }
 0x23c   : > { %2188 = vst.msk [vmem:[%s3281_s25 + $0xb0] sm:$0xff] %vm307_vm3, %v2526_v2  ;;  %v2289_v25 = vmul.f32 %v2526_v2, %v2526_v2  ;;  %v2241_v56 = vsel %vm307_vm3, %v2526_v2, 0.0 }
 0x23d   : > { %v2119_v61 = vpop.f32.mrf.mxu1 }
 0x23e   : > { %2186 = vst.msk [vmem:[%s3281_s25 + $0xa0] sm:$0xff] %vm307_vm3, %v2119_v61  ;;  %v2287_v9 = vmul.f32 %v2119_v61, %v2119_v61  ;;  %v2237_v63 = vsel %vm307_vm3, %v2119_v61, 0.0  ;;  %v2342_v19 = vsel %vm307_vm3, %v2289_v25, 0.0 }
 0x23f   : > { %v2527_v33 = vpop.f32.mrf.mxu1  ;;  %v2238_v27 = vadd.f32 %v2237_v63, %v2236_v45 }
 0x240   : > { %2189 = vst.msk [vmem:[%s3281_s25 + $0xb8] sm:$0xff] %vm307_vm3, %v2527_v33  ;;  %v2338_v1 = vsel %vm307_vm3, %v2287_v9, 0.0  ;;  %v2290_v41 = vmul.f32 %v2527_v33, %v2527_v33  ;;  %v2243_v26 = vsel %vm307_vm3, %v2527_v33, 0.0 }
 0x241   : > { %v2122_v49 = vpop.f32.mrf.mxu1  ;;  %v2339_v38 = vadd.f32 %v2338_v1, %v2337_v54 }
 0x242   : > { %2187 = vst.msk [vmem:[%s3281_s25 + $0xa8] sm:$0xff] %vm307_vm3, %v2122_v49  ;;  %v2288_v40 = vmul.f32 %v2122_v49, %v2122_v49  ;;  %v2239_v48 = vsel %vm307_vm3, %v2122_v49, 0.0  ;;  %v2344_v18 = vsel %vm307_vm3, %v2290_v41, 0.0 }
 0x243   : > { %v2240_v46 = vadd.f32 %v2239_v48, %v2238_v27 }
 0x244   : > { %v2340_v4 = vsel %vm307_vm3, %v2288_v40, 0.0 }
 0x245   : > { %v2341_v7 = vadd.f32 %v2340_v4, %v2339_v38  ;;  %v2242_v58 = vadd.f32 %v2241_v56, %v2240_v46 }
 0x247   : > { %v2343_v8 = vadd.f32 %v2342_v19, %v2341_v7  ;;  %v2244_v39 = vadd.f32 %v2243_v26, %v2242_v58 }
 0x249   : > { %v2345_v22 = vadd.f32 %v2344_v18, %v2343_v8 }
 0x253   : > { %v2530_v42 = vpop.f32.mrf.mxu1 }
 0x254   : > { %2192 = vst.msk [vmem:[%s3281_s25 + $0xd0] sm:$0xff] %vm307_vm3, %v2530_v42  ;;  %v2293_v37 = vmul.f32 %v2530_v42, %v2530_v42  ;;  %v2249_v11 = vsel %vm307_vm3, %v2530_v42, 0.0 }
 0x255   : > { %v2135_v57 = vpop.f32.mrf.mxu1 }
 0x256   : > { %2190 = vst.msk [vmem:[%s3281_s25 + $0xc0] sm:$0xff] %vm307_vm3, %v2135_v57  ;;  %v2291_v52 = vmul.f32 %v2135_v57, %v2135_v57  ;;  %v2245_v51 = vsel %vm307_vm3, %v2135_v57, 0.0  ;;  %v2350_v34 = vsel %vm307_vm3, %v2293_v37, 0.0 }
 0x257   : > { %v2531_v28 = vpop.f32.mrf.mxu1  ;;  %v2246_v53 = vadd.f32 %v2245_v51, %v2244_v39 }
 0x258   : > { %2193 = vst.msk [vmem:[%s3281_s25 + $0xd8] sm:$0xff] %vm307_vm3, %v2531_v28  ;;  %v2346_v16 = vsel %vm307_vm3, %v2291_v52, 0.0  ;;  %v2294_v13 = vmul.f32 %v2531_v28, %v2531_v28  ;;  %v2251_v33 = vsel %vm307_vm3, %v2531_v28, 0.0 }
 0x259   : > { %v2138_v35 = vpop.f32.mrf.mxu1  ;;  %v2347_v36 = vadd.f32 %v2346_v16, %v2345_v22 }
 0x25a   : > { %2191 = vst.msk [vmem:[%s3281_s25 + $0xc8] sm:$0xff] %vm307_vm3, %v2138_v35  ;;  %v2292_v50 = vmul.f32 %v2138_v35, %v2138_v35  ;;  %v2247_v30 = vsel %vm307_vm3, %v2138_v35, 0.0  ;;  %v2352_v60 = vsel %vm307_vm3, %v2294_v13, 0.0 }
 0x25b   : > { %v2248_v23 = vadd.f32 %v2247_v30, %v2246_v53 }
 0x25c   : > { %v2348_v24 = vsel %vm307_vm3, %v2292_v50, 0.0 }
 0x25d   : > { %v2349_v21 = vadd.f32 %v2348_v24, %v2347_v36  ;;  %v2250_v20 = vadd.f32 %v2249_v11, %v2248_v23 }
 0x25f   : > { %v2351_v2 = vadd.f32 %v2350_v34, %v2349_v21  ;;  %v2252_v3 = vadd.f32 %v2251_v33, %v2250_v20 }
 0x261   : > { %v2353_v15 = vadd.f32 %v2352_v60, %v2351_v2 }
 0x26b   : > { %v2534_v43 = vpop.f32.mrf.mxu1 }
 0x26c   : > { %2196 = vst.msk [vmem:[%s3281_s25 + $0xf0] sm:$0xff] %vm307_vm3, %v2534_v43  ;;  %v2297_v62 = vmul.f32 %v2534_v43, %v2534_v43  ;;  %v2257_v42 = vsel %vm307_vm3, %v2534_v43, 0.0 }
 0x26d   : > { %v2151_v61 = vpop.f32.mrf.mxu1 }
 0x26e   : > { %2194 = vst.msk [vmem:[%s3281_s25 + $0xe0] sm:$0xff] %vm307_vm3, %v2151_v61  ;;  %v2253_v49 = vsel %vm307_vm3, %v2151_v61, 0.0  ;;  %v2295_v0 = vmul.f32 %v2151_v61, %v2151_v61  ;;  %v2358_v57 = vsel %vm307_vm3, %v2297_v62, 0.0 }
 0x26f   : > { %v2535_v55 = vpop.f32.mrf.mxu1  ;;  %v2254_v6 = vadd.f32 %v2253_v49, %v2252_v3 }
 0x270   : > { %v2354_v12 = vsel %vm307_vm3, %v2295_v0, 0.0  ;;  %2197 = vst.msk [vmem:[%s3281_s25 + $0xf8] sm:$0xff] %vm307_vm3, %v2535_v55  ;;  %v2298_v5 = vmul.f32 %v2535_v55, %v2535_v55  ;;  %v2259_v59 = vsel %vm307_vm3, %v2535_v55, 0.0 }
 0x271   : > { %v2154_v14 = vpop.f32.mrf.mxu1  ;;  %v2355_v29 = vadd.f32 %v2354_v12, %v2353_v15 }
 0x272   : > { %2195 = vst.msk [vmem:[%s3281_s25 + $0xe8] sm:$0xff] %vm307_vm3, %v2154_v14  ;;  %v2255_v32 = vsel %vm307_vm3, %v2154_v14, 0.0  ;;  %v2296_v31 = vmul.f32 %v2154_v14, %v2154_v14  ;;  %v2360_v45 = vsel %vm307_vm3, %v2298_v5, 0.0 }
 0x273   : > { %v2256_v47 = vadd.f32 %v2255_v32, %v2254_v6 }
 0x274   : > { %v2356_v17 = vsel %vm307_vm3, %v2296_v31, 0.0 }
 0x275   : > { %v2258_v9 = vadd.f32 %v2257_v42, %v2256_v47  ;;  %v2357_v10 = vadd.f32 %v2356_v17, %v2355_v29 }
 0x277   : > { %v2260_v63 = vadd.f32 %v2259_v59, %v2258_v9  ;;  %v2359_v40 = vadd.f32 %v2358_v57, %v2357_v10 }
 0x279   : > { %v2261_v28 = vrot.slane %v2260_v63, 4  ;;  %v2361_v44 = vadd.f32 %v2360_v45, %v2359_v40 }
 0x27b   : > { %v2262_v1 = vadd.f32 %v2261_v28, %v2260_v63  ;;  %v2362_v48 = vrot.slane %v2361_v44, 4 }
 0x27d   : > { %v2263_v27 = vrot.slane %v2262_v1, 2  ;;  %v2363_v54 = vadd.f32 %v2362_v48, %v2361_v44 }
 0x27f   : > { %v2264_v35 = vadd.f32 %v2263_v27, %v2262_v1  ;;  %v2364_v4 = vrot.slane %v2363_v54, 2 }
 0x281   : > { %v2265_v38 = vrot.slane %v2264_v35, 1  ;;  %v2365_v46 = vadd.f32 %v2364_v4, %v2363_v54 }
 0x283   : > { %v2366_v25 = vrot.slane %v2365_v46, 1  ;;  %v2266_v7 = vadd.f32 %v2265_v38, %v2264_v35  ;;  %2372 = sbr.rel (%p2453_p4) target bundleno = 650 (0x28a), region = 44 }
 0x285   : > { %v2367_v56 = vadd.f32 %v2366_v25, %v2365_v46 }
 0x287   : > { %v2369_v58 = vsel %vm2368_vm13, %v2266_v7, %v2367_v56 }
 0x288   : > { %vm2373_vm14 = vcmask 25600  }
 0x289   : > { %2374 = vst.msk [vmem:[%s4403_s5] sm:$0x3] %vm2373_vm14, %v2369_v58 }
 0x28a PF: > { %p2474_p5 = scmp.le.s32.totalorder %s3267_s2, 0 }
 0x28c   : > { %2378 = sbr.rel (%p2474_p5) target bundleno = 661 (0x295), region = 48 }
 0x291   : > { %v2379_v19 = vld [vmem:[%s4403_s5] sm:$0x3]  ;;  %vm2381_vm15 = vcmask 25600  }
 0x292   : > { %v2380_v41 = vadd.f32 %v2379_v19, %v2369_v58 }
 0x294   : > { %2382 = vst.msk [vmem:[%s4403_s5] sm:$0x3] %vm2381_vm15, %v2380_v41 }
 0x295 PF: > { %s16_s18 = sadd.s32 1, %s3220_s18  }
 0x296   : > { %p13_p6 = scmp.ge.s32.totalorder %s16_s18, 4  }
 0x298   :  { %15 = sbr.rel (!%p13_p6) target bundleno = 1 (0x1), region = 89 }

</bundles_post_ra>
